<compile_context>
chip_gen: v6e
topology: v6e:2x2x1
jax: 0.10.0
libtpu: 0.0.40
codegen_flags: <defaults>
</compile_context>

<pallas_src>
import math

import jax
import jax.numpy as jnp
from jax import lax
from jax.experimental import pallas as pl
from jax.experimental.pallas import tpu as pltpu


PARAM_NAMES = [
    "ln_attn_w", "ln_attn_b",
    "attn_in_w", "attn_in_b", "attn_pos_w", "attn_pos_b", "attn_out_w", "attn_out_b",
    "r_w_bias", "r_r_bias",
    "ln_src_w", "ln_src_b",
    "src_q_w", "src_q_b", "src_kv_w", "src_kv_b", "src_out_w", "src_out_b",
    "ln_gate_w", "ln_gate_b", "gate_w", "gate_b",
    "ln_ffn_w", "ln_ffn_b", "ffn_w1", "ffn_b1", "ffn_w2", "ffn_b2",
]


# ------------------------------------------------------------------ shared numeric helpers (f32)
def _layer_norm(x, w, b, eps=1e-5):
    x = x.astype(jnp.float32)
    mu = jnp.mean(x, axis=-1, keepdims=True)
    xc = x - mu
    var = jnp.mean(xc * xc, axis=-1, keepdims=True)
    return xc * lax.rsqrt(var + eps) * w.astype(jnp.float32) + b.astype(jnp.float32)


def _softmax(s):
    m = jnp.max(s, axis=-1, keepdims=True)
    e = jnp.exp(s - m)
    return e / jnp.sum(e, axis=-1, keepdims=True)


def _rel_shift(bd_full):
    """bd_full: [Z, T, 2T-1].  out[z, i, j] = bd_full[z, i, T-1-i+j] for j < T.

    Vectorized Transformer-XL relative shift: binary-decomposed per-row left roll
    (log2(T) lane rotations + selects) instead of T one-row slices.
    """
    _, t, p = bd_full.shape
    row = lax.broadcasted_iota(jnp.int32, (t, p), 0)          # value = query index i
    shift = (t - 1) - row                                     # left-shift amount per row
    cur = bd_full
    k = 0
    while (1 << k) < t:
        step = 1 << k
        rolled = jnp.concatenate([cur[:, :, step:], cur[:, :, :step]], axis=2)  # left roll by step
        take = ((shift >> k) & 1) == 1
        cur = jnp.where(take[None, :, :], rolled, cur)
        k += 1
    return cur[:, :, :t]


# ------------------------------------------------------------------ in-kernel block forward
def _block_forward(x_blk, ctx_blk, pos, amask, cmask, p):
    """x_blk:[Bb,T,H] ctx_blk:[Bb,Td,H] pos:[2T-1,H] amask:[Bb,1,T] cmask:[Bb,1,Td]."""
    bb, t, h = x_blk.shape
    td = ctx_blk.shape[1]
    nh, dh = p["r_w_bias"].shape
    z = nh * bb
    scale = jnp.float32(1.0 / math.sqrt(dh))
    neg = jnp.float32(-1e30)
    wdt = p["attn_in_w"].dtype                 # MXU operand dtype (f32 or bf16)

    x2 = x_blk.reshape(bb * t, h)
    ctx2 = ctx_blk.reshape(bb * td, h)
    xf = x2.astype(jnp.float32)

    def mm(a, w, b):                           # [M,K]@[K,N] + [1,N], f32 accumulate
        y = jnp.dot(a.astype(wdt), w.astype(wdt), preferred_element_type=jnp.float32)
        return y + b.astype(jnp.float32)

    def bdot(eq, a, b):                        # batched-over-heads matmul, f32 accumulate
        return jnp.einsum(eq, a.astype(wdt), b.astype(wdt),
                          preferred_element_type=jnp.float32)

    def to_heads(m, seq):                      # [Bb*seq, nh*dh] -> [Z, seq, dh], z = h*Bb + b
        parts = [m[:, i * dh:(i + 1) * dh].reshape(bb, seq, dh) for i in range(nh)]
        return jnp.stack(parts, axis=0).reshape(z, seq, dh)

    def from_heads(m, seq):                    # [Z, seq, dh] -> [Bb*seq, nh*dh]
        return jnp.concatenate(
            [m[i * bb:(i + 1) * bb].reshape(bb * seq, dh) for i in range(nh)], axis=1)

    # ---------------- relative self-attention ----------------
    qn = _layer_norm(x2, p["ln_attn_w"], p["ln_attn_b"])
    qkv = mm(qn, p["attn_in_w"], p["attn_in_b"])                 # [Bb*T, 3H]
    r = mm(pos, p["attn_pos_w"], p["attn_pos_b"])                # [2T-1, H]
    p_len = r.shape[0]

    q_z = to_heads(qkv[:, :h], t)
    k_z = to_heads(qkv[:, h:2 * h], t)
    v_z = to_heads(qkv[:, 2 * h:], t)

    r_h = jnp.stack([r[:, i * dh:(i + 1) * dh] for i in range(nh)], axis=0)     # [nh, P, dh]
    r_z = jnp.broadcast_to(r_h[:, None], (nh, bb, p_len, dh)).reshape(z, p_len, dh)
    rwb_z = jnp.broadcast_to(p["r_w_bias"].astype(jnp.float32)[:, None, None, :],
                             (nh, bb, 1, dh)).reshape(z, 1, dh)
    rrb_z = jnp.broadcast_to(p["r_r_bias"].astype(jnp.float32)[:, None, None, :],
                             (nh, bb, 1, dh)).reshape(z, 1, dh)
    amask_z = jnp.broadcast_to(amask[None], (nh, bb, 1, t)).reshape(z, 1, t) > 0.5

    ac = bdot("zqd,zkd->zqk", q_z + rwb_z, k_z)                  # [Z, T, T]   content term
    bd = _rel_shift(bdot("zqd,zpd->zqp", q_z + rrb_z, r_z))      # [Z, T, T]   positional term
    sc = jnp.where(amask_z, neg, (ac + bd) * scale)
    pa = _softmax(sc)
    o_z = bdot("zqk,zkd->zqd", pa, v_z)                          # [Z, T, dh]
    present = mm(from_heads(o_z, t), p["attn_out_w"], p["attn_out_b"]) + xf

    # ---------------- context (encoder-decoder) attention ----------------
    q2 = mm(_layer_norm(x2, p["ln_src_w"], p["ln_src_b"]), p["src_q_w"], p["src_q_b"])
    kv = mm(ctx2, p["src_kv_w"], p["src_kv_b"])                  # [Bb*Td, 2H]
    q2_z = to_heads(q2, t)
    k2_z = to_heads(kv[:, :h], td)
    v2_z = to_heads(kv[:, h:], td)
    cmask_z = jnp.broadcast_to(cmask[None], (nh, bb, 1, td)).reshape(z, 1, td) > 0.5

    sc2 = jnp.where(cmask_z, neg, bdot("zqd,zkd->zqk", q2_z, k2_z) * scale)
    pc = _softmax(sc2)
    o2_z = bdot("zqk,zkd->zqd", pc, v2_z)
    past = mm(from_heads(o2_z, t), p["src_out_w"], p["src_out_b"]) + xf

    # ---------------- gate (LN over [past ; present] without materializing the 2H concat) -------
    lgw = p["ln_gate_w"].astype(jnp.float32)
    lgb = p["ln_gate_b"].astype(jnp.float32)
    inv2h = jnp.float32(1.0 / (2 * h))
    mean = (jnp.sum(past, -1, keepdims=True) + jnp.sum(present, -1, keepdims=True)) * inv2h
    dpa = past - mean
    dpr = present - mean
    var = (jnp.sum(dpa * dpa, -1, keepdims=True)
           + jnp.sum(dpr * dpr, -1, keepdims=True)) * inv2h
    rstd = lax.rsqrt(var + 1e-5)
    n_past = dpa * rstd * lgw[:, :h] + lgb[:, :h]
    n_pres = dpr * rstd * lgw[:, h:] + lgb[:, h:]
    logits = (jnp.dot(n_past.astype(wdt), p["gate_w"][:h].astype(wdt),
                      preferred_element_type=jnp.float32)
              + jnp.dot(n_pres.astype(wdt), p["gate_w"][h:].astype(wdt),
                        preferred_element_type=jnp.float32)
              + p["gate_b"].astype(jnp.float32))
    gate = jax.nn.sigmoid(logits)
    xg = gate * present + (1.0 - gate) * past

    # ---------------- position-wise feed forward ----------------
    fin = _layer_norm(xg, p["ln_ffn_w"], p["ln_ffn_b"])
    h1 = jnp.maximum(mm(fin, p["ffn_w1"], p["ffn_b1"]), 0.0)
    out = mm(h1, p["ffn_w2"], p["ffn_b2"]) + xg                  # ffn_scale = 1.0, non-macaron
    return out.reshape(bb, t, h)


# ------------------------------------------------------------------ Pallas kernel / wrapper
def gate_layer_kernel(*refs):
    x_ref, ctx_ref, pos_ref, am_ref, cm_ref = refs[:5]
    p_refs = refs[5:5 + len(PARAM_NAMES)]
    o_ref = refs[5 + len(PARAM_NAMES)]
    params = {k: r[...] for k, r in zip(PARAM_NAMES, p_refs)}
    out = _block_forward(x_ref[...], ctx_ref[...], pos_ref[...], am_ref[...], cm_ref[...], params)
    o_ref[...] = out.astype(o_ref.dtype)


def relative_gate_encoder_layer(x, ctx, pos, attn_mask, ctx_mask, params, *, block_b=2):
    """x:[B,T,H] ctx:[B,Td,H] pos:[2T-1,H] attn_mask:[B,1,T] ctx_mask:[B,1,Td] -> [B,T,H] f32."""
    B, T, H = x.shape
    Td = ctx.shape[1]
    assert B % block_b == 0, "batch must be divisible by block_b (pad batch if needed)"

    def bspec(*tail):
        nd = 1 + len(tail)
        return pl.BlockSpec((block_b,) + tail, lambda i, _nd=nd: (i,) + (0,) * (_nd - 1))

    def fspec(a):
        nd = a.ndim
        return pl.BlockSpec(a.shape, lambda i, _nd=nd: (0,) * _nd)

    ordered_params = [params[name] for name in PARAM_NAMES]
    inputs = [x, ctx, pos, attn_mask, ctx_mask] + ordered_params
    in_specs = ([bspec(T, H), bspec(Td, H), fspec(pos), bspec(1, T), bspec(1, Td)]
                + [fspec(w) for w in ordered_params])

    return pl.pallas_call(
        gate_layer_kernel,
        out_shape=jax.ShapeDtypeStruct((B, T, H), jnp.float32),
        grid=(B // block_b,),
        in_specs=in_specs,
        out_specs=pl.BlockSpec((block_b, T, H), lambda i: (i, 0, 0)),
        compiler_params=pltpu.CompilerParams(
            dimension_semantics=("parallel",),          # batch blocks shard across TensorCores
            vmem_limit_bytes=32 * 1024 * 1024,
        ),
    )(*inputs)


# ------------------------------------------------------------------ pure-JAX reference (independent)
def _reference_forward(x, ctx, pos, attn_mask, ctx_mask, params):
    B, T, H = x.shape
    nh, dh = params["r_w_bias"].shape
    scale = 1.0 / math.sqrt(dh)
    neg = jnp.float32(-1e30)
    outs = []
    for b in range(B):
        xb, cb, am, cm = x[b], ctx[b], attn_mask[b], ctx_mask[b]
        qn = _layer_norm(xb, params["ln_attn_w"], params["ln_attn_b"])
        qkv = qn @ params["attn_in_w"] + params["attn_in_b"]
        r = pos @ params["attn_pos_w"] + params["attn_pos_b"]
        q, k, v = qkv[:, :H], qkv[:, H:2 * H], qkv[:, 2 * H:]
        heads = []
        for hh in range(nh):
            sl = slice(hh * dh, (hh + 1) * dh)
            qh, kh, vh, rh = q[:, sl], k[:, sl], v[:, sl], r[:, sl]
            ac = (qh + params["r_w_bias"][hh]) @ kh.T
            bdf = (qh + params["r_r_bias"][hh]) @ rh.T
            bd = jnp.stack([bdf[i, T - 1 - i:2 * T - 1 - i] for i in range(T)], axis=0)
            sc = jnp.where(am > 0.5, neg, (ac + bd) * scale)
            heads.append(_softmax(sc) @ vh)
        present = jnp.concatenate(heads, -1) @ params["attn_out_w"] + params["attn_out_b"] + xb

        q2 = _layer_norm(xb, params["ln_src_w"], params["ln_src_b"]) @ params["src_q_w"] + params["src_q_b"]
        kv = cb @ params["src_kv_w"] + params["src_kv_b"]
        k2, v2 = kv[:, :H], kv[:, H:]
        heads = []
        for hh in range(nh):
            sl = slice(hh * dh, (hh + 1) * dh)
            sc = jnp.where(cm > 0.5, neg, (q2[:, sl] @ k2[:, sl].T) * scale)
            heads.append(_softmax(sc) @ v2[:, sl])
        past = jnp.concatenate(heads, -1) @ params["src_out_w"] + params["src_out_b"] + xb

        gi = _layer_norm(jnp.concatenate([past, present], -1),
                         params["ln_gate_w"], params["ln_gate_b"])
        gate = jax.nn.sigmoid(gi @ params["gate_w"] + params["gate_b"])
        xg = gate * present + (1.0 - gate) * past

        fo = jnp.maximum(_layer_norm(xg, params["ln_ffn_w"], params["ln_ffn_b"])
                         @ params["ffn_w1"] + params["ffn_b1"], 0.0)
        outs.append(fo @ params["ffn_w2"] + params["ffn_b2"] + xg)
    return jnp.stack(outs, axis=0)


# ------------------------------------------------------------------ params / main
def init_params(key, H, inner, nh):
    dh = H // nh
    ks = iter(jax.random.split(key, 32))

    def w(shape, s=0.05):
        return jax.random.normal(next(ks), shape, jnp.float32) * s

    return {
        "ln_attn_w": jnp.ones((1, H), jnp.float32), "ln_attn_b": jnp.zeros((1, H), jnp.float32),
        "attn_in_w": w((H, 3 * H)), "attn_in_b": w((1, 3 * H)),
        "attn_pos_w": w((H, H)), "attn_pos_b": w((1, H)),
        "attn_out_w": w((H, H)), "attn_out_b": w((1, H)),
        "r_w_bias": w((nh, dh)), "r_r_bias": w((nh, dh)),
        "ln_src_w": jnp.ones((1, H), jnp.float32), "ln_src_b": jnp.zeros((1, H), jnp.float32),
        "src_q_w": w((H, H)), "src_q_b": w((1, H)),
        "src_kv_w": w((H, 2 * H)), "src_kv_b": w((1, 2 * H)),
        "src_out_w": w((H, H)), "src_out_b": w((1, H)),
        "ln_gate_w": jnp.ones((1, 2 * H), jnp.float32), "ln_gate_b": jnp.zeros((1, 2 * H), jnp.float32),
        "gate_w": w((2 * H, H)), "gate_b": w((1, H)),
        "ln_ffn_w": jnp.ones((1, H), jnp.float32), "ln_ffn_b": jnp.zeros((1, H), jnp.float32),
        "ffn_w1": w((H, inner)), "ffn_b1": w((1, inner)),
        "ffn_w2": w((inner, H)), "ffn_b2": w((1, H)),
    }


if __name__ == "__main__":
    B, T, Td, H, nh, inner = 4, 8, 8, 32, 4, 64
    P = 2 * T - 1

    key = jax.random.PRNGKey(0)
    k_x, k_ctx, k_pos, k_par = jax.random.split(key, 4)

    x = jax.random.normal(k_x, (B, T, H), jnp.float32)
    ctx = jax.random.normal(k_ctx, (B, Td, H), jnp.float32)
    pos = jax.random.normal(k_pos, (P, H), jnp.float32)      # relative positions T-1 ... -(T-1)

    # float mask, 1.0 = padded key position
    attn_mask = jnp.zeros((B, 1, T), jnp.float32).at[1, 0, 6:].set(1.0)
    ctx_mask = jnp.zeros((B, 1, Td), jnp.float32).at[1, 0, 5:].set(1.0).at[3, 0, 6:].set(1.0)

    params = init_params(k_par, H, inner, nh)

    # ---- f32 run: tight correctness check against an independent pure-JAX reference ----
    out = relative_gate_encoder_layer(x, ctx, pos, attn_mask, ctx_mask, params, block_b=2)
    out = jax.block_until_ready(out)
    ref = _reference_forward(x, ctx, pos, attn_mask, ctx_mask, params)

    assert out.shape == (B, T, H)
    assert bool(jnp.all(jnp.isfinite(out)))
    assert bool(jnp.allclose(out, ref, atol=5e-4, rtol=5e-4)), "kernel/reference mismatch (f32)"

    # ---- bf16 weights/activations run (MXU-native on v6e/v7x), f32 accumulation in-kernel ----
    params_bf16 = {k: v.astype(jnp.bfloat16) for k, v in params.items()}
    out_bf16 = relative_gate_encoder_layer(
        x.astype(jnp.bfloat16), ctx.astype(jnp.bfloat16), pos.astype(jnp.bfloat16),
        attn_mask, ctx_mask, params_bf16, block_b=2)
    out_bf16 = jax.block_until_ready(out_bf16)
    assert bool(jnp.all(jnp.isfinite(out_bf16)))
    assert bool(jnp.allclose(out_bf16, ref, atol=0.1, rtol=0.1)), "kernel/reference mismatch (bf16)"

    print("KERNEL_OK")
</pallas_src>

<mosaic_0001>
module attributes {stable_mosaic.version = 11 : i64} {
  func.func @gate_layer_kernel(%arg0: i32, %arg1: memref<2x8x32xf32, #tpu.memory_space<vmem>>, %arg2: memref<2x8x32xf32, #tpu.memory_space<vmem>>, %arg3: memref<15x32xf32, #tpu.memory_space<vmem>>, %arg4: memref<2x1x8xf32, #tpu.memory_space<vmem>>, %arg5: memref<2x1x8xf32, #tpu.memory_space<vmem>>, %arg6: memref<1x32xf32, #tpu.memory_space<vmem>>, %arg7: memref<1x32xf32, #tpu.memory_space<vmem>>, %arg8: memref<32x96xf32, #tpu.memory_space<vmem>>, %arg9: memref<1x96xf32, #tpu.memory_space<vmem>>, %arg10: memref<32x32xf32, #tpu.memory_space<vmem>>, %arg11: memref<1x32xf32, #tpu.memory_space<vmem>>, %arg12: memref<32x32xf32, #tpu.memory_space<vmem>>, %arg13: memref<1x32xf32, #tpu.memory_space<vmem>>, %arg14: memref<4x8xf32, #tpu.memory_space<vmem>>, %arg15: memref<4x8xf32, #tpu.memory_space<vmem>>, %arg16: memref<1x32xf32, #tpu.memory_space<vmem>>, %arg17: memref<1x32xf32, #tpu.memory_space<vmem>>, %arg18: memref<32x32xf32, #tpu.memory_space<vmem>>, %arg19: memref<1x32xf32, #tpu.memory_space<vmem>>, %arg20: memref<32x64xf32, #tpu.memory_space<vmem>>, %arg21: memref<1x64xf32, #tpu.memory_space<vmem>>, %arg22: memref<32x32xf32, #tpu.memory_space<vmem>>, %arg23: memref<1x32xf32, #tpu.memory_space<vmem>>, %arg24: memref<1x64xf32, #tpu.memory_space<vmem>>, %arg25: memref<1x64xf32, #tpu.memory_space<vmem>>, %arg26: memref<64x32xf32, #tpu.memory_space<vmem>>, %arg27: memref<1x32xf32, #tpu.memory_space<vmem>>, %arg28: memref<1x32xf32, #tpu.memory_space<vmem>>, %arg29: memref<1x32xf32, #tpu.memory_space<vmem>>, %arg30: memref<32x64xf32, #tpu.memory_space<vmem>>, %arg31: memref<1x64xf32, #tpu.memory_space<vmem>>, %arg32: memref<64x32xf32, #tpu.memory_space<vmem>>, %arg33: memref<1x32xf32, #tpu.memory_space<vmem>>, %arg34: memref<2x8x32xf32, #tpu.memory_space<vmem>>) attributes {dimension_semantics = [#tpu.dimension_semantics<parallel>], iteration_bounds = array<i64: 2>, scalar_prefetch = 0 : i64, scratch_operands = 0 : i64, tpu.core_type = #tpu.core_type<tc>, window_params = [{transform_indices = @transform_0, window_bounds = array<i64: 2, 8, 32>}, {transform_indices = @transform_1, window_bounds = array<i64: 2, 8, 32>}, {pipeline_mode = #tpu.pipeline_mode<synchronous>, transform_indices = @transform_2, window_bounds = array<i64: 15, 32>}, {transform_indices = @transform_3, window_bounds = array<i64: 2, 1, 8>}, {transform_indices = @transform_4, window_bounds = array<i64: 2, 1, 8>}, {pipeline_mode = #tpu.pipeline_mode<synchronous>, transform_indices = @transform_5, window_bounds = array<i64: 1, 32>}, {pipeline_mode = #tpu.pipeline_mode<synchronous>, transform_indices = @transform_6, window_bounds = array<i64: 1, 32>}, {pipeline_mode = #tpu.pipeline_mode<synchronous>, transform_indices = @transform_7, window_bounds = array<i64: 32, 96>}, {pipeline_mode = #tpu.pipeline_mode<synchronous>, transform_indices = @transform_8, window_bounds = array<i64: 1, 96>}, {pipeline_mode = #tpu.pipeline_mode<synchronous>, transform_indices = @transform_9, window_bounds = array<i64: 32, 32>}, {pipeline_mode = #tpu.pipeline_mode<synchronous>, transform_indices = @transform_10, window_bounds = array<i64: 1, 32>}, {pipeline_mode = #tpu.pipeline_mode<synchronous>, transform_indices = @transform_11, window_bounds = array<i64: 32, 32>}, {pipeline_mode = #tpu.pipeline_mode<synchronous>, transform_indices = @transform_12, window_bounds = array<i64: 1, 32>}, {pipeline_mode = #tpu.pipeline_mode<synchronous>, transform_indices = @transform_13, window_bounds = array<i64: 4, 8>}, {pipeline_mode = #tpu.pipeline_mode<synchronous>, transform_indices = @transform_14, window_bounds = array<i64: 4, 8>}, {pipeline_mode = #tpu.pipeline_mode<synchronous>, transform_indices = @transform_15, window_bounds = array<i64: 1, 32>}, {pipeline_mode = #tpu.pipeline_mode<synchronous>, transform_indices = @transform_16, window_bounds = array<i64: 1, 32>}, {pipeline_mode = #tpu.pipeline_mode<synchronous>, transform_indices = @transform_17, window_bounds = array<i64: 32, 32>}, {pipeline_mode = #tpu.pipeline_mode<synchronous>, transform_indices = @transform_18, window_bounds = array<i64: 1, 32>}, {pipeline_mode = #tpu.pipeline_mode<synchronous>, transform_indices = @transform_19, window_bounds = array<i64: 32, 64>}, {pipeline_mode = #tpu.pipeline_mode<synchronous>, transform_indices = @transform_20, window_bounds = array<i64: 1, 64>}, {pipeline_mode = #tpu.pipeline_mode<synchronous>, transform_indices = @transform_21, window_bounds = array<i64: 32, 32>}, {pipeline_mode = #tpu.pipeline_mode<synchronous>, transform_indices = @transform_22, window_bounds = array<i64: 1, 32>}, {pipeline_mode = #tpu.pipeline_mode<synchronous>, transform_indices = @transform_23, window_bounds = array<i64: 1, 64>}, {pipeline_mode = #tpu.pipeline_mode<synchronous>, transform_indices = @transform_24, window_bounds = array<i64: 1, 64>}, {pipeline_mode = #tpu.pipeline_mode<synchronous>, transform_indices = @transform_25, window_bounds = array<i64: 64, 32>}, {pipeline_mode = #tpu.pipeline_mode<synchronous>, transform_indices = @transform_26, window_bounds = array<i64: 1, 32>}, {pipeline_mode = #tpu.pipeline_mode<synchronous>, transform_indices = @transform_27, window_bounds = array<i64: 1, 32>}, {pipeline_mode = #tpu.pipeline_mode<synchronous>, transform_indices = @transform_28, window_bounds = array<i64: 1, 32>}, {pipeline_mode = #tpu.pipeline_mode<synchronous>, transform_indices = @transform_29, window_bounds = array<i64: 32, 64>}, {pipeline_mode = #tpu.pipeline_mode<synchronous>, transform_indices = @transform_30, window_bounds = array<i64: 1, 64>}, {pipeline_mode = #tpu.pipeline_mode<synchronous>, transform_indices = @transform_31, window_bounds = array<i64: 64, 32>}, {pipeline_mode = #tpu.pipeline_mode<synchronous>, transform_indices = @transform_32, window_bounds = array<i64: 1, 32>}, {transform_indices = @transform_33, window_bounds = array<i64: 2, 8, 32>}]} {
    %c0 = arith.constant 0 : index
    %c0_0 = arith.constant 0 : index
    %0 = vector.load %arg6[%c0, %c0_0] : memref<1x32xf32, #tpu.memory_space<vmem>>, vector<1x32xf32>
    %c0_1 = arith.constant 0 : index
    %c0_2 = arith.constant 0 : index
    %1 = vector.load %arg7[%c0_1, %c0_2] : memref<1x32xf32, #tpu.memory_space<vmem>>, vector<1x32xf32>
    %c0_3 = arith.constant 0 : index
    %c0_4 = arith.constant 0 : index
    %2 = vector.load %arg8[%c0_3, %c0_4] : memref<32x96xf32, #tpu.memory_space<vmem>>, vector<32x96xf32>
    %c0_5 = arith.constant 0 : index
    %c0_6 = arith.constant 0 : index
    %3 = vector.load %arg9[%c0_5, %c0_6] : memref<1x96xf32, #tpu.memory_space<vmem>>, vector<1x96xf32>
    %c0_7 = arith.constant 0 : index
    %c0_8 = arith.constant 0 : index
    %4 = vector.load %arg10[%c0_7, %c0_8] : memref<32x32xf32, #tpu.memory_space<vmem>>, vector<32x32xf32>
    %c0_9 = arith.constant 0 : index
    %c0_10 = arith.constant 0 : index
    %5 = vector.load %arg11[%c0_9, %c0_10] : memref<1x32xf32, #tpu.memory_space<vmem>>, vector<1x32xf32>
    %c0_11 = arith.constant 0 : index
    %c0_12 = arith.constant 0 : index
    %6 = vector.load %arg12[%c0_11, %c0_12] : memref<32x32xf32, #tpu.memory_space<vmem>>, vector<32x32xf32>
    %c0_13 = arith.constant 0 : index
    %c0_14 = arith.constant 0 : index
    %7 = vector.load %arg13[%c0_13, %c0_14] : memref<1x32xf32, #tpu.memory_space<vmem>>, vector<1x32xf32>
    %c0_15 = arith.constant 0 : index
    %c0_16 = arith.constant 0 : index
    %8 = vector.load %arg14[%c0_15, %c0_16] : memref<4x8xf32, #tpu.memory_space<vmem>>, vector<4x8xf32>
    %c0_17 = arith.constant 0 : index
    %c0_18 = arith.constant 0 : index
    %9 = vector.load %arg15[%c0_17, %c0_18] : memref<4x8xf32, #tpu.memory_space<vmem>>, vector<4x8xf32>
    %c0_19 = arith.constant 0 : index
    %c0_20 = arith.constant 0 : index
    %10 = vector.load %arg16[%c0_19, %c0_20] : memref<1x32xf32, #tpu.memory_space<vmem>>, vector<1x32xf32>
    %c0_21 = arith.constant 0 : index
    %c0_22 = arith.constant 0 : index
    %11 = vector.load %arg17[%c0_21, %c0_22] : memref<1x32xf32, #tpu.memory_space<vmem>>, vector<1x32xf32>
    %c0_23 = arith.constant 0 : index
    %c0_24 = arith.constant 0 : index
    %12 = vector.load %arg18[%c0_23, %c0_24] : memref<32x32xf32, #tpu.memory_space<vmem>>, vector<32x32xf32>
    %c0_25 = arith.constant 0 : index
    %c0_26 = arith.constant 0 : index
    %13 = vector.load %arg19[%c0_25, %c0_26] : memref<1x32xf32, #tpu.memory_space<vmem>>, vector<1x32xf32>
    %c0_27 = arith.constant 0 : index
    %c0_28 = arith.constant 0 : index
    %14 = vector.load %arg20[%c0_27, %c0_28] : memref<32x64xf32, #tpu.memory_space<vmem>>, vector<32x64xf32>
    %c0_29 = arith.constant 0 : index
    %c0_30 = arith.constant 0 : index
    %15 = vector.load %arg21[%c0_29, %c0_30] : memref<1x64xf32, #tpu.memory_space<vmem>>, vector<1x64xf32>
    %c0_31 = arith.constant 0 : index
    %c0_32 = arith.constant 0 : index
    %16 = vector.load %arg22[%c0_31, %c0_32] : memref<32x32xf32, #tpu.memory_space<vmem>>, vector<32x32xf32>
    %c0_33 = arith.constant 0 : index
    %c0_34 = arith.constant 0 : index
    %17 = vector.load %arg23[%c0_33, %c0_34] : memref<1x32xf32, #tpu.memory_space<vmem>>, vector<1x32xf32>
    %c0_35 = arith.constant 0 : index
    %c0_36 = arith.constant 0 : index
    %18 = vector.load %arg24[%c0_35, %c0_36] : memref<1x64xf32, #tpu.memory_space<vmem>>, vector<1x64xf32>
    %c0_37 = arith.constant 0 : index
    %c0_38 = arith.constant 0 : index
    %19 = vector.load %arg25[%c0_37, %c0_38] : memref<1x64xf32, #tpu.memory_space<vmem>>, vector<1x64xf32>
    %c0_39 = arith.constant 0 : index
    %c0_40 = arith.constant 0 : index
    %20 = vector.load %arg26[%c0_39, %c0_40] : memref<64x32xf32, #tpu.memory_space<vmem>>, vector<64x32xf32>
    %c0_41 = arith.constant 0 : index
    %c0_42 = arith.constant 0 : index
    %21 = vector.load %arg27[%c0_41, %c0_42] : memref<1x32xf32, #tpu.memory_space<vmem>>, vector<1x32xf32>
    %c0_43 = arith.constant 0 : index
    %c0_44 = arith.constant 0 : index
    %22 = vector.load %arg28[%c0_43, %c0_44] : memref<1x32xf32, #tpu.memory_space<vmem>>, vector<1x32xf32>
    %c0_45 = arith.constant 0 : index
    %c0_46 = arith.constant 0 : index
    %23 = vector.load %arg29[%c0_45, %c0_46] : memref<1x32xf32, #tpu.memory_space<vmem>>, vector<1x32xf32>
    %c0_47 = arith.constant 0 : index
    %c0_48 = arith.constant 0 : index
    %24 = vector.load %arg30[%c0_47, %c0_48] : memref<32x64xf32, #tpu.memory_space<vmem>>, vector<32x64xf32>
    %c0_49 = arith.constant 0 : index
    %c0_50 = arith.constant 0 : index
    %25 = vector.load %arg31[%c0_49, %c0_50] : memref<1x64xf32, #tpu.memory_space<vmem>>, vector<1x64xf32>
    %c0_51 = arith.constant 0 : index
    %c0_52 = arith.constant 0 : index
    %26 = vector.load %arg32[%c0_51, %c0_52] : memref<64x32xf32, #tpu.memory_space<vmem>>, vector<64x32xf32>
    %c0_53 = arith.constant 0 : index
    %c0_54 = arith.constant 0 : index
    %27 = vector.load %arg33[%c0_53, %c0_54] : memref<1x32xf32, #tpu.memory_space<vmem>>, vector<1x32xf32>
    %c0_55 = arith.constant 0 : index
    %c0_56 = arith.constant 0 : index
    %c0_57 = arith.constant 0 : index
    %28 = vector.load %arg1[%c0_55, %c0_56, %c0_57] : memref<2x8x32xf32, #tpu.memory_space<vmem>>, vector<2x8x32xf32>
    %c0_58 = arith.constant 0 : index
    %c0_59 = arith.constant 0 : index
    %c0_60 = arith.constant 0 : index
    %29 = vector.load %arg2[%c0_58, %c0_59, %c0_60] : memref<2x8x32xf32, #tpu.memory_space<vmem>>, vector<2x8x32xf32>
    %c0_61 = arith.constant 0 : index
    %c0_62 = arith.constant 0 : index
    %30 = vector.load %arg3[%c0_61, %c0_62] : memref<15x32xf32, #tpu.memory_space<vmem>>, vector<15x32xf32>
    %c0_63 = arith.constant 0 : index
    %c0_64 = arith.constant 0 : index
    %c0_65 = arith.constant 0 : index
    %31 = vector.load %arg4[%c0_63, %c0_64, %c0_65] : memref<2x1x8xf32, #tpu.memory_space<vmem>>, vector<2x1x8xf32>
    %c0_66 = arith.constant 0 : index
    %c0_67 = arith.constant 0 : index
    %c0_68 = arith.constant 0 : index
    %32 = vector.load %arg5[%c0_66, %c0_67, %c0_68] : memref<2x1x8xf32, #tpu.memory_space<vmem>>, vector<2x1x8xf32>
    %33 = vector.shape_cast %28 : vector<2x8x32xf32> to vector<16x32xf32>
    %34 = vector.shape_cast %29 : vector<2x8x32xf32> to vector<16x32xf32>
    %cst = arith.constant dense<0.000000e+00> : vector<16xf32>
    %35 = vector.multi_reduction <add>, %33, %cst [1] : vector<16x32xf32> to vector<16xf32>
    %36 = vector.shape_cast %35 : vector<16xf32> to vector<16x1xf32>
    %cst_69 = arith.constant 3.200000e+01 : f32
    %37 = vector.broadcast %cst_69 : f32 to vector<16x1xf32>
    %38 = arith.divf %36, %37 : vector<16x1xf32>
    %39 = vector.broadcast %38 : vector<16x1xf32> to vector<16x32xf32>
    %40 = arith.subf %33, %39 : vector<16x32xf32>
    %41 = arith.mulf %40, %40 : vector<16x32xf32>
    %cst_70 = arith.constant dense<0.000000e+00> : vector<16xf32>
    %42 = vector.multi_reduction <add>, %41, %cst_70 [1] : vector<16x32xf32> to vector<16xf32>
    %43 = vector.shape_cast %42 : vector<16xf32> to vector<16x1xf32>
    %cst_71 = arith.constant 3.200000e+01 : f32
    %44 = vector.broadcast %cst_71 : f32 to vector<16x1xf32>
    %45 = arith.divf %43, %44 : vector<16x1xf32>
    %cst_72 = arith.constant 9.99999974E-6 : f32
    %46 = vector.broadcast %cst_72 : f32 to vector<16x1xf32>
    %47 = arith.addf %45, %46 : vector<16x1xf32>
    %48 = math.rsqrt %47 : vector<16x1xf32>
    %49 = vector.broadcast %48 : vector<16x1xf32> to vector<16x32xf32>
    %50 = arith.mulf %40, %49 : vector<16x32xf32>
    %51 = vector.broadcast %0 : vector<1x32xf32> to vector<16x32xf32>
    %52 = arith.mulf %50, %51 : vector<16x32xf32>
    %53 = vector.broadcast %1 : vector<1x32xf32> to vector<16x32xf32>
    %54 = arith.addf %52, %53 : vector<16x32xf32>
    %cst_73 = arith.constant dense<0.000000e+00> : vector<16x96xf32>
    %55 = tpu.matmul %54, %2, %cst_73 {dimension_numbers = #tpu.dot_dimension_numbers<[1], [0], [0], [1], [0, 0, 1, 1], [], []>} : vector<16x32xf32>, vector<32x96xf32>, vector<16x96xf32> -> vector<16x96xf32>
    %56 = vector.broadcast %3 : vector<1x96xf32> to vector<16x96xf32>
    %57 = arith.addf %55, %56 : vector<16x96xf32>
    %cst_74 = arith.constant dense<0.000000e+00> : vector<15x32xf32>
    %58 = tpu.matmul %30, %4, %cst_74 {dimension_numbers = #tpu.dot_dimension_numbers<[1], [0], [0], [1], [0, 0, 1, 1], [], []>} : vector<15x32xf32>, vector<32x32xf32>, vector<15x32xf32> -> vector<15x32xf32>
    %59 = vector.broadcast %5 : vector<1x32xf32> to vector<15x32xf32>
    %60 = arith.addf %58, %59 : vector<15x32xf32>
    %61 = vector.extract_strided_slice %57 {offsets = [0, 0], sizes = [16, 32], strides = [1, 1]} : vector<16x96xf32> to vector<16x32xf32>
    %62 = vector.extract_strided_slice %61 {offsets = [0, 0], sizes = [16, 8], strides = [1, 1]} : vector<16x32xf32> to vector<16x8xf32>
    %63 = vector.shape_cast %62 : vector<16x8xf32> to vector<2x8x8xf32>
    %64 = vector.extract_strided_slice %61 {offsets = [0, 8], sizes = [16, 8], strides = [1, 1]} : vector<16x32xf32> to vector<16x8xf32>
    %65 = vector.shape_cast %64 : vector<16x8xf32> to vector<2x8x8xf32>
    %66 = vector.extract_strided_slice %61 {offsets = [0, 16], sizes = [16, 8], strides = [1, 1]} : vector<16x32xf32> to vector<16x8xf32>
    %67 = vector.shape_cast %66 : vector<16x8xf32> to vector<2x8x8xf32>
    %68 = vector.extract_strided_slice %61 {offsets = [0, 24], sizes = [16, 8], strides = [1, 1]} : vector<16x32xf32> to vector<16x8xf32>
    %69 = vector.shape_cast %68 : vector<16x8xf32> to vector<2x8x8xf32>
    %70 = vector.shape_cast %63 : vector<2x8x8xf32> to vector<1x2x8x8xf32>
    %71 = vector.shape_cast %65 : vector<2x8x8xf32> to vector<1x2x8x8xf32>
    %72 = vector.shape_cast %67 : vector<2x8x8xf32> to vector<1x2x8x8xf32>
    %73 = vector.shape_cast %69 : vector<2x8x8xf32> to vector<1x2x8x8xf32>
    %74 = tpu.concatenate %70, %71, %72, %73 in 0 : vector<1x2x8x8xf32>, vector<1x2x8x8xf32>, vector<1x2x8x8xf32>, vector<1x2x8x8xf32> -> vector<4x2x8x8xf32>
    %75 = vector.shape_cast %74 : vector<4x2x8x8xf32> to vector<8x8x8xf32>
    %76 = vector.extract_strided_slice %57 {offsets = [0, 32], sizes = [16, 32], strides = [1, 1]} : vector<16x96xf32> to vector<16x32xf32>
    %77 = vector.extract_strided_slice %76 {offsets = [0, 0], sizes = [16, 8], strides = [1, 1]} : vector<16x32xf32> to vector<16x8xf32>
    %78 = vector.shape_cast %77 : vector<16x8xf32> to vector<2x8x8xf32>
    %79 = vector.extract_strided_slice %76 {offsets = [0, 8], sizes = [16, 8], strides = [1, 1]} : vector<16x32xf32> to vector<16x8xf32>
    %80 = vector.shape_cast %79 : vector<16x8xf32> to vector<2x8x8xf32>
    %81 = vector.extract_strided_slice %76 {offsets = [0, 16], sizes = [16, 8], strides = [1, 1]} : vector<16x32xf32> to vector<16x8xf32>
    %82 = vector.shape_cast %81 : vector<16x8xf32> to vector<2x8x8xf32>
    %83 = vector.extract_strided_slice %76 {offsets = [0, 24], sizes = [16, 8], strides = [1, 1]} : vector<16x32xf32> to vector<16x8xf32>
    %84 = vector.shape_cast %83 : vector<16x8xf32> to vector<2x8x8xf32>
    %85 = vector.shape_cast %78 : vector<2x8x8xf32> to vector<1x2x8x8xf32>
    %86 = vector.shape_cast %80 : vector<2x8x8xf32> to vector<1x2x8x8xf32>
    %87 = vector.shape_cast %82 : vector<2x8x8xf32> to vector<1x2x8x8xf32>
    %88 = vector.shape_cast %84 : vector<2x8x8xf32> to vector<1x2x8x8xf32>
    %89 = tpu.concatenate %85, %86, %87, %88 in 0 : vector<1x2x8x8xf32>, vector<1x2x8x8xf32>, vector<1x2x8x8xf32>, vector<1x2x8x8xf32> -> vector<4x2x8x8xf32>
    %90 = vector.shape_cast %89 : vector<4x2x8x8xf32> to vector<8x8x8xf32>
    %91 = vector.extract_strided_slice %57 {offsets = [0, 64], sizes = [16, 32], strides = [1, 1]} : vector<16x96xf32> to vector<16x32xf32>
    %92 = vector.extract_strided_slice %91 {offsets = [0, 0], sizes = [16, 8], strides = [1, 1]} : vector<16x32xf32> to vector<16x8xf32>
    %93 = vector.shape_cast %92 : vector<16x8xf32> to vector<2x8x8xf32>
    %94 = vector.extract_strided_slice %91 {offsets = [0, 8], sizes = [16, 8], strides = [1, 1]} : vector<16x32xf32> to vector<16x8xf32>
    %95 = vector.shape_cast %94 : vector<16x8xf32> to vector<2x8x8xf32>
    %96 = vector.extract_strided_slice %91 {offsets = [0, 16], sizes = [16, 8], strides = [1, 1]} : vector<16x32xf32> to vector<16x8xf32>
    %97 = vector.shape_cast %96 : vector<16x8xf32> to vector<2x8x8xf32>
    %98 = vector.extract_strided_slice %91 {offsets = [0, 24], sizes = [16, 8], strides = [1, 1]} : vector<16x32xf32> to vector<16x8xf32>
    %99 = vector.shape_cast %98 : vector<16x8xf32> to vector<2x8x8xf32>
    %100 = vector.shape_cast %93 : vector<2x8x8xf32> to vector<1x2x8x8xf32>
    %101 = vector.shape_cast %95 : vector<2x8x8xf32> to vector<1x2x8x8xf32>
    %102 = vector.shape_cast %97 : vector<2x8x8xf32> to vector<1x2x8x8xf32>
    %103 = vector.shape_cast %99 : vector<2x8x8xf32> to vector<1x2x8x8xf32>
    %104 = tpu.concatenate %100, %101, %102, %103 in 0 : vector<1x2x8x8xf32>, vector<1x2x8x8xf32>, vector<1x2x8x8xf32>, vector<1x2x8x8xf32> -> vector<4x2x8x8xf32>
    %105 = vector.shape_cast %104 : vector<4x2x8x8xf32> to vector<8x8x8xf32>
    %106 = vector.extract_strided_slice %60 {offsets = [0, 0], sizes = [15, 8], strides = [1, 1]} : vector<15x32xf32> to vector<15x8xf32>
    %107 = vector.extract_strided_slice %60 {offsets = [0, 8], sizes = [15, 8], strides = [1, 1]} : vector<15x32xf32> to vector<15x8xf32>
    %108 = vector.extract_strided_slice %60 {offsets = [0, 16], sizes = [15, 8], strides = [1, 1]} : vector<15x32xf32> to vector<15x8xf32>
    %109 = vector.extract_strided_slice %60 {offsets = [0, 24], sizes = [15, 8], strides = [1, 1]} : vector<15x32xf32> to vector<15x8xf32>
    %110 = vector.shape_cast %106 : vector<15x8xf32> to vector<1x15x8xf32>
    %111 = vector.shape_cast %107 : vector<15x8xf32> to vector<1x15x8xf32>
    %112 = vector.shape_cast %108 : vector<15x8xf32> to vector<1x15x8xf32>
    %113 = vector.shape_cast %109 : vector<15x8xf32> to vector<1x15x8xf32>
    %114 = tpu.concatenate %110, %111, %112, %113 in 0 : vector<1x15x8xf32>, vector<1x15x8xf32>, vector<1x15x8xf32>, vector<1x15x8xf32> -> vector<4x15x8xf32>
    %115 = vector.shape_cast %114 : vector<4x15x8xf32> to vector<4x1x15x8xf32>
    %116 = vector.shape_cast %115 : vector<4x1x15x8xf32> to vector<4x1x15x8xf32>
    %117 = vector.broadcast %116 : vector<4x1x15x8xf32> to vector<4x2x15x8xf32>
    %118 = vector.shape_cast %117 : vector<4x2x15x8xf32> to vector<8x15x8xf32>
    %119 = vector.shape_cast %8 : vector<4x8xf32> to vector<4x1x1x8xf32>
    %120 = vector.shape_cast %119 : vector<4x1x1x8xf32> to vector<4x1x1x8xf32>
    %121 = vector.broadcast %120 : vector<4x1x1x8xf32> to vector<4x2x1x8xf32>
    %122 = vector.shape_cast %121 : vector<4x2x1x8xf32> to vector<8x1x8xf32>
    %123 = vector.shape_cast %9 : vector<4x8xf32> to vector<4x1x1x8xf32>
    %124 = vector.shape_cast %123 : vector<4x1x1x8xf32> to vector<4x1x1x8xf32>
    %125 = vector.broadcast %124 : vector<4x1x1x8xf32> to vector<4x2x1x8xf32>
    %126 = vector.shape_cast %125 : vector<4x2x1x8xf32> to vector<8x1x8xf32>
    %127 = vector.shape_cast %31 : vector<2x1x8xf32> to vector<1x2x1x8xf32>
    %128 = vector.shape_cast %127 : vector<1x2x1x8xf32> to vector<1x2x1x8xf32>
    %129 = vector.broadcast %128 : vector<1x2x1x8xf32> to vector<4x2x1x8xf32>
    %130 = vector.shape_cast %129 : vector<4x2x1x8xf32> to vector<8x1x8xf32>
    %cst_75 = arith.constant 5.000000e-01 : f32
    %131 = vector.broadcast %cst_75 : f32 to vector<8x1x8xf32>
    %132 = arith.cmpf ogt, %130, %131 : vector<8x1x8xf32>
    %133 = vector.broadcast %122 : vector<8x1x8xf32> to vector<8x8x8xf32>
    %134 = arith.addf %75, %133 : vector<8x8x8xf32>
    "tpu.trace_start"() <{level = 10 : i32, message = "zqd,zkd->zqk"}> : () -> ()
    %cst_76 = arith.constant dense<0.000000e+00> : vector<8x8x8xf32>
    %135 = tpu.matmul %134, %90, %cst_76 {dimension_numbers = #tpu.dot_dimension_numbers<[2], [2], [1], [1], [0, 0, 0, 1, 1, 1], [0], [0]>} : vector<8x8x8xf32>, vector<8x8x8xf32>, vector<8x8x8xf32> -> vector<8x8x8xf32>
    "tpu.trace_stop"() : () -> ()
    %136 = vector.broadcast %126 : vector<8x1x8xf32> to vector<8x8x8xf32>
    %137 = arith.addf %75, %136 : vector<8x8x8xf32>
    "tpu.trace_start"() <{level = 10 : i32, message = "zqd,zpd->zqp"}> : () -> ()
    %cst_77 = arith.constant dense<0.000000e+00> : vector<8x8x15xf32>
    %138 = tpu.matmul %137, %118, %cst_77 {dimension_numbers = #tpu.dot_dimension_numbers<[2], [2], [1], [1], [0, 0, 0, 1, 1, 1], [0], [0]>} : vector<8x8x8xf32>, vector<8x15x8xf32>, vector<8x8x15xf32> -> vector<8x8x15xf32>
    "tpu.trace_stop"() : () -> ()
    %139 = tpu.iota {dimensions = array<i32: 0>} : vector<8x15xi32>
    %c7_i32 = arith.constant 7 : i32
    %140 = vector.broadcast %c7_i32 : i32 to vector<8x15xi32>
    %141 = arith.subi %140, %139 : vector<8x15xi32>
    %142 = vector.extract_strided_slice %138 {offsets = [0, 0, 1], sizes = [8, 8, 14], strides = [1, 1, 1]} : vector<8x8x15xf32> to vector<8x8x14xf32>
    %143 = vector.extract_strided_slice %138 {offsets = [0, 0, 0], sizes = [8, 8, 1], strides = [1, 1, 1]} : vector<8x8x15xf32> to vector<8x8x1xf32>
    %144 = tpu.concatenate %142, %143 in 2 : vector<8x8x14xf32>, vector<8x8x1xf32> -> vector<8x8x15xf32>
    %c0_i32 = arith.constant 0 : i32
    %145 = vector.broadcast %c0_i32 : i32 to vector<8x15xi32>
    %146 = arith.shrsi %141, %145 : vector<8x15xi32>
    %c1_i32 = arith.constant 1 : i32
    %147 = vector.broadcast %c1_i32 : i32 to vector<8x15xi32>
    %148 = arith.andi %146, %147 : vector<8x15xi32>
    %c1_i32_78 = arith.constant 1 : i32
    %149 = vector.broadcast %c1_i32_78 : i32 to vector<8x15xi32>
    %150 = arith.cmpi eq, %148, %149 : vector<8x15xi32>
    %151 = vector.shape_cast %150 : vector<8x15xi1> to vector<1x8x15xi1>
    %152 = vector.shape_cast %151 : vector<1x8x15xi1> to vector<1x8x15xi1>
    %153 = vector.broadcast %152 : vector<1x8x15xi1> to vector<8x8x15xi1>
    %154 = arith.select %153, %144, %138 : vector<8x8x15xi1>, vector<8x8x15xf32>
    %155 = vector.extract_strided_slice %154 {offsets = [0, 0, 2], sizes = [8, 8, 13], strides = [1, 1, 1]} : vector<8x8x15xf32> to vector<8x8x13xf32>
    %156 = vector.extract_strided_slice %154 {offsets = [0, 0, 0], sizes = [8, 8, 2], strides = [1, 1, 1]} : vector<8x8x15xf32> to vector<8x8x2xf32>
    %157 = tpu.concatenate %155, %156 in 2 : vector<8x8x13xf32>, vector<8x8x2xf32> -> vector<8x8x15xf32>
    %c1_i32_79 = arith.constant 1 : i32
    %158 = vector.broadcast %c1_i32_79 : i32 to vector<8x15xi32>
    %159 = arith.shrsi %141, %158 : vector<8x15xi32>
    %c1_i32_80 = arith.constant 1 : i32
    %160 = vector.broadcast %c1_i32_80 : i32 to vector<8x15xi32>
    %161 = arith.andi %159, %160 : vector<8x15xi32>
    %c1_i32_81 = arith.constant 1 : i32
    %162 = vector.broadcast %c1_i32_81 : i32 to vector<8x15xi32>
    %163 = arith.cmpi eq, %161, %162 : vector<8x15xi32>
    %164 = vector.shape_cast %163 : vector<8x15xi1> to vector<1x8x15xi1>
    %165 = vector.shape_cast %164 : vector<1x8x15xi1> to vector<1x8x15xi1>
    %166 = vector.broadcast %165 : vector<1x8x15xi1> to vector<8x8x15xi1>
    %167 = arith.select %166, %157, %154 : vector<8x8x15xi1>, vector<8x8x15xf32>
    %168 = vector.extract_strided_slice %167 {offsets = [0, 0, 4], sizes = [8, 8, 11], strides = [1, 1, 1]} : vector<8x8x15xf32> to vector<8x8x11xf32>
    %169 = vector.extract_strided_slice %167 {offsets = [0, 0, 0], sizes = [8, 8, 4], strides = [1, 1, 1]} : vector<8x8x15xf32> to vector<8x8x4xf32>
    %170 = tpu.concatenate %168, %169 in 2 : vector<8x8x11xf32>, vector<8x8x4xf32> -> vector<8x8x15xf32>
    %c2_i32 = arith.constant 2 : i32
    %171 = vector.broadcast %c2_i32 : i32 to vector<8x15xi32>
    %172 = arith.shrsi %141, %171 : vector<8x15xi32>
    %c1_i32_82 = arith.constant 1 : i32
    %173 = vector.broadcast %c1_i32_82 : i32 to vector<8x15xi32>
    %174 = arith.andi %172, %173 : vector<8x15xi32>
    %c1_i32_83 = arith.constant 1 : i32
    %175 = vector.broadcast %c1_i32_83 : i32 to vector<8x15xi32>
    %176 = arith.cmpi eq, %174, %175 : vector<8x15xi32>
    %177 = vector.shape_cast %176 : vector<8x15xi1> to vector<1x8x15xi1>
    %178 = vector.shape_cast %177 : vector<1x8x15xi1> to vector<1x8x15xi1>
    %179 = vector.broadcast %178 : vector<1x8x15xi1> to vector<8x8x15xi1>
    %180 = arith.select %179, %170, %167 : vector<8x8x15xi1>, vector<8x8x15xf32>
    %181 = vector.extract_strided_slice %180 {offsets = [0, 0, 0], sizes = [8, 8, 8], strides = [1, 1, 1]} : vector<8x8x15xf32> to vector<8x8x8xf32>
    %182 = arith.addf %135, %181 : vector<8x8x8xf32>
    %cst_84 = arith.constant 0.353553385 : f32
    %183 = vector.broadcast %cst_84 : f32 to vector<8x8x8xf32>
    %184 = arith.mulf %182, %183 : vector<8x8x8xf32>
    %cst_85 = arith.constant -1.000000e+30 : f32
    %185 = vector.shape_cast %132 : vector<8x1x8xi1> to vector<8x1x8xi1>
    %186 = vector.broadcast %185 : vector<8x1x8xi1> to vector<8x8x8xi1>
    %187 = vector.broadcast %cst_85 : f32 to vector<8x8x8xf32>
    %188 = arith.select %186, %187, %184 : vector<8x8x8xi1>, vector<8x8x8xf32>
    %cst_86 = arith.constant dense<0xFF800000> : vector<8x8xf32>
    %189 = vector.multi_reduction <maximumf>, %188, %cst_86 [2] : vector<8x8x8xf32> to vector<8x8xf32>
    %190 = vector.shape_cast %189 : vector<8x8xf32> to vector<8x8x1xf32>
    %191 = vector.broadcast %190 : vector<8x8x1xf32> to vector<8x8x8xf32>
    %192 = arith.subf %188, %191 : vector<8x8x8xf32>
    %193 = math.exp %192 : vector<8x8x8xf32>
    %cst_87 = arith.constant dense<0.000000e+00> : vector<8x8xf32>
    %194 = vector.multi_reduction <add>, %193, %cst_87 [2] : vector<8x8x8xf32> to vector<8x8xf32>
    %195 = vector.shape_cast %194 : vector<8x8xf32> to vector<8x8x1xf32>
    %196 = vector.broadcast %195 : vector<8x8x1xf32> to vector<8x8x8xf32>
    %197 = arith.divf %193, %196 : vector<8x8x8xf32>
    "tpu.trace_start"() <{level = 10 : i32, message = "zqk,zkd->zqd"}> : () -> ()
    %cst_88 = arith.constant dense<0.000000e+00> : vector<8x8x8xf32>
    %198 = tpu.matmul %197, %105, %cst_88 {dimension_numbers = #tpu.dot_dimension_numbers<[2], [1], [1], [2], [0, 0, 0, 1, 1, 2], [0], [0]>} : vector<8x8x8xf32>, vector<8x8x8xf32>, vector<8x8x8xf32> -> vector<8x8x8xf32>
    "tpu.trace_stop"() : () -> ()
    %199 = vector.extract_strided_slice %198 {offsets = [0, 0, 0], sizes = [2, 8, 8], strides = [1, 1, 1]} : vector<8x8x8xf32> to vector<2x8x8xf32>
    %200 = vector.shape_cast %199 : vector<2x8x8xf32> to vector<16x8xf32>
    %201 = vector.extract_strided_slice %198 {offsets = [2, 0, 0], sizes = [2, 8, 8], strides = [1, 1, 1]} : vector<8x8x8xf32> to vector<2x8x8xf32>
    %202 = vector.shape_cast %201 : vector<2x8x8xf32> to vector<16x8xf32>
    %203 = vector.extract_strided_slice %198 {offsets = [4, 0, 0], sizes = [2, 8, 8], strides = [1, 1, 1]} : vector<8x8x8xf32> to vector<2x8x8xf32>
    %204 = vector.shape_cast %203 : vector<2x8x8xf32> to vector<16x8xf32>
    %205 = vector.extract_strided_slice %198 {offsets = [6, 0, 0], sizes = [2, 8, 8], strides = [1, 1, 1]} : vector<8x8x8xf32> to vector<2x8x8xf32>
    %206 = vector.shape_cast %205 : vector<2x8x8xf32> to vector<16x8xf32>
    %207 = tpu.concatenate %200, %202, %204, %206 in 1 : vector<16x8xf32>, vector<16x8xf32>, vector<16x8xf32>, vector<16x8xf32> -> vector<16x32xf32>
    %cst_89 = arith.constant dense<0.000000e+00> : vector<16x32xf32>
    %208 = tpu.matmul %207, %6, %cst_89 {dimension_numbers = #tpu.dot_dimension_numbers<[1], [0], [0], [1], [0, 0, 1, 1], [], []>} : vector<16x32xf32>, vector<32x32xf32>, vector<16x32xf32> -> vector<16x32xf32>
    %209 = vector.broadcast %7 : vector<1x32xf32> to vector<16x32xf32>
    %210 = arith.addf %208, %209 : vector<16x32xf32>
    %211 = arith.addf %210, %33 : vector<16x32xf32>
    %cst_90 = arith.constant dense<0.000000e+00> : vector<16xf32>
    %212 = vector.multi_reduction <add>, %33, %cst_90 [1] : vector<16x32xf32> to vector<16xf32>
    %213 = vector.shape_cast %212 : vector<16xf32> to vector<16x1xf32>
    %cst_91 = arith.constant 3.200000e+01 : f32
    %214 = vector.broadcast %cst_91 : f32 to vector<16x1xf32>
    %215 = arith.divf %213, %214 : vector<16x1xf32>
    %216 = vector.broadcast %215 : vector<16x1xf32> to vector<16x32xf32>
    %217 = arith.subf %33, %216 : vector<16x32xf32>
    %218 = arith.mulf %217, %217 : vector<16x32xf32>
    %cst_92 = arith.constant dense<0.000000e+00> : vector<16xf32>
    %219 = vector.multi_reduction <add>, %218, %cst_92 [1] : vector<16x32xf32> to vector<16xf32>
    %220 = vector.shape_cast %219 : vector<16xf32> to vector<16x1xf32>
    %cst_93 = arith.constant 3.200000e+01 : f32
    %221 = vector.broadcast %cst_93 : f32 to vector<16x1xf32>
    %222 = arith.divf %220, %221 : vector<16x1xf32>
    %cst_94 = arith.constant 9.99999974E-6 : f32
    %223 = vector.broadcast %cst_94 : f32 to vector<16x1xf32>
    %224 = arith.addf %222, %223 : vector<16x1xf32>
    %225 = math.rsqrt %224 : vector<16x1xf32>
    %226 = vector.broadcast %225 : vector<16x1xf32> to vector<16x32xf32>
    %227 = arith.mulf %217, %226 : vector<16x32xf32>
    %228 = vector.broadcast %10 : vector<1x32xf32> to vector<16x32xf32>
    %229 = arith.mulf %227, %228 : vector<16x32xf32>
    %230 = vector.broadcast %11 : vector<1x32xf32> to vector<16x32xf32>
    %231 = arith.addf %229, %230 : vector<16x32xf32>
    %cst_95 = arith.constant dense<0.000000e+00> : vector<16x32xf32>
    %232 = tpu.matmul %231, %12, %cst_95 {dimension_numbers = #tpu.dot_dimension_numbers<[1], [0], [0], [1], [0, 0, 1, 1], [], []>} : vector<16x32xf32>, vector<32x32xf32>, vector<16x32xf32> -> vector<16x32xf32>
    %233 = vector.broadcast %13 : vector<1x32xf32> to vector<16x32xf32>
    %234 = arith.addf %232, %233 : vector<16x32xf32>
    %cst_96 = arith.constant dense<0.000000e+00> : vector<16x64xf32>
    %235 = tpu.matmul %34, %14, %cst_96 {dimension_numbers = #tpu.dot_dimension_numbers<[1], [0], [0], [1], [0, 0, 1, 1], [], []>} : vector<16x32xf32>, vector<32x64xf32>, vector<16x64xf32> -> vector<16x64xf32>
    %236 = vector.broadcast %15 : vector<1x64xf32> to vector<16x64xf32>
    %237 = arith.addf %235, %236 : vector<16x64xf32>
    %238 = vector.extract_strided_slice %234 {offsets = [0, 0], sizes = [16, 8], strides = [1, 1]} : vector<16x32xf32> to vector<16x8xf32>
    %239 = vector.shape_cast %238 : vector<16x8xf32> to vector<2x8x8xf32>
    %240 = vector.extract_strided_slice %234 {offsets = [0, 8], sizes = [16, 8], strides = [1, 1]} : vector<16x32xf32> to vector<16x8xf32>
    %241 = vector.shape_cast %240 : vector<16x8xf32> to vector<2x8x8xf32>
    %242 = vector.extract_strided_slice %234 {offsets = [0, 16], sizes = [16, 8], strides = [1, 1]} : vector<16x32xf32> to vector<16x8xf32>
    %243 = vector.shape_cast %242 : vector<16x8xf32> to vector<2x8x8xf32>
    %244 = vector.extract_strided_slice %234 {offsets = [0, 24], sizes = [16, 8], strides = [1, 1]} : vector<16x32xf32> to vector<16x8xf32>
    %245 = vector.shape_cast %244 : vector<16x8xf32> to vector<2x8x8xf32>
    %246 = vector.shape_cast %239 : vector<2x8x8xf32> to vector<1x2x8x8xf32>
    %247 = vector.shape_cast %241 : vector<2x8x8xf32> to vector<1x2x8x8xf32>
    %248 = vector.shape_cast %243 : vector<2x8x8xf32> to vector<1x2x8x8xf32>
    %249 = vector.shape_cast %245 : vector<2x8x8xf32> to vector<1x2x8x8xf32>
    %250 = tpu.concatenate %246, %247, %248, %249 in 0 : vector<1x2x8x8xf32>, vector<1x2x8x8xf32>, vector<1x2x8x8xf32>, vector<1x2x8x8xf32> -> vector<4x2x8x8xf32>
    %251 = vector.shape_cast %250 : vector<4x2x8x8xf32> to vector<8x8x8xf32>
    %252 = vector.extract_strided_slice %237 {offsets = [0, 0], sizes = [16, 32], strides = [1, 1]} : vector<16x64xf32> to vector<16x32xf32>
    %253 = vector.extract_strided_slice %252 {offsets = [0, 0], sizes = [16, 8], strides = [1, 1]} : vector<16x32xf32> to vector<16x8xf32>
    %254 = vector.shape_cast %253 : vector<16x8xf32> to vector<2x8x8xf32>
    %255 = vector.extract_strided_slice %252 {offsets = [0, 8], sizes = [16, 8], strides = [1, 1]} : vector<16x32xf32> to vector<16x8xf32>
    %256 = vector.shape_cast %255 : vector<16x8xf32> to vector<2x8x8xf32>
    %257 = vector.extract_strided_slice %252 {offsets = [0, 16], sizes = [16, 8], strides = [1, 1]} : vector<16x32xf32> to vector<16x8xf32>
    %258 = vector.shape_cast %257 : vector<16x8xf32> to vector<2x8x8xf32>
    %259 = vector.extract_strided_slice %252 {offsets = [0, 24], sizes = [16, 8], strides = [1, 1]} : vector<16x32xf32> to vector<16x8xf32>
    %260 = vector.shape_cast %259 : vector<16x8xf32> to vector<2x8x8xf32>
    %261 = vector.shape_cast %254 : vector<2x8x8xf32> to vector<1x2x8x8xf32>
    %262 = vector.shape_cast %256 : vector<2x8x8xf32> to vector<1x2x8x8xf32>
    %263 = vector.shape_cast %258 : vector<2x8x8xf32> to vector<1x2x8x8xf32>
    %264 = vector.shape_cast %260 : vector<2x8x8xf32> to vector<1x2x8x8xf32>
    %265 = tpu.concatenate %261, %262, %263, %264 in 0 : vector<1x2x8x8xf32>, vector<1x2x8x8xf32>, vector<1x2x8x8xf32>, vector<1x2x8x8xf32> -> vector<4x2x8x8xf32>
    %266 = vector.shape_cast %265 : vector<4x2x8x8xf32> to vector<8x8x8xf32>
    %267 = vector.extract_strided_slice %237 {offsets = [0, 32], sizes = [16, 32], strides = [1, 1]} : vector<16x64xf32> to vector<16x32xf32>
    %268 = vector.extract_strided_slice %267 {offsets = [0, 0], sizes = [16, 8], strides = [1, 1]} : vector<16x32xf32> to vector<16x8xf32>
    %269 = vector.shape_cast %268 : vector<16x8xf32> to vector<2x8x8xf32>
    %270 = vector.extract_strided_slice %267 {offsets = [0, 8], sizes = [16, 8], strides = [1, 1]} : vector<16x32xf32> to vector<16x8xf32>
    %271 = vector.shape_cast %270 : vector<16x8xf32> to vector<2x8x8xf32>
    %272 = vector.extract_strided_slice %267 {offsets = [0, 16], sizes = [16, 8], strides = [1, 1]} : vector<16x32xf32> to vector<16x8xf32>
    %273 = vector.shape_cast %272 : vector<16x8xf32> to vector<2x8x8xf32>
    %274 = vector.extract_strided_slice %267 {offsets = [0, 24], sizes = [16, 8], strides = [1, 1]} : vector<16x32xf32> to vector<16x8xf32>
    %275 = vector.shape_cast %274 : vector<16x8xf32> to vector<2x8x8xf32>
    %276 = vector.shape_cast %269 : vector<2x8x8xf32> to vector<1x2x8x8xf32>
    %277 = vector.shape_cast %271 : vector<2x8x8xf32> to vector<1x2x8x8xf32>
    %278 = vector.shape_cast %273 : vector<2x8x8xf32> to vector<1x2x8x8xf32>
    %279 = vector.shape_cast %275 : vector<2x8x8xf32> to vector<1x2x8x8xf32>
    %280 = tpu.concatenate %276, %277, %278, %279 in 0 : vector<1x2x8x8xf32>, vector<1x2x8x8xf32>, vector<1x2x8x8xf32>, vector<1x2x8x8xf32> -> vector<4x2x8x8xf32>
    %281 = vector.shape_cast %280 : vector<4x2x8x8xf32> to vector<8x8x8xf32>
    %282 = vector.shape_cast %32 : vector<2x1x8xf32> to vector<1x2x1x8xf32>
    %283 = vector.shape_cast %282 : vector<1x2x1x8xf32> to vector<1x2x1x8xf32>
    %284 = vector.broadcast %283 : vector<1x2x1x8xf32> to vector<4x2x1x8xf32>
    %285 = vector.shape_cast %284 : vector<4x2x1x8xf32> to vector<8x1x8xf32>
    %cst_97 = arith.constant 5.000000e-01 : f32
    %286 = vector.broadcast %cst_97 : f32 to vector<8x1x8xf32>
    %287 = arith.cmpf ogt, %285, %286 : vector<8x1x8xf32>
    "tpu.trace_start"() <{level = 10 : i32, message = "zqd,zkd->zqk"}> : () -> ()
    %cst_98 = arith.constant dense<0.000000e+00> : vector<8x8x8xf32>
    %288 = tpu.matmul %251, %266, %cst_98 {dimension_numbers = #tpu.dot_dimension_numbers<[2], [2], [1], [1], [0, 0, 0, 1, 1, 1], [0], [0]>} : vector<8x8x8xf32>, vector<8x8x8xf32>, vector<8x8x8xf32> -> vector<8x8x8xf32>
    "tpu.trace_stop"() : () -> ()
    %cst_99 = arith.constant 0.353553385 : f32
    %289 = vector.broadcast %cst_99 : f32 to vector<8x8x8xf32>
    %290 = arith.mulf %288, %289 : vector<8x8x8xf32>
    %cst_100 = arith.constant -1.000000e+30 : f32
    %291 = vector.shape_cast %287 : vector<8x1x8xi1> to vector<8x1x8xi1>
    %292 = vector.broadcast %291 : vector<8x1x8xi1> to vector<8x8x8xi1>
    %293 = vector.broadcast %cst_100 : f32 to vector<8x8x8xf32>
    %294 = arith.select %292, %293, %290 : vector<8x8x8xi1>, vector<8x8x8xf32>
    %cst_101 = arith.constant dense<0xFF800000> : vector<8x8xf32>
    %295 = vector.multi_reduction <maximumf>, %294, %cst_101 [2] : vector<8x8x8xf32> to vector<8x8xf32>
    %296 = vector.shape_cast %295 : vector<8x8xf32> to vector<8x8x1xf32>
    %297 = vector.broadcast %296 : vector<8x8x1xf32> to vector<8x8x8xf32>
    %298 = arith.subf %294, %297 : vector<8x8x8xf32>
    %299 = math.exp %298 : vector<8x8x8xf32>
    %cst_102 = arith.constant dense<0.000000e+00> : vector<8x8xf32>
    %300 = vector.multi_reduction <add>, %299, %cst_102 [2] : vector<8x8x8xf32> to vector<8x8xf32>
    %301 = vector.shape_cast %300 : vector<8x8xf32> to vector<8x8x1xf32>
    %302 = vector.broadcast %301 : vector<8x8x1xf32> to vector<8x8x8xf32>
    %303 = arith.divf %299, %302 : vector<8x8x8xf32>
    "tpu.trace_start"() <{level = 10 : i32, message = "zqk,zkd->zqd"}> : () -> ()
    %cst_103 = arith.constant dense<0.000000e+00> : vector<8x8x8xf32>
    %304 = tpu.matmul %303, %281, %cst_103 {dimension_numbers = #tpu.dot_dimension_numbers<[2], [1], [1], [2], [0, 0, 0, 1, 1, 2], [0], [0]>} : vector<8x8x8xf32>, vector<8x8x8xf32>, vector<8x8x8xf32> -> vector<8x8x8xf32>
    "tpu.trace_stop"() : () -> ()
    %305 = vector.extract_strided_slice %304 {offsets = [0, 0, 0], sizes = [2, 8, 8], strides = [1, 1, 1]} : vector<8x8x8xf32> to vector<2x8x8xf32>
    %306 = vector.shape_cast %305 : vector<2x8x8xf32> to vector<16x8xf32>
    %307 = vector.extract_strided_slice %304 {offsets = [2, 0, 0], sizes = [2, 8, 8], strides = [1, 1, 1]} : vector<8x8x8xf32> to vector<2x8x8xf32>
    %308 = vector.shape_cast %307 : vector<2x8x8xf32> to vector<16x8xf32>
    %309 = vector.extract_strided_slice %304 {offsets = [4, 0, 0], sizes = [2, 8, 8], strides = [1, 1, 1]} : vector<8x8x8xf32> to vector<2x8x8xf32>
    %310 = vector.shape_cast %309 : vector<2x8x8xf32> to vector<16x8xf32>
    %311 = vector.extract_strided_slice %304 {offsets = [6, 0, 0], sizes = [2, 8, 8], strides = [1, 1, 1]} : vector<8x8x8xf32> to vector<2x8x8xf32>
    %312 = vector.shape_cast %311 : vector<2x8x8xf32> to vector<16x8xf32>
    %313 = tpu.concatenate %306, %308, %310, %312 in 1 : vector<16x8xf32>, vector<16x8xf32>, vector<16x8xf32>, vector<16x8xf32> -> vector<16x32xf32>
    %cst_104 = arith.constant dense<0.000000e+00> : vector<16x32xf32>
    %314 = tpu.matmul %313, %16, %cst_104 {dimension_numbers = #tpu.dot_dimension_numbers<[1], [0], [0], [1], [0, 0, 1, 1], [], []>} : vector<16x32xf32>, vector<32x32xf32>, vector<16x32xf32> -> vector<16x32xf32>
    %315 = vector.broadcast %17 : vector<1x32xf32> to vector<16x32xf32>
    %316 = arith.addf %314, %315 : vector<16x32xf32>
    %317 = arith.addf %316, %33 : vector<16x32xf32>
    %cst_105 = arith.constant dense<0.000000e+00> : vector<16xf32>
    %318 = vector.multi_reduction <add>, %317, %cst_105 [1] : vector<16x32xf32> to vector<16xf32>
    %319 = vector.shape_cast %318 : vector<16xf32> to vector<16x1xf32>
    %cst_106 = arith.constant dense<0.000000e+00> : vector<16xf32>
    %320 = vector.multi_reduction <add>, %211, %cst_106 [1] : vector<16x32xf32> to vector<16xf32>
    %321 = vector.shape_cast %320 : vector<16xf32> to vector<16x1xf32>
    %322 = arith.addf %319, %321 : vector<16x1xf32>
    %cst_107 = arith.constant 1.562500e-02 : f32
    %323 = vector.broadcast %cst_107 : f32 to vector<16x1xf32>
    %324 = arith.mulf %322, %323 : vector<16x1xf32>
    %325 = vector.broadcast %324 : vector<16x1xf32> to vector<16x32xf32>
    %326 = arith.subf %317, %325 : vector<16x32xf32>
    %327 = vector.broadcast %324 : vector<16x1xf32> to vector<16x32xf32>
    %328 = arith.subf %211, %327 : vector<16x32xf32>
    %329 = arith.mulf %326, %326 : vector<16x32xf32>
    %cst_108 = arith.constant dense<0.000000e+00> : vector<16xf32>
    %330 = vector.multi_reduction <add>, %329, %cst_108 [1] : vector<16x32xf32> to vector<16xf32>
    %331 = vector.shape_cast %330 : vector<16xf32> to vector<16x1xf32>
    %332 = arith.mulf %328, %328 : vector<16x32xf32>
    %cst_109 = arith.constant dense<0.000000e+00> : vector<16xf32>
    %333 = vector.multi_reduction <add>, %332, %cst_109 [1] : vector<16x32xf32> to vector<16xf32>
    %334 = vector.shape_cast %333 : vector<16xf32> to vector<16x1xf32>
    %335 = arith.addf %331, %334 : vector<16x1xf32>
    %cst_110 = arith.constant 1.562500e-02 : f32
    %336 = vector.broadcast %cst_110 : f32 to vector<16x1xf32>
    %337 = arith.mulf %335, %336 : vector<16x1xf32>
    %cst_111 = arith.constant 9.99999974E-6 : f32
    %338 = vector.broadcast %cst_111 : f32 to vector<16x1xf32>
    %339 = arith.addf %337, %338 : vector<16x1xf32>
    %340 = math.rsqrt %339 : vector<16x1xf32>
    %341 = vector.broadcast %340 : vector<16x1xf32> to vector<16x32xf32>
    %342 = arith.mulf %326, %341 : vector<16x32xf32>
    %343 = vector.extract_strided_slice %18 {offsets = [0, 0], sizes = [1, 32], strides = [1, 1]} : vector<1x64xf32> to vector<1x32xf32>
    %344 = vector.broadcast %343 : vector<1x32xf32> to vector<16x32xf32>
    %345 = arith.mulf %342, %344 : vector<16x32xf32>
    %346 = vector.extract_strided_slice %19 {offsets = [0, 0], sizes = [1, 32], strides = [1, 1]} : vector<1x64xf32> to vector<1x32xf32>
    %347 = vector.broadcast %346 : vector<1x32xf32> to vector<16x32xf32>
    %348 = arith.addf %345, %347 : vector<16x32xf32>
    %349 = vector.broadcast %340 : vector<16x1xf32> to vector<16x32xf32>
    %350 = arith.mulf %328, %349 : vector<16x32xf32>
    %351 = vector.extract_strided_slice %18 {offsets = [0, 32], sizes = [1, 32], strides = [1, 1]} : vector<1x64xf32> to vector<1x32xf32>
    %352 = vector.broadcast %351 : vector<1x32xf32> to vector<16x32xf32>
    %353 = arith.mulf %350, %352 : vector<16x32xf32>
    %354 = vector.extract_strided_slice %19 {offsets = [0, 32], sizes = [1, 32], strides = [1, 1]} : vector<1x64xf32> to vector<1x32xf32>
    %355 = vector.broadcast %354 : vector<1x32xf32> to vector<16x32xf32>
    %356 = arith.addf %353, %355 : vector<16x32xf32>
    %357 = vector.extract_strided_slice %20 {offsets = [0, 0], sizes = [32, 32], strides = [1, 1]} : vector<64x32xf32> to vector<32x32xf32>
    %cst_112 = arith.constant dense<0.000000e+00> : vector<16x32xf32>
    %358 = tpu.matmul %348, %357, %cst_112 {dimension_numbers = #tpu.dot_dimension_numbers<[1], [0], [0], [1], [0, 0, 1, 1], [], []>} : vector<16x32xf32>, vector<32x32xf32>, vector<16x32xf32> -> vector<16x32xf32>
    %359 = vector.extract_strided_slice %20 {offsets = [32, 0], sizes = [32, 32], strides = [1, 1]} : vector<64x32xf32> to vector<32x32xf32>
    %cst_113 = arith.constant dense<0.000000e+00> : vector<16x32xf32>
    %360 = tpu.matmul %356, %359, %cst_113 {dimension_numbers = #tpu.dot_dimension_numbers<[1], [0], [0], [1], [0, 0, 1, 1], [], []>} : vector<16x32xf32>, vector<32x32xf32>, vector<16x32xf32> -> vector<16x32xf32>
    %361 = arith.addf %358, %360 : vector<16x32xf32>
    %362 = vector.broadcast %21 : vector<1x32xf32> to vector<16x32xf32>
    %363 = arith.addf %361, %362 : vector<16x32xf32>
    %364 = arith.negf %363 : vector<16x32xf32>
    %365 = math.exp %364 : vector<16x32xf32>
    %cst_114 = arith.constant 1.000000e+00 : f32
    %366 = vector.broadcast %cst_114 : f32 to vector<16x32xf32>
    %367 = arith.addf %366, %365 : vector<16x32xf32>
    %368 = arith.divf %366, %367 : vector<16x32xf32>
    %369 = arith.mulf %368, %211 : vector<16x32xf32>
    %cst_115 = arith.constant 1.000000e+00 : f32
    %370 = vector.broadcast %cst_115 : f32 to vector<16x32xf32>
    %371 = arith.subf %370, %368 : vector<16x32xf32>
    %372 = arith.mulf %371, %317 : vector<16x32xf32>
    %373 = arith.addf %369, %372 : vector<16x32xf32>
    %cst_116 = arith.constant dense<0.000000e+00> : vector<16xf32>
    %374 = vector.multi_reduction <add>, %373, %cst_116 [1] : vector<16x32xf32> to vector<16xf32>
    %375 = vector.shape_cast %374 : vector<16xf32> to vector<16x1xf32>
    %cst_117 = arith.constant 3.200000e+01 : f32
    %376 = vector.broadcast %cst_117 : f32 to vector<16x1xf32>
    %377 = arith.divf %375, %376 : vector<16x1xf32>
    %378 = vector.broadcast %377 : vector<16x1xf32> to vector<16x32xf32>
    %379 = arith.subf %373, %378 : vector<16x32xf32>
    %380 = arith.mulf %379, %379 : vector<16x32xf32>
    %cst_118 = arith.constant dense<0.000000e+00> : vector<16xf32>
    %381 = vector.multi_reduction <add>, %380, %cst_118 [1] : vector<16x32xf32> to vector<16xf32>
    %382 = vector.shape_cast %381 : vector<16xf32> to vector<16x1xf32>
    %cst_119 = arith.constant 3.200000e+01 : f32
    %383 = vector.broadcast %cst_119 : f32 to vector<16x1xf32>
    %384 = arith.divf %382, %383 : vector<16x1xf32>
    %cst_120 = arith.constant 9.99999974E-6 : f32
    %385 = vector.broadcast %cst_120 : f32 to vector<16x1xf32>
    %386 = arith.addf %384, %385 : vector<16x1xf32>
    %387 = math.rsqrt %386 : vector<16x1xf32>
    %388 = vector.broadcast %387 : vector<16x1xf32> to vector<16x32xf32>
    %389 = arith.mulf %379, %388 : vector<16x32xf32>
    %390 = vector.broadcast %22 : vector<1x32xf32> to vector<16x32xf32>
    %391 = arith.mulf %389, %390 : vector<16x32xf32>
    %392 = vector.broadcast %23 : vector<1x32xf32> to vector<16x32xf32>
    %393 = arith.addf %391, %392 : vector<16x32xf32>
    %cst_121 = arith.constant dense<0.000000e+00> : vector<16x64xf32>
    %394 = tpu.matmul %393, %24, %cst_121 {dimension_numbers = #tpu.dot_dimension_numbers<[1], [0], [0], [1], [0, 0, 1, 1], [], []>} : vector<16x32xf32>, vector<32x64xf32>, vector<16x64xf32> -> vector<16x64xf32>
    %395 = vector.broadcast %25 : vector<1x64xf32> to vector<16x64xf32>
    %396 = arith.addf %394, %395 : vector<16x64xf32>
    %cst_122 = arith.constant 0.000000e+00 : f32
    %397 = vector.broadcast %cst_122 : f32 to vector<16x64xf32>
    %398 = arith.maximumf %396, %397 : vector<16x64xf32>
    %cst_123 = arith.constant dense<0.000000e+00> : vector<16x32xf32>
    %399 = tpu.matmul %398, %26, %cst_123 {dimension_numbers = #tpu.dot_dimension_numbers<[1], [0], [0], [1], [0, 0, 1, 1], [], []>} : vector<16x64xf32>, vector<64x32xf32>, vector<16x32xf32> -> vector<16x32xf32>
    %400 = vector.broadcast %27 : vector<1x32xf32> to vector<16x32xf32>
    %401 = arith.addf %399, %400 : vector<16x32xf32>
    %402 = arith.addf %401, %373 : vector<16x32xf32>
    %403 = vector.shape_cast %402 : vector<16x32xf32> to vector<2x8x32xf32>
    %c0_124 = arith.constant 0 : index
    %c0_125 = arith.constant 0 : index
    %c0_126 = arith.constant 0 : index
    %404 = vector.load %arg34[%c0_124, %c0_125, %c0_126] : memref<2x8x32xf32, #tpu.memory_space<vmem>>, vector<2x8x32xf32>
    tpu.vector_store %arg34[%c0_124, %c0_125, %c0_126], %403 {strides = array<i32>} : memref<2x8x32xf32, #tpu.memory_space<vmem>>, vector<2x8x32xf32>,
    return
  }
  func.func @transform_0(%arg0: i32) -> (i32, i32, i32) {
    %c0_i32 = arith.constant 0 : i32
    %c0_i32_0 = arith.constant 0 : i32
    %c0_i32_1 = arith.constant 0 : i32
    return %arg0, %c0_i32, %c0_i32_0 : i32, i32, i32
  }
  func.func @transform_1(%arg0: i32) -> (i32, i32, i32) {
    %c0_i32 = arith.constant 0 : i32
    %c0_i32_0 = arith.constant 0 : i32
    %c0_i32_1 = arith.constant 0 : i32
    return %arg0, %c0_i32, %c0_i32_0 : i32, i32, i32
  }
  func.func @transform_2(%arg0: i32) -> (i32, i32) {
    %c0_i32 = arith.constant 0 : i32
    %c0_i32_0 = arith.constant 0 : i32
    %c0_i32_1 = arith.constant 0 : i32
    return %c0_i32, %c0_i32_0 : i32, i32
  }
  func.func @transform_3(%arg0: i32) -> (i32, i32, i32) {
    %c0_i32 = arith.constant 0 : i32
    %c0_i32_0 = arith.constant 0 : i32
    %c0_i32_1 = arith.constant 0 : i32
    return %arg0, %c0_i32, %c0_i32_0 : i32, i32, i32
  }
  func.func @transform_4(%arg0: i32) -> (i32, i32, i32) {
    %c0_i32 = arith.constant 0 : i32
    %c0_i32_0 = arith.constant 0 : i32
    %c0_i32_1 = arith.constant 0 : i32
    return %arg0, %c0_i32, %c0_i32_0 : i32, i32, i32
  }
  func.func @transform_5(%arg0: i32) -> (i32, i32) {
    %c0_i32 = arith.constant 0 : i32
    %c0_i32_0 = arith.constant 0 : i32
    %c0_i32_1 = arith.constant 0 : i32
    return %c0_i32, %c0_i32_0 : i32, i32
  }
  func.func @transform_6(%arg0: i32) -> (i32, i32) {
    %c0_i32 = arith.constant 0 : i32
    %c0_i32_0 = arith.constant 0 : i32
    %c0_i32_1 = arith.constant 0 : i32
    return %c0_i32, %c0_i32_0 : i32, i32
  }
  func.func @transform_7(%arg0: i32) -> (i32, i32) {
    %c0_i32 = arith.constant 0 : i32
    %c0_i32_0 = arith.constant 0 : i32
    %c0_i32_1 = arith.constant 0 : i32
    return %c0_i32, %c0_i32_0 : i32, i32
  }
  func.func @transform_8(%arg0: i32) -> (i32, i32) {
    %c0_i32 = arith.constant 0 : i32
    %c0_i32_0 = arith.constant 0 : i32
    %c0_i32_1 = arith.constant 0 : i32
    return %c0_i32, %c0_i32_0 : i32, i32
  }
  func.func @transform_9(%arg0: i32) -> (i32, i32) {
    %c0_i32 = arith.constant 0 : i32
    %c0_i32_0 = arith.constant 0 : i32
    %c0_i32_1 = arith.constant 0 : i32
    return %c0_i32, %c0_i32_0 : i32, i32
  }
  func.func @transform_10(%arg0: i32) -> (i32, i32) {
    %c0_i32 = arith.constant 0 : i32
    %c0_i32_0 = arith.constant 0 : i32
    %c0_i32_1 = arith.constant 0 : i32
    return %c0_i32, %c0_i32_0 : i32, i32
  }
  func.func @transform_11(%arg0: i32) -> (i32, i32) {
    %c0_i32 = arith.constant 0 : i32
    %c0_i32_0 = arith.constant 0 : i32
    %c0_i32_1 = arith.constant 0 : i32
    return %c0_i32, %c0_i32_0 : i32, i32
  }
  func.func @transform_12(%arg0: i32) -> (i32, i32) {
    %c0_i32 = arith.constant 0 : i32
    %c0_i32_0 = arith.constant 0 : i32
    %c0_i32_1 = arith.constant 0 : i32
    return %c0_i32, %c0_i32_0 : i32, i32
  }
  func.func @transform_13(%arg0: i32) -> (i32, i32) {
    %c0_i32 = arith.constant 0 : i32
    %c0_i32_0 = arith.constant 0 : i32
    %c0_i32_1 = arith.constant 0 : i32
    return %c0_i32, %c0_i32_0 : i32, i32
  }
  func.func @transform_14(%arg0: i32) -> (i32, i32) {
    %c0_i32 = arith.constant 0 : i32
    %c0_i32_0 = arith.constant 0 : i32
    %c0_i32_1 = arith.constant 0 : i32
    return %c0_i32, %c0_i32_0 : i32, i32
  }
  func.func @transform_15(%arg0: i32) -> (i32, i32) {
    %c0_i32 = arith.constant 0 : i32
    %c0_i32_0 = arith.constant 0 : i32
    %c0_i32_1 = arith.constant 0 : i32
    return %c0_i32, %c0_i32_0 : i32, i32
  }
  func.func @transform_16(%arg0: i32) -> (i32, i32) {
    %c0_i32 = arith.constant 0 : i32
    %c0_i32_0 = arith.constant 0 : i32
    %c0_i32_1 = arith.constant 0 : i32
    return %c0_i32, %c0_i32_0 : i32, i32
  }
  func.func @transform_17(%arg0: i32) -> (i32, i32) {
    %c0_i32 = arith.constant 0 : i32
    %c0_i32_0 = arith.constant 0 : i32
    %c0_i32_1 = arith.constant 0 : i32
    return %c0_i32, %c0_i32_0 : i32, i32
  }
  func.func @transform_18(%arg0: i32) -> (i32, i32) {
    %c0_i32 = arith.constant 0 : i32
    %c0_i32_0 = arith.constant 0 : i32
    %c0_i32_1 = arith.constant 0 : i32
    return %c0_i32, %c0_i32_0 : i32, i32
  }
  func.func @transform_19(%arg0: i32) -> (i32, i32) {
    %c0_i32 = arith.constant 0 : i32
    %c0_i32_0 = arith.constant 0 : i32
    %c0_i32_1 = arith.constant 0 : i32
    return %c0_i32, %c0_i32_0 : i32, i32
  }
  func.func @transform_20(%arg0: i32) -> (i32, i32) {
    %c0_i32 = arith.constant 0 : i32
    %c0_i32_0 = arith.constant 0 : i32
    %c0_i32_1 = arith.constant 0 : i32
    return %c0_i32, %c0_i32_0 : i32, i32
  }
  func.func @transform_21(%arg0: i32) -> (i32, i32) {
    %c0_i32 = arith.constant 0 : i32
    %c0_i32_0 = arith.constant 0 : i32
    %c0_i32_1 = arith.constant 0 : i32
    return %c0_i32, %c0_i32_0 : i32, i32
  }
  func.func @transform_22(%arg0: i32) -> (i32, i32) {
    %c0_i32 = arith.constant 0 : i32
    %c0_i32_0 = arith.constant 0 : i32
    %c0_i32_1 = arith.constant 0 : i32
    return %c0_i32, %c0_i32_0 : i32, i32
  }
  func.func @transform_23(%arg0: i32) -> (i32, i32) {
    %c0_i32 = arith.constant 0 : i32
    %c0_i32_0 = arith.constant 0 : i32
    %c0_i32_1 = arith.constant 0 : i32
    return %c0_i32, %c0_i32_0 : i32, i32
  }
  func.func @transform_24(%arg0: i32) -> (i32, i32) {
    %c0_i32 = arith.constant 0 : i32
    %c0_i32_0 = arith.constant 0 : i32
    %c0_i32_1 = arith.constant 0 : i32
    return %c0_i32, %c0_i32_0 : i32, i32
  }
  func.func @transform_25(%arg0: i32) -> (i32, i32) {
    %c0_i32 = arith.constant 0 : i32
    %c0_i32_0 = arith.constant 0 : i32
    %c0_i32_1 = arith.constant 0 : i32
    return %c0_i32, %c0_i32_0 : i32, i32
  }
  func.func @transform_26(%arg0: i32) -> (i32, i32) {
    %c0_i32 = arith.constant 0 : i32
    %c0_i32_0 = arith.constant 0 : i32
    %c0_i32_1 = arith.constant 0 : i32
    return %c0_i32, %c0_i32_0 : i32, i32
  }
  func.func @transform_27(%arg0: i32) -> (i32, i32) {
    %c0_i32 = arith.constant 0 : i32
    %c0_i32_0 = arith.constant 0 : i32
    %c0_i32_1 = arith.constant 0 : i32
    return %c0_i32, %c0_i32_0 : i32, i32
  }
  func.func @transform_28(%arg0: i32) -> (i32, i32) {
    %c0_i32 = arith.constant 0 : i32
    %c0_i32_0 = arith.constant 0 : i32
    %c0_i32_1 = arith.constant 0 : i32
    return %c0_i32, %c0_i32_0 : i32, i32
  }
  func.func @transform_29(%arg0: i32) -> (i32, i32) {
    %c0_i32 = arith.constant 0 : i32
    %c0_i32_0 = arith.constant 0 : i32
    %c0_i32_1 = arith.constant 0 : i32
    return %c0_i32, %c0_i32_0 : i32, i32
  }
  func.func @transform_30(%arg0: i32) -> (i32, i32) {
    %c0_i32 = arith.constant 0 : i32
    %c0_i32_0 = arith.constant 0 : i32
    %c0_i32_1 = arith.constant 0 : i32
    return %c0_i32, %c0_i32_0 : i32, i32
  }
  func.func @transform_31(%arg0: i32) -> (i32, i32) {
    %c0_i32 = arith.constant 0 : i32
    %c0_i32_0 = arith.constant 0 : i32
    %c0_i32_1 = arith.constant 0 : i32
    return %c0_i32, %c0_i32_0 : i32, i32
  }
  func.func @transform_32(%arg0: i32) -> (i32, i32) {
    %c0_i32 = arith.constant 0 : i32
    %c0_i32_0 = arith.constant 0 : i32
    %c0_i32_1 = arith.constant 0 : i32
    return %c0_i32, %c0_i32_0 : i32, i32
  }
  func.func @transform_33(%arg0: i32) -> (i32, i32, i32) {
    %c0_i32 = arith.constant 0 : i32
    %c0_i32_0 = arith.constant 0 : i32
    %c0_i32_1 = arith.constant 0 : i32
    return %arg0, %c0_i32, %c0_i32_0 : i32, i32, i32
  }
}

</mosaic_0001>

<bundles_post_ra>
// kernel: tpu_custom_call.1
= control target key start
LH: loop header
LB: loop body
LE: loop exit
PB: predicated region body
PF: predicated region fallthrough
CT: control target
= control target key end

     0   :  { %s8035_s6 = smov 1   ;;  %s8036_s10 = smov 2   ;;  %s9511_s0 = inlined_call_operand.smem [shape: u32[34], index: -1, kind: input, shape index: {}] }
   0x1   :  { %s8117_s5 = sld [smem:[%s9511_s0]]   ;;  %s8037_s14 = smov 3  }
   0x2   :  { %s8122_s9 = sld [smem:[%s9511_s0 + %s8035_s6]]   ;;  %s8038_s18 = smov 4  }
   0x3   :  { %s8127_s13 = sld [smem:[%s9511_s0 + %s8036_s10]]   ;;  %s8039_s22 = smov 5  }
   0x4   :  { %s8132_s17 = sld [smem:[%s9511_s0 + %s8037_s14]]   ;;  %s8040_s26 = smov 6  }
   0x5   :  { %s8137_s21 = sld [smem:[%s9511_s0 + %s8038_s18]]   ;;  %s8041_s30 = smov 7  }
   0x6   :  { %s8142_s25 = sld [smem:[%s9511_s0 + %s8039_s22]]   ;;  %s8042_s4 = smov 8  }
   0x7   :  { %9531 = sst [smem:[#allocation41_spill]] %s8117_s5  ;;  %s8043_s10 = smov 9  }
   0x8   :  { %9532 = sst [smem:[#allocation42_spill]] %s8122_s9  ;;  %s8044_s15 = smov 10  }
   0x9   :  { %9533 = sst [smem:[#allocation43_spill]] %s8127_s13  ;;  %s8045_s20 = smov 11  }
   0xa   :  { %9534 = sst [smem:[#allocation44_spill]] %s8132_s17  ;;  %s8047_s1 = smov 13  }
   0xb   :  { %9535 = sst [smem:[#allocation45_spill]] %s8137_s21  ;;  %s8048_s7 = smov 14  }
   0xc   :  { %9536 = sst [smem:[#allocation46_spill]] %s8142_s25  ;;  %s8050_s22 = smov 16  }
   0xd   :  { %s8147_s29 = sld [smem:[%s9511_s0 + %s8040_s26]]   ;;  %s8046_s26 = smov 12  }
   0xe   :  { %s8152_s3 = sld [smem:[%s9511_s0 + %s8041_s30]]   ;;  %s8051_s28 = smov 17  }
   0xf   :  { %s8157_s8 = sld [smem:[%s9511_s0 + %s8042_s4]]  }
  0x10   :  { %s8162_s14 = sld [smem:[%s9511_s0 + %s8043_s10]]  }
  0x11   :  { %s8167_s19 = sld [smem:[%s9511_s0 + %s8044_s15]]   ;;  %s8049_s15 = smov 15  }
  0x12   :  { %s8172_s24 = sld [smem:[%s9511_s0 + %s8045_s20]]  }
  0x13   :  { %s8177_s30 = sld [smem:[%s9511_s0 + %s8046_s26]]  }
  0x14   :  { %9537 = sst [smem:[#allocation47_spill]] %s8152_s3 }
  0x15   :  { %9538 = sst [smem:[#allocation48_spill]] %s8157_s8 }
  0x16   :  { %9539 = sst [smem:[#allocation49_spill]] %s8162_s14 }
  0x17   :  { %s8182_s6 = sld [smem:[%s9511_s0 + %s8047_s1]]  }
  0x18   :  { %9540 = sst [smem:[#allocation50_spill]] %s8172_s24 }
  0x19   :  { %s8187_s12 = sld [smem:[%s9511_s0 + %s8048_s7]]   ;;  %s8052_s7 = smov 18  }
  0x1a   :  { %s8192_s20 = sld [smem:[%s9511_s0 + %s8049_s15]]   ;;  %s8053_s15 = smov 19  }
  0x1b   :  { %s8197_s27 = sld [smem:[%s9511_s0 + %s8050_s22]]   ;;  %s8054_s22 = smov 20  }
  0x1c   :  { %s8202_s4 = sld [smem:[%s9511_s0 + %s8051_s28]]   ;;  %s8055_s28 = smov 21  }
  0x1d   :  { %9541 = sst [smem:[#allocation51_spill]] %s8182_s6 }
  0x1e   :  { %s8207_s21 = sld [smem:[%s9511_s0 + %s8052_s7]]   ;;  %s8056_s7 = smov 22  }
  0x1f   :  { %9542 = sst [smem:[#allocation52_spill]] %s8187_s12 }
  0x20   :  { %s8212_s9 = sld [smem:[%s9511_s0 + %s8053_s15]]   ;;  %s8057_s15 = smov 23  }
  0x21   :  { %s8217_s24 = sld [smem:[%s9511_s0 + %s8054_s22]]   ;;  %s8058_s22 = smov 24  }
  0x22   :  { %9543 = sst [smem:[#allocation53_spill]] %s8202_s4 }
  0x23   :  { %s8222_s6 = sld [smem:[%s9511_s0 + %s8055_s28]]   ;;  %s8059_s28 = smov 25  }
  0x24   :  { %s8227_s12 = sld [smem:[%s9511_s0 + %s8056_s7]]   ;;  %s8060_s7 = smov 26  }
  0x25   :  { %s8232_s25 = sld [smem:[%s9511_s0 + %s8057_s15]]   ;;  %s8061_s15 = smov 27  }
  0x26   :  { %9544 = sst [smem:[#allocation54_spill]] %s8212_s9 }
  0x27   :  { %s8237_s14 = sld [smem:[%s9511_s0 + %s8058_s22]]   ;;  %s8062_s22 = smov 28  }
  0x28   :  { %s8242_s3 = sld [smem:[%s9511_s0 + %s8059_s28]]   ;;  %s8063_s28 = smov 29  }
  0x29   :  { %9545 = sst [smem:[#allocation55_spill]] %s8222_s6 }
  0x2a   :  { %9546 = sst [smem:[#allocation56_spill]] %s8227_s12 }
  0x2b   :  { %9547 = sst [smem:[#allocation57_spill]] %s8232_s25 }
  0x2c   :  { %s8247_s5 = sld [smem:[%s9511_s0 + %s8060_s7]]   ;;  %s8064_s7 = smov 30  }
  0x2d   :  { %9548 = sst [smem:[#allocation58_spill]] %s8237_s14 }
  0x2e   :  { %9549 = sst [smem:[#allocation59_spill]] %s8242_s3 }
  0x2f   :  { %s8252_s17 = sld [smem:[%s9511_s0 + %s8061_s15]]   ;;  %s8065_s15 = smov 31  }
  0x30   :  { %s8257_s25 = sld [smem:[%s9511_s0 + %s8062_s22]]   ;;  %s8066_s22 = smov 32  }
  0x31   :  { %s8262_s3 = sld [smem:[%s9511_s0 + %s8063_s28]]   ;;  %s8067_s28 = smov 33  }
  0x32   :  { %9550 = sst [smem:[#allocation60_spill]] %s8247_s5 }
  0x33   :  { %s8267_s5 = sld [smem:[%s9511_s0 + %s8064_s7]]  }
  0x35   :  { %9551 = sst [smem:[#allocation61_spill]] %s8252_s17 }
  0x36   :  { %9552 = sst [smem:[#allocation62_spill]] %s8257_s25 }
  0x37   :  { %9553 = sst [smem:[#allocation63_spill]] %s8262_s3 }
  0x38   :  { %s8272_s17 = sld [smem:[%s9511_s0 + %s8065_s15]]  }
  0x39   :  { %9554 = sst [smem:[#allocation64_spill]] %s8267_s5 }
  0x3a   :  { %s8277_s25 = sld [smem:[%s9511_s0 + %s8066_s22]]  }
  0x3b   :  { %s8282_s3 = sld [smem:[%s9511_s0 + %s8067_s28]]  }
  0x40   :  { %9555 = sst [smem:[#allocation65_spill]] %s8277_s25 }
  0x41   :  { %9556 = sst [smem:[#allocation66_spill]] %s8282_s3 }
  0x42   :  { %72 = vsyncpa [#allocation3], 0 }
  0x43   :  { %73 = vsyncpa [#allocation6], 0 }
  0x44   :  { %75 = vsyncpa [#allocation6 + $0x1], 0 }
  0x45   :  { %76 = vsyncpa [#allocation9], 0 }
  0x46   :  { %77 = vsyncpa [#allocation12], 0 }
  0x47   :  { %78 = vsyncpa [#allocation15], 0 }
  0x48   :  { %79 = vsyncpa [#allocation18], 0 }
  0x49   :  { %80 = vsyncpa [#allocation21], 0 }
  0x4a   :  { %81 = vsyncpa [#allocation24], 0 }
  0x4b   :  { %82 = vsyncpa [#allocation27], 0 }
  0x4c   :  { %83 = vsyncpa [#allocation4], 0 }
  0x4d   :  { %85 = vsyncpa [#allocation4 + $0x1], 0  ;;  %s8284_s7 = smov 0   ;;  %s8286_s10 = smov 0  }
  0x4e   :  { %s8288_s11 = smov 0   ;;  %s8290_s0 = smov 0  }
  0x4f LB: > { %s8068_s15 = smov [#allocation7]   ;;  %s8305_s18 = sadd.s32 4294967295, %s8033_s0   ;;  %s8033_s0 = sphi %s8290_s0, %s9633_s0   ;;  %s8029_s11 = sphi %s8288_s11, %s9632_s11   ;;  %s8025_s10 = sphi %s8286_s10, %s9631_s10   ;;  %s8021_s7 = sphi %s8284_s7, %s9630_s7  }
  0x50   : > { %s864_s16 = sshll.u32 %s8068_s15, 4  ;;  %p6489_p0 = scmp.ge.s32.totalorder %s8033_s0, 1  ;;  %s865_s16 = int_to_ptr.vmem [resolvable:$true] %s864_s16 }
  0x51   : > { %p9518_p1 = scmp.eq.s32.totalorder %s8305_s18, 0  ;;  %p835_p2 = scmp.lt.s32.totalorder %s8033_s0, 3 }
  0x52   : > { %s8069_s23 = smov [#allocation8]   ;;  %s8070_s28 = smov [#allocation11]  }
  0x53   : > { %p8310_p3 = pnand %p6489_p0, %p835_p2  ;;  %s878_s26 = sshll.u32 %s8069_s23, 4  ;;  %s8317_s26 = int_to_ptr.vmem [resolvable:$true] %s878_s26 }
  0x54   : > { %s906_s1 = sshll.u32 %s8070_s28, 4  ;;  %s8071_s15 = smov [#allocation14]   ;;  %s8325_s1 = int_to_ptr.vmem [resolvable:$true] %s906_s1 }
  0x55   : > { %s9557_s22 = scalar_select %p8310_p3, 1, 0 }
  0x56   : > { %p7208_p5 = pneg %p8310_p3  ;;  %s8327_s3 = sshll.u32 %s8071_s15, 4  ;;  %s935_s3 = int_to_ptr.vmem [resolvable:$true] %s8327_s3 }
  0x57   : > { %s7500_s23 = scalar_lea.vmem %s865_s16, 16  ;;  %s7507_s28 = scalar_lea.vmem %s865_s16, 32 }
  0x58   : > { %p8321_p6 = pnand %p7208_p5, %p9518_p1  ;;  %p7501_p8 = scmp.ne.s32.totalorder %s865_s16, %s7500_s23 }
  0x59   : > { %p7508_p11 = scmp.lt.s32.totalorder %s865_s16, %s865_s16  ;;  %p7509_p12 = scmp.lt.s32.totalorder %s7507_s28, %s7500_s23 }
  0x5a   : > { %p8331_p7 = pneg %p8321_p6 }
  0x5b   : > { %p7510_p13 = por %p7509_p12, %p7508_p11 }
  0x5c   : > { %p7503_p9 = pnand %p7501_p8, %p8331_p7 }
  0x5e   : > { %p7504_p10 = pneg %p7503_p9 }
  0x60   : > { %p7511_p0 = pnand %p7510_p13, %p7504_p10 }
  0x62   : > { %7514 = shalt.err (!%p7511_p0)
}
  0x63   : > { %7214 = dma.hbm_to_vmem [thread:$0]  (!%p8321_p6), %s8147_s29, 16, %s865_s16, [#allocation6]  }
  0x64   : > { %s7526_s15 = scalar_lea.vmem %s8317_s26, 16  ;;  %s7533_s5 = scalar_lea.vmem %s8317_s26, 32 }
  0x65   : > { %p7527_p2 = scmp.ne.s32.totalorder %s8317_s26, %s7526_s15  ;;  %p7534_p9 = scmp.lt.s32.totalorder %s8317_s26, %s8317_s26 }
  0x66   : > { %p7535_p11 = scmp.lt.s32.totalorder %s7533_s5, %s7526_s15 }
  0x67   : > { %p7529_p5 = pnand %p7527_p2, %p8331_p7 }
  0x68   : > { %p7536_p10 = por %p7535_p11, %p7534_p9 }
  0x69   : > { %p7530_p8 = pneg %p7529_p5 }
  0x6b   : > { %p7537_p12 = pnand %p7536_p10, %p7530_p8 }
  0x6d   : > { %7540 = shalt.err (!%p7537_p12)
}
  0x6e   : > { %s9560_s8 = sld [smem:[#allocation48_spill]]  ;;  %s7552_s16 = scalar_lea.vmem %s8325_s1, 16 }
  0x6f   : > { %p7553_p13 = scmp.ne.s32.totalorder %s8325_s1, %s7552_s16  ;;  %s7559_s23 = scalar_lea.vmem %s8325_s1, 32 }
  0x70   : > { %p7560_p5 = scmp.lt.s32.totalorder %s8325_s1, %s8325_s1  ;;  %p7561_p8 = scmp.lt.s32.totalorder %s7559_s23, %s7552_s16 }
  0x71   : > { %p7555_p0 = pnand %p7553_p13, %p8331_p7 }
  0x72   : > { %p7562_p9 = por %p7561_p8, %p7560_p5 }
  0x73   : > { %p7556_p2 = pneg %p7555_p0 }
  0x74   : > { %7217 = dma.hbm_to_vmem [thread:$0]  (!%p8321_p6), %s9560_s8, 16, %s8317_s26, [#allocation9]  }
  0x75   : > { %p7563_p11 = pnand %p7562_p9, %p7556_p2 }
  0x77   : > { %7566 = shalt.err (!%p7563_p11)
}
  0x78   : > { %7223 = dma.hbm_to_vmem [thread:$0]  (!%p8321_p6), %s8177_s30, 16, %s8325_s1, [#allocation12]  }
  0x79   : > { %s8072_s5 = smov [#allocation17]   ;;  %s7578_s28 = scalar_lea.vmem %s935_s3, 16 }
  0x7a   : > { %s958_s26 = sshll.u32 %s8072_s5, 4  ;;  %p7579_p10 = scmp.ne.s32.totalorder %s935_s3, %s7578_s28  ;;  %s959_s26 = int_to_ptr.vmem [resolvable:$true] %s958_s26 }
  0x7b   : > { %s7585_s15 = scalar_lea.vmem %s935_s3, 32  ;;  %p7586_p0 = scmp.lt.s32.totalorder %s935_s3, %s935_s3 }
  0x7c   : > { %p7581_p12 = pnand %p7579_p10, %p8331_p7  ;;  %p7587_p5 = scmp.lt.s32.totalorder %s7585_s15, %s7578_s28 }
  0x7e   : > { %p7582_p13 = pneg %p7581_p12  ;;  %p7588_p2 = por %p7587_p5, %p7586_p0 }
  0x80   : > { %p7589_p8 = pnand %p7588_p2, %p7582_p13 }
  0x82   : > { %7592 = shalt.err (!%p7589_p8)
}
  0x83   : > { %7229 = dma.hbm_to_vmem [thread:$0]  (!%p8321_p6), %s8197_s27, 16, %s935_s3, [#allocation15]  }
  0x84   : > { %s7604_s1 = scalar_lea.vmem %s959_s26, 16  ;;  %s7611_s16 = scalar_lea.vmem %s959_s26, 32 }
  0x85   : > { %p7605_p9 = scmp.ne.s32.totalorder %s959_s26, %s7604_s1  ;;  %p7612_p10 = scmp.lt.s32.totalorder %s959_s26, %s959_s26 }
  0x86   : > { %p7613_p12 = scmp.lt.s32.totalorder %s7611_s16, %s7604_s1 }
  0x87   : > { %p7607_p11 = pnand %p7605_p9, %p8331_p7 }
  0x88   : > { %p7614_p1 = por %p7613_p12, %p7612_p10 }
  0x89   : > { %p7608_p4 = pneg %p7607_p11 }
  0x8b   : > { %p7615_p3 = pnand %p7614_p1, %p7608_p4 }
  0x8d   : > { %7618 = shalt.err (!%p7615_p3)
}
  0x8e   : > { %7235 = dma.hbm_to_vmem [thread:$0]  (!%p8321_p6), %s8207_s21, 16, %s959_s26, [#allocation18]  }
  0x8f   : > { %s8073_s23 = smov [#allocation20]   ;;  %s8074_s3 = smov [#allocation23]  }
  0x90   : > { %s982_s5 = sshll.u32 %s8073_s23, 4  ;;  %s1006_s28 = sshll.u32 %s8074_s3, 4  ;;  %s983_s5 = int_to_ptr.vmem [resolvable:$true] %s982_s5  ;;  %s1007_s28 = int_to_ptr.vmem [resolvable:$true] %s1006_s28 }
  0x91   : > { %s7630_s15 = scalar_lea.vmem %s983_s5, 16  ;;  %s7637_s8 = scalar_lea.vmem %s983_s5, 32 }
  0x92   : > { %p7631_p13 = scmp.ne.s32.totalorder %s983_s5, %s7630_s15  ;;  %p7638_p2 = scmp.lt.s32.totalorder %s983_s5, %s983_s5 }
  0x93   : > { %p7639_p8 = scmp.lt.s32.totalorder %s7637_s8, %s7630_s15 }
  0x94   : > { %p7633_p0 = pnand %p7631_p13, %p8331_p7 }
  0x95   : > { %p7640_p1 = por %p7639_p8, %p7638_p2 }
  0x96   : > { %p7634_p5 = pneg %p7633_p0 }
  0x98   : > { %p7641_p3 = pnand %p7640_p1, %p7634_p5 }
  0x9a   : > { %7644 = shalt.err (!%p7641_p3)
}
  0x9b   : > { %7241 = dma.hbm_to_vmem [thread:$0]  (!%p8321_p6), %s8217_s24, 16, %s983_s5, [#allocation21]  }
  0x9c   : > { %s7656_s26 = scalar_lea.vmem %s1007_s28, 16  ;;  %s7663_s1 = scalar_lea.vmem %s1007_s28, 32 }
  0x9d   : > { %p7657_p4 = scmp.ne.s32.totalorder %s1007_s28, %s7656_s26  ;;  %p7664_p10 = scmp.lt.s32.totalorder %s1007_s28, %s1007_s28 }
  0x9e   : > { %p7665_p12 = scmp.lt.s32.totalorder %s7663_s1, %s7656_s26 }
  0x9f   : > { %p7659_p9 = pnand %p7657_p4, %p8331_p7 }
  0xa0   : > { %p7666_p13 = por %p7665_p12, %p7664_p10 }
  0xa1   : > { %p7660_p11 = pneg %p7659_p9 }
  0xa3   : > { %p7667_p0 = pnand %p7666_p13, %p7660_p11 }
  0xa5   : > { %7670 = shalt.err (!%p7667_p0)
}
  0xa6   : > { %s9561_s12 = sld [smem:[#allocation56_spill]]  ;;  %s8075_s8 = smov [#allocation26]  }
  0xa7   : > { %s1028_s16 = sshll.u32 %s8075_s8, 4  ;;  %s8076_s23 = smov [#allocation2]   ;;  %s1029_s16 = int_to_ptr.vmem [resolvable:$true] %s1028_s16 }
  0xa8   : > { %s847_s5 = sshll.u32 %s8076_s23, 4  ;;  %s7682_s3 = scalar_lea.vmem %s1029_s16, 16  ;;  %s848_s5 = int_to_ptr.vmem [resolvable:$true] %s847_s5 }
  0xa9   : > { %p7683_p5 = scmp.ne.s32.totalorder %s1029_s16, %s7682_s3  ;;  %s7689_s15 = scalar_lea.vmem %s1029_s16, 32 }
  0xaa   : > { %p7690_p1 = scmp.lt.s32.totalorder %s1029_s16, %s1029_s16  ;;  %p7691_p3 = scmp.lt.s32.totalorder %s7689_s15, %s7682_s3 }
  0xab   : > { %p7685_p2 = pnand %p7683_p5, %p8331_p7 }
  0xac   : > { %7247 = dma.hbm_to_vmem [thread:$0]  (!%p8321_p6), %s9561_s12, 16, %s1007_s28, [#allocation24]  }
  0xad   : > { %p7686_p8 = pneg %p7685_p2  ;;  %p7692_p4 = por %p7691_p3, %p7690_p1 }
  0xaf   : > { %p7693_p9 = pnand %p7692_p4, %p7686_p8 }
  0xb1   : > { %7696 = shalt.err (!%p7693_p9)
}
  0xb2   : > { %s9562_s14 = sld [smem:[#allocation58_spill]]  ;;  %s7708_s28 = scalar_lea.vmem %s848_s5, 256 }
  0xb3   : > { %p7709_p11 = scmp.ne.s32.totalorder %s848_s5, %s7708_s28  ;;  %p7716_p13 = scmp.lt.s32.totalorder %s848_s5, %s848_s5 }
  0xb4   : > { %p7717_p0 = scmp.lt.s32.totalorder %s7708_s28, %s7708_s28 }
  0xb5   : > { %p7711_p10 = pnand %p7709_p11, %p8331_p7 }
  0xb6   : > { %p7718_p5 = por %p7717_p0, %p7716_p13 }
  0xb7   : > { %p7712_p12 = pneg %p7711_p10 }
  0xb8   : > { %7253 = dma.hbm_to_vmem [thread:$0]  (!%p8321_p6), %s9562_s14, 16, %s1029_s16, [#allocation27]  }
  0xb9   : > { %p7719_p2 = pnand %p7718_p5, %p7712_p12 }
  0xbb   : > { %7722 = shalt.err (!%p7719_p2)
}
  0xbc   : > { %s9520_s26 = smov 128   ;;  %s9563_s13 = sld [smem:[#allocation43_spill]] }
  0xbd   : > { %s8078_s1 = smov 8   ;;  %s8079_s8 = smov [#allocation10]  }
  0xbe   : > { %s892_s16 = sshll.u32 %s8079_s8, 4  ;;  %s8080_s23 = smov [#allocation13]   ;;  %s893_s16 = int_to_ptr.vmem [resolvable:$true] %s892_s16 }
  0xbf   : > { %s923_s3 = sshll.u32 %s8080_s23, 4  ;;  %s7734_s15 = scalar_lea.vmem %s893_s16, 16  ;;  %s924_s3 = int_to_ptr.vmem [resolvable:$true] %s923_s3 }
  0xc0   : > { %p7735_p8 = scmp.ne.s32.totalorder %s893_s16, %s7734_s15  ;;  %s7741_s28 = scalar_lea.vmem %s893_s16, 32 }
  0xc1   : > { %p7742_p4 = scmp.lt.s32.totalorder %s893_s16, %s893_s16  ;;  %p7743_p9 = scmp.lt.s32.totalorder %s7741_s28, %s7734_s15 }
  0xc2   : > { %7211 = dma.hbm_to_vmem [thread:$0]  (!%p8321_p6), %s9563_s13, 256, %s848_s5, [#allocation3], %s9520_s26, %s9520_s26, %s8078_s1  }
  0xc3   : > { %p7737_p1 = pnand %p7735_p8, %p8331_p7  ;;  %p7744_p11 = por %p7743_p9, %p7742_p4 }
  0xc5   : > { %p7738_p3 = pneg %p7737_p1 }
  0xc7   : > { %p7745_p10 = pnand %p7744_p11, %p7738_p3 }
  0xc9   : > { %7748 = shalt.err (!%p7745_p10)
}
  0xca   : > { %7220 = dma.hbm_to_vmem [thread:$0]  (!%p8321_p6), %s8167_s19, 16, %s893_s16, [#allocation9]  }
  0xcb   : > { %s7760_s5 = scalar_lea.vmem %s924_s3, 16  ;;  %s7767_s8 = scalar_lea.vmem %s924_s3, 32 }
  0xcc   : > { %p7761_p12 = scmp.ne.s32.totalorder %s924_s3, %s7760_s5  ;;  %p7768_p5 = scmp.lt.s32.totalorder %s924_s3, %s924_s3 }
  0xcd   : > { %p7769_p2 = scmp.lt.s32.totalorder %s7767_s8, %s7760_s5 }
  0xce   : > { %p7763_p13 = pnand %p7761_p12, %p8331_p7 }
  0xcf   : > { %p7770_p8 = por %p7769_p2, %p7768_p5 }
  0xd0   : > { %p7764_p0 = pneg %p7763_p13 }
  0xd2   : > { %p7771_p1 = pnand %p7770_p8, %p7764_p0 }
  0xd4   : > { %7774 = shalt.err (!%p7771_p1)
}
  0xd5   : > { %7226 = dma.hbm_to_vmem [thread:$0]  (!%p8321_p6), %s8192_s20, 16, %s924_s3, [#allocation12]  }
  0xd6   : > { %s8081_s23 = smov [#allocation16]   ;;  %s8082_s16 = smov [#allocation19]  }
  0xd7   : > { %s944_s15 = sshll.u32 %s8081_s23, 4  ;;  %s968_s28 = sshll.u32 %s8082_s16, 4  ;;  %s945_s15 = int_to_ptr.vmem [resolvable:$true] %s944_s15  ;;  %s969_s28 = int_to_ptr.vmem [resolvable:$true] %s968_s28 }
  0xd8   : > { %s7786_s26 = scalar_lea.vmem %s945_s15, 512  ;;  %p7794_p11 = scmp.lt.s32.totalorder %s945_s15, %s945_s15 }
  0xd9   : > { %p7787_p3 = scmp.ne.s32.totalorder %s945_s15, %s7786_s26  ;;  %p7795_p10 = scmp.lt.s32.totalorder %s7786_s26, %s7786_s26 }
  0xdb   : > { %p7789_p4 = pnand %p7787_p3, %p8331_p7  ;;  %p7796_p12 = por %p7795_p10, %p7794_p11 }
  0xdd   : > { %p7790_p9 = pneg %p7789_p4 }
  0xdf   : > { %p7797_p13 = pnand %p7796_p12, %p7790_p9 }
  0xe1   : > { %7800 = shalt.err (!%p7797_p13)
}
  0xe2   : > { %s9564_s5 = smov 128   ;;  %s9565_s4 = sld [smem:[#allocation53_spill]] }
  0xe3   : > { %s7812_s3 = scalar_lea.vmem %s969_s28, 512  ;;  %p7820_p8 = scmp.lt.s32.totalorder %s969_s28, %s969_s28 }
  0xe4   : > { %p7813_p0 = scmp.ne.s32.totalorder %s969_s28, %s7812_s3  ;;  %p7821_p1 = scmp.lt.s32.totalorder %s7812_s3, %s7812_s3 }
  0xe6   : > { %p7815_p5 = pnand %p7813_p0, %p8331_p7  ;;  %p7822_p3 = por %p7821_p1, %p7820_p8 }
  0xe8   : > { %7232 = dma.hbm_to_vmem [thread:$0]  (!%p8321_p6), %s9565_s4, 512, %s945_s15, [#allocation15], %s9564_s5, %s9564_s5, %s8078_s1  }
  0xe9   : > { %p7816_p2 = pneg %p7815_p5 }
  0xeb   : > { %p7823_p4 = pnand %p7822_p3, %p7816_p2 }
  0xed   : > { %7826 = shalt.err (!%p7823_p4)
}
  0xee   : > { %s9566_s9 = sld [smem:[#allocation54_spill]]  ;;  %s8083_s26 = smov [#allocation22]  }
  0xef   : > { %s992_s8 = sshll.u32 %s8083_s26, 4  ;;  %s8084_s23 = smov [#allocation25]   ;;  %s993_s8 = int_to_ptr.vmem [resolvable:$true] %s992_s8 }
  0xf0   : > { %s1017_s15 = sshll.u32 %s8084_s23, 4  ;;  %s7838_s16 = scalar_lea.vmem %s993_s8, 512  ;;  %s1018_s15 = int_to_ptr.vmem [resolvable:$true] %s1017_s15 }
  0xf1   : > { %p7839_p9 = scmp.ne.s32.totalorder %s993_s8, %s7838_s16  ;;  %p7846_p12 = scmp.lt.s32.totalorder %s993_s8, %s993_s8 }
  0xf2   : > { %p7847_p13 = scmp.lt.s32.totalorder %s7838_s16, %s7838_s16 }
  0xf3   : > { %p7841_p11 = pnand %p7839_p9, %p8331_p7 }
  0xf4   : > { %7238 = dma.hbm_to_vmem [thread:$0]  (!%p8321_p6), %s9566_s9, 512, %s969_s28, [#allocation18], %s9564_s5, %s9564_s5, %s8078_s1  }
  0xf5   : > { %p7842_p10 = pneg %p7841_p11  ;;  %p7848_p0 = por %p7847_p13, %p7846_p12 }
  0xf7   : > { %p7849_p5 = pnand %p7848_p0, %p7842_p10 }
  0xf9   : > { %7852 = shalt.err (!%p7849_p5)
}
  0xfa   : > { %s9567_s6 = sld [smem:[#allocation55_spill]]  ;;  %s7864_s28 = scalar_lea.vmem %s1018_s15, 16 }
  0xfb   : > { %p7865_p2 = scmp.ne.s32.totalorder %s1018_s15, %s7864_s28  ;;  %s7871_s3 = scalar_lea.vmem %s1018_s15, 32 }
  0xfc   : > { %p7872_p3 = scmp.lt.s32.totalorder %s1018_s15, %s1018_s15  ;;  %p7873_p4 = scmp.lt.s32.totalorder %s7871_s3, %s7864_s28 }
  0xfd   : > { %p7867_p8 = pnand %p7865_p2, %p8331_p7 }
  0xfe   : > { %p7874_p9 = por %p7873_p4, %p7872_p3 }
  0xff   : > { %p7868_p1 = pneg %p7867_p8 }
 0x100   : > { %7244 = dma.hbm_to_vmem [thread:$0]  (!%p8321_p6), %s9567_s6, 512, %s993_s8, [#allocation21], %s9564_s5, %s9564_s5, %s8078_s1  }
 0x101   : > { %p7875_p11 = pnand %p7874_p9, %p7868_p1 }
 0x103   : > { %7878 = shalt.err (!%p7875_p11)
}
 0x104   : > { %s9568_s26 = sld [smem:[#allocation57_spill]]  ;;  %s8085_s23 = smov [#allocation28]  }
 0x105   : > { %s1050_s16 = sshll.u32 %s8085_s23, 4  ;;  %s1051_s16 = int_to_ptr.vmem [resolvable:$true] %s1050_s16 }
 0x106   : > { %s7890_s8 = scalar_lea.vmem %s1051_s16, 512  ;;  %p7898_p0 = scmp.lt.s32.totalorder %s1051_s16, %s1051_s16 }
 0x107   : > { %p7891_p10 = scmp.ne.s32.totalorder %s1051_s16, %s7890_s8  ;;  %p7899_p5 = scmp.lt.s32.totalorder %s7890_s8, %s7890_s8 }
 0x109   : > { %p7893_p12 = pnand %p7891_p10, %p8331_p7  ;;  %p7900_p2 = por %p7899_p5, %p7898_p0 }
 0x10a   : > { %7250 = dma.hbm_to_vmem [thread:$0]  (!%p8321_p6), %s9568_s26, 16, %s1018_s15, [#allocation24]  }
 0x10b   : > { %p7894_p13 = pneg %p7893_p12 }
 0x10d   : > { %p7901_p8 = pnand %p7900_p2, %p7894_p13 }
 0x10f   : > { %7904 = shalt.err (!%p7901_p8)
}
 0x110   : > { %s9569_s28 = sld [smem:[#allocation63_spill]]  ;;  %s6488_s25 = sadd.s32 4294967294, %s8033_s0  }
 0x111   : > { %s8445_s2 = sadd.s32 1, %s8033_s0   ;;  %s171_s3 = sadd.s32 1, %s8029_s11 }
 0x112   : > { %s168_s15 = ssub.s32 %s8033_s0, %s8445_s2  ;;  %s9570_s26 = sld [smem:[#allocation44_spill]] }
 0x113   : > { %p169_p7 = scmp.eq.s32.totalorder %s168_s15, 0  ;;  %p178_p1 = scmp.ne.s32.totalorder %s8029_s11, %s8025_s10 }
 0x114   : > { %p179_p3 = scmp.eq.s32.totalorder %s8033_s0, 0  ;;  %p184_p4 = scmp.ne.s32.totalorder %s8025_s10, %s8021_s7 }
 0x115   : > { %s8456_s23 = scalar_select %p169_p7, %s8029_s11, %s171_s3  }
 0x116   : > { %7256 = dma.hbm_to_vmem [thread:$0]  (!%p8321_p6), %s9569_s28, 512, %s1051_s16, [#allocation27], %s9564_s5, %s9564_s5, %s8078_s1  }
 0x117   : > { %p8458_p9 = por %p179_p3, %p178_p1  ;;  %p9572_p6 = scmp.eq.s32.totalorder %s8305_s18, 0 }
 0x118   : > { %p822_p10 = scmp.eq.s32.totalorder %s8305_s18, 1  ;;  %p828_p12 = scmp.eq.s32.totalorder %s6488_s25, 1 }
 0x119   : > { %p8464_p11 = por %p9572_p6, %p184_p4  ;;  %p7281_p13 = scmp.lt.s32.totalorder %s8033_s0, 2 }
 0x11a   : > { %s1091_s5 = sand.u32 1, %s8033_s0   ;;  %p8471_p0 = por %p822_p10, %p178_p1 }
 0x11b   : > { %s9573_s1 = scalar_select %p8464_p11, 1, 0 }
 0x11c   : > { %s9574_s16 = scalar_select %p8471_p0, 1, 0 }
 0x11d   : > { %p8475_p5 = por %p828_p12, %p184_p4  ;;  %s1093_s15 = sand.u32 1, %s8029_s11  }
 0x11e   : > { %s6507_s3 = sshll.u32 %s1093_s15, 1  ;;  %s6652_s4 = sshll.u32 %s8033_s0, 5 }
 0x11f   : > { %s9575_s28 = scalar_select %p8475_p5, 1, 0 }
 0x120   : > { %s8482_s6 = scalar_lea.hbm %s9570_s26, %s6652_s4  ;;  %s1095_s25 = scalar_lea.vmem [#allocation5], %s6507_s3 }
 0x121   : > { %s1102_s9 = sshll.u32 %s1095_s25, 4  ;;  %p8486_p2 = pnand %p7281_p13, %p8458_p9  ;;  %s8490_s9 = int_to_ptr.vmem [resolvable:$true] %s1102_s9 }
 0x122   : > { %s8492_s13 = scalar_lea.sflag [#allocation6], %s1091_s5  ;;  %s7905_s14 = scalar_lea.hbm %s8482_s6, 32 }
 0x123   : > { %p7906_p8 = scmp.ne.s32.totalorder %s8482_s6, %s7905_s14  ;;  %p7907_p7 = pneg %p8486_p2 }
 0x124   : > { %s7910_s4 = scalar_lea.hbm %s9570_s26, 64  ;;  %p7911_p4 = scmp.lt.s32.totalorder %s8482_s6, %s9570_s26 }
 0x125   : > { %p7908_p1 = pnand %p7907_p7, %p7906_p8  ;;  %p7912_p6 = scmp.lt.s32.totalorder %s7910_s4, %s7905_s14 }
 0x127   : > { %p7909_p3 = pneg %p7908_p1  ;;  %p7913_p10 = por %p7912_p6, %p7911_p4 }
 0x129   : > { %p7914_p12 = pnand %p7913_p10, %p7909_p3 }
 0x12b   : > { %7917 = shalt.err (!%p7914_p12)
}
 0x12c   : > { %s7918_s8 = scalar_lea.vmem %s8490_s9, 32  ;;  %s8086_s5 = smov [#allocation5]  }
 0x12d   : > { %p7919_p9 = scmp.ne.s32.totalorder %s8490_s9, %s7918_s8  ;;  %s7923_s15 = sshll.u32 %s8086_s5, 4  ;;  %s7924_s15 = int_to_ptr.vmem [resolvable:$false] %s7923_s15 }
 0x12e   : > { %s7925_s3 = scalar_lea.vmem %s7924_s15, 64  ;;  %p7926_p0 = scmp.lt.s32.totalorder %s8490_s9, %s7924_s15 }
 0x12f   : > { %p7921_p13 = pnand %p7919_p9, %p7907_p7  ;;  %p7927_p8 = scmp.lt.s32.totalorder %s7925_s3, %s7918_s8 }
 0x131   : > { %p7922_p5 = pneg %p7921_p13  ;;  %p7928_p1 = por %p7927_p8, %p7926_p0 }
 0x133   : > { %p7929_p11 = pnand %p7928_p1, %p7922_p5 }
 0x135   : > { %7932 = shalt.err (!%p7929_p11)
}
 0x136   : > { %s8087_s14 = smov 16   ;;  %s8088_s25 = smov 1  }
 0x137   : > { %7260 = dma.hbm_to_vmem [thread:$0]  (!%p8486_p2), %s8482_s6, 32, %s8490_s9, %s8492_s13, %s8087_s14, %s8087_s14, %s8088_s25  }
 0x138   : > { %p9577_p7 = scmp.ne.s32.totalorder %s9557_s22, 0 }
 0x139   : > { %p9578_p3 = scmp.eq.s32.totalorder (!%p9577_p7), %s8305_s18, 0 }
 0x13a   : > { %1122 = sbr.rel (%p9577_p7) target bundleno = 4818 (0x12d2), region = 152 }
 0x13f   : > { %7976 = dma.done.wait (%p9578_p3), [#allocation3], 256   ;;  %p9579_p4 = pmov %p9578_p3 }
 0x140   : > { %s1128_s4 = sand.u32 1, %s8305_s18   ;;  %s8517_s8 = sand.u32 1, %s8025_s10  }
 0x141   : > { %7978 = vsyncadd (%p9579_p4), [#allocation3], 4294967040  ;;  %s6512_s5 = sshll.u32 %s8517_s8, 1  ;;  %s1129_s15 = scalar_lea.sflag [#allocation6], %s1128_s4 }
 0x142   : > { %s8520_s12 = scalar_lea.vmem [#allocation5], %s6512_s5  ;;  %p9580_p11 = scmp.ne.s32.totalorder %s9573_s1, 0 }
 0x144   : > { %7980 = dma.done.wait (%p9580_p11), %s1129_s15, 32  }
 0x145   : > { %7982 = vsyncadd (%p9580_p11), %s1129_s15, 4294967264  ;;  %p9581_p0 = pmov %p9578_p3 }
 0x147   : > { %7984 = dma.done.wait (%p9581_p0), [#allocation6], 16   ;;  %p9582_p5 = pmov %p9581_p0 }
 0x148   : > { %p9583_p2 = pmov %p9581_p0 }
 0x149   : > { %7986 = vsyncadd (%p9582_p5), [#allocation6], 4294967280 }
 0x14a   : > { %7988 = dma.done.wait (%p9583_p2), [#allocation9], 32   ;;  %p9584_p6 = pmov %p9581_p0 }
 0x14b   : > { %p9585_p10 = pmov %p9581_p0 }
 0x14c   : > { %7990 = vsyncadd (%p9584_p6), [#allocation9], 4294967264 }
 0x14d   : > { %7992 = dma.done.wait (%p9585_p10), [#allocation12], 32   ;;  %p9586_p12 = pmov %p9581_p0 }
 0x14e   : > { %p9587_p9 = pmov %p9581_p0 }
 0x14f   : > { %7994 = vsyncadd (%p9586_p12), [#allocation12], 4294967264 }
 0x150   : > { %7996 = dma.done.wait (%p9587_p9), [#allocation15], 528   ;;  %p9588_p13 = pmov %p9581_p0 }
 0x151   : > { %p9589_p8 = pmov %p9581_p0 }
 0x152   : > { %7998 = vsyncadd (%p9588_p13), [#allocation15], 4294966768 }
 0x153   : > { %8000 = dma.done.wait (%p9589_p8), [#allocation18], 528   ;;  %p9590_p1 = pmov %p9581_p0 }
 0x154   : > { %p9591_p7 = pmov %p9581_p0 }
 0x155   : > { %8002 = vsyncadd (%p9590_p1), [#allocation18], 4294966768 }
 0x156   : > { %8004 = dma.done.wait (%p9591_p7), [#allocation21], 528   ;;  %p9592_p3 = pmov %p9581_p0 }
 0x157   : > { %p9593_p4 = pmov %p9581_p0 }
 0x158   : > { %8006 = vsyncadd (%p9592_p3), [#allocation21], 4294966768 }
 0x159   : > { %8008 = dma.done.wait (%p9593_p4), [#allocation24], 32   ;;  %p9594_p11 = pmov %p9581_p0 }
 0x15b   : > { %8010 = vsyncadd (%p9594_p11), [#allocation24], 4294967264 }
 0x15c   : > { %8012 = dma.done.wait (%p9581_p0), [#allocation27], 528   ;;  %p9595_p5 = pmov %p9581_p0 }
 0x15d   : > { %s9596_s9 = sld [smem:[#allocation41_spill]]  ;;  %s6529_s13 = sshll.u32 %s8305_s18, 1  ;;  %vm1381_vm0 = vcmask 261120   ;;  %v6535_v28 = vld [vmem:[#allocation7] ss:$0 sm:$0xff]  ;;  %v1375_v35 = vld [vmem:[#allocation2] sm:$0xff]  ;;  %v1645_v43 = vlaneseq }
 0x15e   : > { %8014 = vsyncadd (%p9595_p5), [#allocation27], 4294966768  ;;  %p1290_p2 = scmp.lt.s32.totalorder %s6529_s13, 3  ;;  %s9597_s1 = sld [smem:[#allocation47_spill]]  ;;  %v1376_v39 = vld [vmem:[#allocation2 + $0x8] sm:$0x7f] }
 0x15f   : > { %s9598_s3 = sld [smem:[#allocation49_spill]]  ;;  %v8089_v40 = vmov 0.0   ;;  %vm8090_vm1 = vmmov 0   ;;  %v8091_v41 = vmov 1966171168   ;;  %v8598_v45 = vshrl.u32 %v1645_v43, 7 }
 0x160   : > { %s9635_s13 = smov (!%p1290_p2, %s6529_s13), 3  ;;  %s9599_s14 = sld [smem:[#allocation46_spill]]  ;;  %6828 = vmatprep.subr.mxu0 %v8089_v40  ;;  %6832 = vmatprep.mubr.msk.f32.mxu0 %vm8090_vm1, %v8089_v40  ;;  %v1643_v42 = vunpack.c.l.s4 %v8091_v41  ;;  %v6536_v54 = vld [vmem:[#allocation8] ss:$0 sm:$0xff]  ;;  %v6539_v57 = vld [vmem:[#allocation10] ss:$0 sm:$0xff] }
 0x161   : > { %s6530_s6 = sshll.u32 %s9635_s13, 3  ;;  %s9600_s25 = sld [smem:[#allocation52_spill]]  ;;  %vm1741_vm2 = vcmask 64512   ;;  %v8623_v61 = vsub.s32 0, %v8598_v45  ;;  %vm2401_vm3 = vcmask 113664   ;;  %vm2478_vm5 = vcmask 105472  }
 0x162   : > { %s9601_s4 = sld [smem:[#allocation51_spill]]  ;;  %v1644_v44 = vunpack.c.0.s8 %v1643_v42  ;;  %s8092_s5 = smov 120   ;;  %vm2556_vm7 = vcmask 89088   ;;  %vm3944_vm13 = vcmask 130048   ;;  %vm3947_vm14 = vcmask 195584  }
 0x163   : > { %s8565_s22 = scalar_lea.vmem %s9596_s9, %s6530_s6  ;;  %s8093_s15 = smov 112  }
 0x164   : > { %v1371_v0 = vld [vmem:[%s8565_s22] sm:$0xff]  ;;  %v1372_v1 = vld [vmem:[%s8565_s22 + $0x8] sm:$0xff]  ;;  %v1313_v14 = vld [vmem:[%s9597_s1 + $0x18] sm:$0xff]  ;;  %v8602_v48 = vsub.s32 %v1644_v44, %v8598_v45  ;;  %s9526_s9 = smov 104   ;;  %p9625_p10 = scmp.ne.s32.totalorder %s9574_s16, 0 }
 0x165   : > { %v1382_v2 = vsel %vm1381_vm0, %v1371_v0, 0.0  ;;  %v1385_v3 = vsel %vm1381_vm0, %v1372_v1, 0.0  ;;  %v1312_v15 = vld [vmem:[%s9597_s1 + $0x10] sm:$0xff]  ;;  %6806 = vmatprep.subr.mxu1 %v1313_v14  ;;  %v1311_v16 = vld [vmem:[%s9597_s1 + $0x8] sm:$0xff]  ;;  %v1310_v17 = vld [vmem:[%s9597_s1] sm:$0xff] }
 0x166   : > { %1383 = vadd.xlane.f32.xlu0 %v1382_v2  ;;  %6807 = vmatpush3.msra.mxu1 %v1313_v14  ;;  %v1318_v18 = vld [vmem:[%s9598_s3 + $0x18] sm:$0xff]  ;;  %v6534_v26 = vld [vmem:[%s9599_s14] ss:$0 sm:$0xff]  ;;  %v1317_v36 = vld [vmem:[%s9598_s3 + $0x10] sm:$0xff]  ;;  %s9524_s14 = smov 96  }
 0x167   : > { %6808 = vmatprep.subr.mxu1 %v1312_v15  ;;  %v1316_v37 = vld [vmem:[%s9598_s3 + $0x8] sm:$0xff]  ;;  %v1315_v38 = vld [vmem:[%s9598_s3] sm:$0xff] }
 0x168   : > { %6809 = vmatpush3.msra.mxu1 %v1312_v15  ;;  %v6543_v46 = vld.sshfl [vmem:[%s9600_s25] sm:$0x33 pattern:$0x75316420]  ;;  %s8096_s25 = smov 14  }
 0x169   : > { %6810 = vmatprep.subr.mxu1 %v1311_v16  ;;  %v1666_v47 = vcombine.high %v6543_v46, %v6543_v46  ;;  %v8605_v49 = vld.sshfl [vmem:[%s9601_s4] sm:$0x33 pattern:$0x75316420]  ;;  %v8620_v60 = vrot.slane %v6543_v46, %v8602_v48  ;;  %s8097_s4 = smov 127  }
 0x16a   : > { %1386 = vadd.xlane.f32.xlu0 %v1385_v3  ;;  %6811 = vmatpush3.msra.mxu1 %v1311_v16  ;;  %v1641_v50 = vcombine.high %v8605_v49, %v8605_v49 }
 0x16b   : > { %6812 = vmatprep.subr.mxu1 %v1310_v17  ;;  %v8610_v51 = vrot.slane %v1666_v47, %v8602_v48 }
 0x16c   : > { %6813 = vmatpush3.msra.mxu1 %v1310_v17  ;;  %v8613_v52 = vrot.slane %v1641_v50, %v8602_v48 }
 0x16d   : > { %6817 = vmatprep.subr.mxu1 %v1318_v18 }
 0x16e   : > { %v1657_v50 = vcombine.high %v8613_v52, %v8613_v52 }
 0x1ef   : > { %v1384_v4 = vpop.xlane.xlu0 %1383 }
 0x1f0   : > { %v1389_v5 = vmul.f32 0.03125, %v1384_v4 }
 0x1f2   : > { %v1391_v6 = vsub.f32 %v1371_v0, %v1389_v5 }
 0x1f3   : > { %v1387_v7 = vpop.xlane.xlu0 %1386 }
 0x1f4   : > { %v1390_v8 = vmul.f32 0.03125, %v1387_v7  ;;  %v1393_v9 = vmul.f32 %v1391_v6, %v1391_v6 }
 0x1f6   : > { %v1392_v10 = vsub.f32 %v1372_v1, %v1390_v8  ;;  %v1395_v11 = vsel %vm1381_vm0, %v1393_v9, 0.0  ;;  %v1716_v1 = vrot.slane %v8620_v60, %v8623_v61 }
 0x1f7   : > { %1396 = vadd.xlane.f32.xlu1 %v1395_v11 }
 0x1f8   : > { %v1394_v12 = vmul.f32 %v1392_v10, %v1392_v10 }
 0x1fa   : > { %v1398_v13 = vsel %vm1381_vm0, %v1394_v12, 0.0  ;;  %v1681_v12 = vcombine.high %v8620_v60, %v8620_v60 }
 0x1fb   : > { %1399 = vadd.xlane.f32.xlu1 %v1398_v13 }
 0x1fc   : > { %v1724_v15 = vrot.slane %v1681_v12, %v8623_v61 }
 0x280   : > { %v1397_v19 = vpop.xlane.xlu1 %1396 }
 0x281   : > { %v1401_v20 = vmul.f32 0.03125, %v1397_v19 }
 0x283   : > { %v1403_v21 = vadd.f32 1e-05, %v1401_v20  ;;  %v1682_v20 = vcombine.high %v8610_v51, %v8610_v51 }
 0x284   : > { %v1400_v22 = vpop.xlane.xlu1 %1399 }
 0x285   : > { %7403 = vrsqrt.f32 %v1403_v21  ;;  %v1402_v23 = vmul.f32 0.03125, %v1400_v22 }
 0x287   : > { %v1404_v24 = vadd.f32 1e-05, %v1402_v23  ;;  %v1728_v23 = vrot.slane %v1682_v20, %v8623_v61 }
 0x289   : > { %7405 = vrsqrt.f32 %v1404_v24  ;;  %v1648_v24 = vrot.slane %v8605_v49, %v8602_v48 }
 0x28b   : > { %v1656_v43 = vcombine.high %v1648_v24, %v1648_v24 }
 0x28d   : > { %v1696_v44 = vrot.slane %v1656_v43, %v8623_v61 }
 0x292   : > { %v7404_v25 = vpop.eup %7403 }
 0x293   : > { %v8579_v27 = vmul.f32 %v7404_v25, %v1391_v6  ;;  %v1720_v6 = vrot.slane %v8610_v51, %v8623_v61  ;;  %v1700_v51 = vrot.slane %v1657_v50, %v8623_v61 }
 0x295   : > { %v1415_v29 = vmul.f32 %v6534_v26, %v8579_v27 }
 0x296   : > { %v7406_v30 = vpop.eup %7405 }
 0x297   : > { %v8582_v31 = vmul.f32 %v7406_v30, %v1392_v10  ;;  %v1423_v32 = vadd.f32 %v6535_v28, %v1415_v29  ;;  %v1688_v29 = vrot.slane %v1648_v24, %v8623_v61 }
 0x299   : > { %v1416_v33 = vmul.f32 %v6534_v26, %v8582_v31  ;;  %6814 = vmatprep.mubr.msk.f32.mxu1 %vm1381_vm0, %v1423_v32 }
 0x29b   : > { %v1424_v34 = vadd.f32 %v6535_v28, %v1416_v33 }
 0x29d   : > { %6815 = vmatmul.mubr.msk.f32.vlgmr.msra.gmra.mxu1 %vm1381_vm0, %v1424_v34 }
 0x29e   : > { %6818 = vmatpush3.msra.mxu1 %v1318_v18  ;;  %6825 = vmatprep.mubr.msk.f32.mxu1 %vm1381_vm0, %v1375_v35 }
 0x29f   : > { %6819 = vmatprep.subr.mxu1 %v1317_v36 }
 0x2a0   : > { %6820 = vmatpush3.msra.mxu1 %v1317_v36 }
 0x2a1   : > { %6821 = vmatprep.subr.mxu1 %v1316_v37 }
 0x2a2   : > { %6822 = vmatpush3.msra.mxu1 %v1316_v37 }
 0x2a3   : > { %6823 = vmatprep.subr.mxu1 %v1315_v38 }
 0x2a4   : > { %6824 = vmatpush3.msra.mxu1 %v1315_v38 }
 0x2a5   : > { %6826 = vmatmul.mubr.msk.f32.vlgmr.msra.gmra.mxu1 %vm1381_vm0, %v1376_v39  ;;  %6835 = vmatprep.subr.mxu1 %v8089_v40  ;;  %v1692_v39 = vrot.slane %v8613_v52, %v8623_v61 }
 0x2a6   : > { %6839 = vmatprep.mubr.msk.f32.mxu1 %vm8090_vm1, %v8089_v40 }
 0x35d   : > { %v6816_v53 = vpop.f32.mrf.mxu1 }
 0x35e   : > { %v8629_v0 = vadd.f32 %v6816_v53, %v6536_v54 }
 0x35f   : > { %v1503_v55 = vpop.f32.mrf.mxu1 }
 0x360   : > { %v8615_v56 = vadd.f32 %v6536_v54, %v1503_v55  ;;  %v1734_v3 = vadd.f32 %v1716_v1, %v8629_v0  ;;  %v1706_v34 = vadd.f32 %v1688_v29, %v8629_v0 }
 0x362   : > { %1601 = vrot.lane.b32.xlu1 %v8615_v56, %s8092_s5  ;;  %v1733_v2 = vadd.f32 %v1716_v1, %v8615_v56  ;;  %v1705_v33 = vadd.f32 %v1688_v29, %v8615_v56 }
 0x365   : > { %v6827_v58 = vpop.f32.mrf.mxu1 }
 0x366   : > { %v1596_v59 = vadd.f32 %v6827_v58, %v6539_v57 }
 0x367   : > { %v1590_v62 = vpop.f32.mrf.mxu1 }
 0x368   : > { %v1591_v63 = vadd.f32 %v6539_v57, %v1590_v62  ;;  %1623 = vrot.lane.b32.xlu0 %v1596_v59, %s8092_s5  ;;  %6829 = vmatpush3.xpose.msk.msra.mxu0 %vm1741_vm2, %v1596_v59 }
 0x369   : > { %6836 = vmatpush3.xpose.msk.msra.mxu1 %vm1741_vm2, %v1596_v59  ;;  %6830 = vmatprep.subr.mxu0 %v8089_v40 }
 0x36a   : > { %1621 = vrot.lane.b32.xlu1 %v1591_v63, %s8092_s5  ;;  %6837 = vmatprep.subr.mxu1 %v8089_v40 }
 0x36c   : > { %1627 = vrot.lane.b32.xlu0 %v1596_v59, %s8093_s15  ;;  %6831 = vmatpush3.xpose.msk.msra.mxu0 %vm1741_vm2, %v1591_v63 }
 0x36d   : > { %6838 = vmatpush3.xpose.msk.msra.mxu1 %vm1741_vm2, %v1591_v63  ;;  %6842 = vmatprep.subr.mxu0 %v8089_v40 }
 0x36e   : > { %1603 = vrot.lane.b32.xlu1 %v8629_v0, %s8092_s5  ;;  %6849 = vmatprep.subr.mxu1 %v8089_v40 }
 0x36f   : > { %6833 = vmatmul.mubr.msk.f32.vlgmr.msra.gmra.mxu0 %vm1741_vm2, %v1733_v2 }
 0x370   : > { %6840 = vmatmul.mubr.msk.f32.vlgmr.msra.gmra.mxu1 %vm1741_vm2, %v1734_v3  ;;  %1607 = vrot.lane.b32.xlu0 %v8615_v56, %s8093_s15 }
 0x371   : > { %6846 = vmatprep.mubr.msk.f32.mxu0 %vm8090_vm1, %v8089_v40  ;;  %6853 = vmatprep.mubr.msk.f32.mxu1 %vm8090_vm1, %v8089_v40 }
 0x372   : > { %1625 = vrot.lane.b32.xlu1 %v1591_v63, %s8093_s15 }
 0x374   : > { %1631 = vrot.lane.b32.xlu0 %v1596_v59, %s9526_s9 }
 0x376   : > { %1609 = vrot.lane.b32.xlu1 %v8629_v0, %s8093_s15 }
 0x378   : > { %1613 = vrot.lane.b32.xlu0 %v8615_v56, %s9526_s9 }
 0x37a   : > { %1629 = vrot.lane.b32.xlu1 %v1591_v63, %s9526_s9 }
 0x37c   : > { %2578 = vrot.lane.b32.xlu0 %v8615_v56, %s9524_s14 }
 0x37e   : > { %1615 = vrot.lane.b32.xlu1 %v8629_v0, %s9526_s9  ;;  %s8101_s9 = smov 124  }
 0x382   : > { %2655 = vrot.lane.b32.xlu1 %v8629_v0, %s9524_s14 }
 0x3d4   : > { %v8665_v4 = vpop.permute.xlu1 %1601 }
 0x3d5   : > { %2732 = vrot.lane.b32.xlu0 %v8665_v4, %s9524_s14  ;;  %v1735_v9 = vadd.f32 %v1720_v6, %v8665_v4  ;;  %v1707_v42 = vadd.f32 %v1692_v39, %v8665_v4 }
 0x3da   : > { %v1624_v5 = vpop.permute.xlu0 %1623 }
 0x3db   : > { %6843 = vmatpush3.xpose.msk.msra.mxu0 %vm1741_vm2, %v1624_v5  ;;  %6850 = vmatpush3.xpose.msk.msra.mxu1 %vm1741_vm2, %v1624_v5 }
 0x3dc   : > { %v1622_v7 = vpop.permute.xlu1 %1621  ;;  %6844 = vmatprep.subr.mxu0 %v8089_v40  ;;  %6851 = vmatprep.subr.mxu1 %v8089_v40 }
 0x3de   : > { %v1628_v8 = vpop.permute.xlu0 %1627 }
 0x3df   : > { %6845 = vmatpush3.xpose.msk.msra.mxu0 %vm1741_vm2, %v1622_v7  ;;  %6852 = vmatpush3.xpose.msk.msra.mxu1 %vm1741_vm2, %v1622_v7 }
 0x3e0   : > { %v8678_v10 = vpop.permute.xlu1 %1603  ;;  %6856 = vmatprep.subr.mxu0 %v8089_v40  ;;  %6863 = vmatprep.subr.mxu1 %v8089_v40 }
 0x3e1   : > { %v1736_v11 = vadd.f32 %v1720_v6, %v8678_v10  ;;  %2809 = vrot.lane.b32.xlu1 %v8678_v10, %s9524_s14  ;;  %v1708_v47 = vadd.f32 %v1692_v39, %v8678_v10  ;;  %v8827_v6 = vsub.s32 7, %v8598_v45 }
 0x3e2   : > { %v8687_v13 = vpop.permute.xlu0 %1607  ;;  %6847 = vmatmul.mubr.msk.f32.vlgmr.msra.gmra.mxu0 %vm1741_vm2, %v1735_v9 }
 0x3e3   : > { %2886 = vrot.lane.b32.xlu0 %v8687_v13, %s9524_s14  ;;  %6854 = vmatmul.mubr.msk.f32.vlgmr.msra.gmra.mxu1 %vm1741_vm2, %v1736_v11  ;;  %v1737_v18 = vadd.f32 %v1724_v15, %v8687_v13  ;;  %v1709_v49 = vadd.f32 %v1696_v44, %v8687_v13  ;;  %v2410_v12 = vand.u32 1, %v8827_v6 }
 0x3e4   : > { %6857 = vmatpush3.xpose.msk.msra.mxu0 %vm1741_vm2, %v1628_v8  ;;  %6864 = vmatpush3.xpose.msk.msra.mxu1 %vm1741_vm2, %v1628_v8  ;;  %v1626_v14 = vpop.permute.xlu1 %1625 }
 0x3e5   : > { %6858 = vmatprep.subr.mxu0 %v8089_v40  ;;  %6865 = vmatprep.subr.mxu1 %v8089_v40  ;;  %vm8847_vm4 = vcmp.eq.s32.totalorder %v2410_v12, 1 }
 0x3e6   : > { %v1632_v16 = vpop.permute.xlu0 %1631  ;;  %6860 = vmatprep.mubr.msk.f32.mxu0 %vm8090_vm1, %v8089_v40  ;;  %6867 = vmatprep.mubr.msk.f32.mxu1 %vm8090_vm1, %v8089_v40 }
 0x3e8   : > { %6859 = vmatpush3.xpose.msk.msra.mxu0 %vm1741_vm2, %v1626_v14  ;;  %6866 = vmatpush3.xpose.msk.msra.mxu1 %vm1741_vm2, %v1626_v14  ;;  %v8704_v17 = vpop.permute.xlu1 %1609 }
 0x3e9   : > { %v1738_v19 = vadd.f32 %v1724_v15, %v8704_v17  ;;  %2963 = vrot.lane.b32.xlu1 %v8704_v17, %s9524_s14  ;;  %6870 = vmatprep.subr.mxu0 %v8089_v40  ;;  %v1710_v54 = vadd.f32 %v1696_v44, %v8704_v17 }
 0x3ea   : > { %v8713_v21 = vpop.permute.xlu0 %1613  ;;  %6877 = vmatprep.subr.mxu1 %v8089_v40 }
 0x3eb   : > { %6861 = vmatmul.mubr.msk.f32.vlgmr.msra.gmra.mxu0 %vm1741_vm2, %v1737_v18  ;;  %3040 = vrot.lane.b32.xlu0 %v8713_v21, %s9524_s14  ;;  %v1739_v26 = vadd.f32 %v1728_v23, %v8713_v21  ;;  %v1711_v55 = vadd.f32 %v1700_v51, %v8713_v21 }
 0x3ec   : > { %6868 = vmatmul.mubr.msk.f32.vlgmr.msra.gmra.mxu1 %vm1741_vm2, %v1738_v19  ;;  %6871 = vmatpush3.xpose.msk.msra.mxu0 %vm1741_vm2, %v1632_v16  ;;  %v1630_v22 = vpop.permute.xlu1 %1629 }
 0x3ed   : > { %6878 = vmatpush3.xpose.msk.msra.mxu1 %vm1741_vm2, %v1632_v16  ;;  %6872 = vmatprep.subr.mxu0 %v8089_v40 }
 0x3ee   : > { %6879 = vmatprep.subr.mxu1 %v8089_v40  ;;  %6874 = vmatprep.mubr.msk.f32.mxu0 %vm8090_vm1, %v8089_v40  ;;  %v2579_v30 = vpop.permute.xlu0 %2578 }
 0x3ef   : > { %6881 = vmatprep.mubr.msk.f32.mxu1 %vm8090_vm1, %v8089_v40 }
 0x3f0   : > { %6873 = vmatpush3.xpose.msk.msra.mxu0 %vm1741_vm2, %v1630_v22  ;;  %v8732_v25 = vpop.permute.xlu1 %1615 }
 0x3f1   : > { %6880 = vmatpush3.xpose.msk.msra.mxu1 %vm1741_vm2, %v1630_v22  ;;  %v1740_v28 = vadd.f32 %v1728_v23, %v8732_v25  ;;  %3117 = vrot.lane.b32.xlu1 %v8732_v25, %s9524_s14  ;;  %v1712_v58 = vadd.f32 %v1700_v51, %v8732_v25  ;;  %s8100_s14 = smov 11  }
 0x3f2   : > { %6884 = vmatprep.subr.mxu0 %v8089_v40  ;;  %6889 = vmatprep.subr.mxu1 %v8089_v40 }
 0x3f3   : > { %6875 = vmatmul.mubr.msk.f32.vlgmr.msra.gmra.mxu0 %vm1741_vm2, %v1739_v26 }
 0x3f4   : > { %6882 = vmatmul.mubr.msk.f32.vlgmr.msra.gmra.mxu1 %vm1741_vm2, %v1740_v28  ;;  %6885 = vmatpush3.xpose.msk.msra.mxu0 %vm1741_vm2, %v2579_v30  ;;  %v2656_v32 = vpop.permute.xlu1 %2655 }
 0x3f5   : > { %6886 = vmatprep.mubr.msk.f32.mxu0 %vm8090_vm1, %v8089_v40  ;;  %6890 = vmatpush3.xpose.msk.msra.mxu1 %vm1741_vm2, %v2656_v32 }
 0x3f6   : > { %6891 = vmatprep.mubr.msk.f32.mxu1 %vm8090_vm1, %v8089_v40  ;;  %6894 = vmatprep.subr.mxu0 %v8089_v40 }
 0x3f7   : > { %6887 = vmatmul.mubr.msk.f32.vlgmr.msra.gmra.mxu0 %vm1741_vm2, %v1705_v33  ;;  %6899 = vmatprep.subr.mxu1 %v8089_v40 }
 0x3f8   : > { %6892 = vmatmul.mubr.msk.f32.vlgmr.msra.gmra.mxu1 %vm1741_vm2, %v1706_v34  ;;  %6896 = vmatprep.mubr.msk.f32.mxu0 %vm8090_vm1, %v8089_v40 }
 0x3f9   : > { %6901 = vmatprep.mubr.msk.f32.mxu1 %vm8090_vm1, %v8089_v40 }
 0x42f   : > { %v8760_v35 = vpop.f32.mrf.mxu0 }
 0x430   : > { %v8762_v36 = vpop.f32.mrf.mxu1  ;;  %2377 = vrot.lane.b32.xlu1 %v8760_v35, %s8096_s25  ;;  %2353 = vrot.lane.b32.xlu0 %v8760_v35, %s8097_s4 }
 0x431   : > { %v6834_v37 = vpop.f32.mrf.mxu0 }
 0x432   : > { %v6841_v38 = vpop.f32.mrf.mxu1 }
 0x434   : > { %2379 = vrot.lane.b32.xlu1 %v8762_v36, %s8096_s25  ;;  %2355 = vrot.lane.b32.xlu0 %v8762_v36, %s8097_s4 }
 0x447   : > { %v2733_v41 = vpop.permute.xlu0 %2732 }
 0x448   : > { %6895 = vmatpush3.xpose.msk.msra.mxu0 %vm1741_vm2, %v2733_v41 }
 0x449   : > { %6904 = vmatprep.subr.mxu0 %v8089_v40 }
 0x44b   : > { %6897 = vmatmul.mubr.msk.f32.vlgmr.msra.gmra.mxu0 %vm1741_vm2, %v1707_v42 }
 0x44c   : > { %6906 = vmatprep.mubr.msk.f32.mxu0 %vm8090_vm1, %v8089_v40 }
 0x453   : > { %v2810_v46 = vpop.permute.xlu1 %2809 }
 0x454   : > { %6900 = vmatpush3.xpose.msk.msra.mxu1 %vm1741_vm2, %v2810_v46 }
 0x455   : > { %v2887_v48 = vpop.permute.xlu0 %2886  ;;  %6909 = vmatprep.subr.mxu1 %v8089_v40 }
 0x456   : > { %6905 = vmatpush3.xpose.msk.msra.mxu0 %vm1741_vm2, %v2887_v48 }
 0x457   : > { %6902 = vmatmul.mubr.msk.f32.vlgmr.msra.gmra.mxu1 %vm1741_vm2, %v1708_v47  ;;  %6914 = vmatprep.subr.mxu0 %v8089_v40 }
 0x458   : > { %6911 = vmatprep.mubr.msk.f32.mxu1 %vm8090_vm1, %v8089_v40 }
 0x459   : > { %6907 = vmatmul.mubr.msk.f32.vlgmr.msra.gmra.mxu0 %vm1741_vm2, %v1709_v49 }
 0x45a   : > { %6916 = vmatprep.mubr.msk.f32.mxu0 %vm8090_vm1, %v8089_v40 }
 0x45b   : > { %v2964_v53 = vpop.permute.xlu1 %2963 }
 0x45c   : > { %6910 = vmatpush3.xpose.msk.msra.mxu1 %vm1741_vm2, %v2964_v53 }
 0x45d   : > { %v3041_v52 = vpop.permute.xlu0 %3040  ;;  %6919 = vmatprep.subr.mxu1 %v8089_v40 }
 0x45e   : > { %6915 = vmatpush3.xpose.msk.msra.mxu0 %vm1741_vm2, %v3041_v52 }
 0x45f   : > { %6912 = vmatmul.mubr.msk.f32.vlgmr.msra.gmra.mxu1 %vm1741_vm2, %v1710_v54  ;;  %6924 = vmatprep.subr.mxu0 %v8089_v40 }
 0x460   : > { %6921 = vmatprep.mubr.msk.f32.mxu1 %vm8090_vm1, %v8089_v40 }
 0x461   : > { %6917 = vmatmul.mubr.msk.f32.vlgmr.msra.gmra.mxu0 %vm1741_vm2, %v1711_v55 }
 0x462   : > { %6926 = vmatprep.mubr.msk.f32.mxu0 %vm8090_vm1, %v8089_v40 }
 0x463   : > { %v3118_v57 = vpop.permute.xlu1 %3117 }
 0x464   : > { %6920 = vmatpush3.xpose.msk.msra.mxu1 %vm1741_vm2, %v3118_v57 }
 0x465   : > { %6929 = vmatprep.subr.mxu1 %v8089_v40 }
 0x467   : > { %6922 = vmatmul.mubr.msk.f32.vlgmr.msra.gmra.mxu1 %vm1741_vm2, %v1712_v58 }
 0x468   : > { %6931 = vmatprep.mubr.msk.f32.mxu1 %vm8090_vm1, %v8089_v40 }
 0x4a2   : > { %v1965_v59 = vpop.f32.mrf.mxu0  ;;  %v2378_v7 = vpop.permute.xlu1 %2377 }
 0x4a3   : > { %v2038_v60 = vpop.f32.mrf.mxu1  ;;  %2381 = vrot.lane.b32.xlu1 %v1965_v59, %s8096_s25  ;;  %2357 = vrot.lane.b32.xlu0 %v1965_v59, %s8097_s4  ;;  %v2354_v8 = vpop.permute.xlu0 %2353 }
 0x4a4   : > { %v6848_v62 = vpop.f32.mrf.mxu0  ;;  %v2402_v45 = vsel %vm2401_vm3, %v2354_v8, %v2378_v7 }
 0x4a5   : > { %v6855_v63 = vpop.f32.mrf.mxu1  ;;  %v8854_v26 = vsel %vm8847_vm4, %v2402_v45, %v8760_v35 }
 0x4a6   : > { %v2380_v18 = vpop.permute.xlu1 %2379 }
 0x4a7   : > { %2383 = vrot.lane.b32.xlu1 %v2038_v60, %s8096_s25  ;;  %2359 = vrot.lane.b32.xlu0 %v2038_v60, %s8097_s4  ;;  %v2356_v22 = vpop.permute.xlu0 %2355 }
 0x4a8   : > { %v2403_v28 = vsel %vm2401_vm3, %v2356_v22, %v2380_v18 }
 0x4a9   : > { %v8864_v29 = vsel %vm8847_vm4, %v2403_v28, %v8762_v36 }
 0x4ab   : > { %v2115_v1 = vpop.f32.mrf.mxu0 }
 0x4ac   : > { %v8818_v2 = vpop.f32.mrf.mxu1  ;;  %2385 = vrot.lane.b32.xlu1 %v2115_v1, %s8096_s25  ;;  %2361 = vrot.lane.b32.xlu0 %v2115_v1, %s8097_s4 }
 0x4ad   : > { %v6862_v3 = vpop.f32.mrf.mxu0 }
 0x4ae   : > { %v6869_v5 = vpop.f32.mrf.mxu1 }
 0x4b0   : > { %2387 = vrot.lane.b32.xlu1 %v8818_v2, %s8096_s25  ;;  %2363 = vrot.lane.b32.xlu0 %v8818_v2, %s8097_s4 }
 0x4b3   : > { %v8829_v9 = vpop.f32.mrf.mxu0 }
 0x4b4   : > { %v8831_v11 = vpop.f32.mrf.mxu1  ;;  %2389 = vrot.lane.b32.xlu1 %v8829_v9, %s8096_s25  ;;  %2365 = vrot.lane.b32.xlu0 %v8829_v9, %s8097_s4 }
 0x4b5   : > { %v6876_v14 = vpop.f32.mrf.mxu0 }
 0x4b6   : > { %v6883_v15 = vpop.f32.mrf.mxu1 }
 0x4b7   : > { %v8838_v16 = vpop.f32.mrf.mxu0 }
 0x4b8   : > { %2391 = vrot.lane.b32.xlu1 %v8831_v11, %s8096_s25  ;;  %2367 = vrot.lane.b32.xlu0 %v8831_v11, %s8097_s4  ;;  %v8845_v19 = vpop.f32.mrf.mxu1  ;;  %s8098_s25 = smov 13   ;;  %s8099_s4 = smov 126  }
 0x4b9   : > { %v6888_v23 = vpop.f32.mrf.mxu0 }
 0x4ba   : > { %v6893_v24 = vpop.f32.mrf.mxu1 }
 0x4bc   : > { %2454 = vrot.lane.b32.xlu1 %v8854_v26, %s8098_s25  ;;  %2430 = vrot.lane.b32.xlu0 %v8854_v26, %s8099_s4 }
 0x4c0   : > { %2456 = vrot.lane.b32.xlu1 %v8864_v29, %s8098_s25  ;;  %2432 = vrot.lane.b32.xlu0 %v8864_v29, %s8099_s4 }
 0x50b   : > { %v8870_v30 = vpop.f32.mrf.mxu0 }
 0x50d   : > { %v6898_v32 = vpop.f32.mrf.mxu0 }
 0x515   : > { %v2382_v33 = vpop.permute.xlu1 %2381  ;;  %v2358_v34 = vpop.permute.xlu0 %2357 }
 0x516   : > { %v2404_v35 = vsel %vm2401_vm3, %v2358_v34, %v2382_v33 }
 0x517   : > { %v8873_v37 = vpop.f32.mrf.mxu1  ;;  %v8877_v38 = vsel %vm8847_vm4, %v2404_v35, %v1965_v59 }
 0x518   : > { %2458 = vrot.lane.b32.xlu1 %v8877_v38, %s8098_s25  ;;  %2434 = vrot.lane.b32.xlu0 %v8877_v38, %s8099_s4 }
 0x519   : > { %v6903_v36 = vpop.f32.mrf.mxu1  ;;  %v8883_v39 = vpop.f32.mrf.mxu0 }
 0x51a   : > { %v2384_v41 = vpop.permute.xlu1 %2383  ;;  %v2360_v42 = vpop.permute.xlu0 %2359 }
 0x51b   : > { %v2405_v43 = vsel %vm2401_vm3, %v2360_v42, %v2384_v41  ;;  %v6908_v44 = vpop.f32.mrf.mxu0 }
 0x51c   : > { %v2417_v46 = vsel %vm8847_vm4, %v2405_v43, %v2038_v60  ;;  %v2487_v60 = vshra.s32 %v8827_v6, 1 }
 0x51d   : > { %2460 = vrot.lane.b32.xlu1 %v2417_v46, %s8098_s25  ;;  %2436 = vrot.lane.b32.xlu0 %v2417_v46, %s8099_s4 }
 0x51e   : > { %v2386_v47 = vpop.permute.xlu1 %2385  ;;  %v2362_v48 = vpop.permute.xlu0 %2361  ;;  %v2488_v7 = vand.u32 1, %v2487_v60  ;;  %v2565_v60 = vshra.s32 %v8827_v6, 2 }
 0x51f   : > { %v2406_v49 = vsel %vm2401_vm3, %v2362_v48, %v2386_v47  ;;  %v8891_v50 = vpop.f32.mrf.mxu1 }
 0x520   : > { %v2418_v51 = vsel %vm8847_vm4, %v2406_v49, %v2115_v1  ;;  %vm2489_vm6 = vcmp.eq.s32.totalorder %v2488_v7, 1 }
 0x521   : > { %2462 = vrot.lane.b32.xlu1 %v2418_v51, %s8098_s25  ;;  %2438 = vrot.lane.b32.xlu0 %v2418_v51, %s8099_s4  ;;  %v6913_v53 = vpop.f32.mrf.mxu1  ;;  %v8897_v54 = vpop.f32.mrf.mxu0 }
 0x522   : > { %v2388_v52 = vpop.permute.xlu1 %2387  ;;  %v2364_v55 = vpop.permute.xlu0 %2363 }
 0x523   : > { %v2407_v57 = vsel %vm2401_vm3, %v2364_v55, %v2388_v52  ;;  %v6918_v58 = vpop.f32.mrf.mxu0 }
 0x524   : > { %v2419_v59 = vsel %vm8847_vm4, %v2407_v57, %v8818_v2 }
 0x525   : > { %2464 = vrot.lane.b32.xlu1 %v2419_v59, %s8098_s25  ;;  %2440 = vrot.lane.b32.xlu0 %v2419_v59, %s8099_s4 }
 0x526   : > { %v2390_v62 = vpop.permute.xlu1 %2389  ;;  %v2366_v63 = vpop.permute.xlu0 %2365 }
 0x527   : > { %v2408_v1 = vsel %vm2401_vm3, %v2366_v63, %v2390_v62  ;;  %v8907_v3 = vpop.f32.mrf.mxu1  ;;  %v8980_v63 = vand.u32 1, %v2565_v60 }
 0x528   : > { %v2420_v5 = vsel %vm8847_vm4, %v2408_v1, %v8829_v9 }
 0x529   : > { %2466 = vrot.lane.b32.xlu1 %v2420_v5, %s8098_s25  ;;  %2442 = vrot.lane.b32.xlu0 %v2420_v5, %s8099_s4  ;;  %v6923_v2 = vpop.f32.mrf.mxu1  ;;  %vm2567_vm8 = vcmp.eq.s32.totalorder %v8980_v63, 1 }
 0x52a   : > { %v2392_v8 = vpop.permute.xlu1 %2391  ;;  %v2368_v12 = vpop.permute.xlu0 %2367 }
 0x52b   : > { %v2409_v14 = vsel %vm2401_vm3, %v2368_v12, %v2392_v8 }
 0x52c   : > { %v2421_v15 = vsel %vm8847_vm4, %v2409_v14, %v8831_v11  ;;  %v1378_v14 = vld [vmem:[%s8520_s12 + $0x1] sm:$0x1] }
 0x52d   : > { %2468 = vrot.lane.b32.xlu1 %v2421_v15, %s8098_s25  ;;  %2444 = vrot.lane.b32.xlu0 %v2421_v15, %s8099_s4  ;;  %vm1684_vm10 = vcmp.gt.f32.partialorder %v1378_v14, 0.5  ;;  %s8105_s25 = smov 16   ;;  %s9528_s4 = smov 24  }
 0x52e   : > { %v2455_v9 = vpop.permute.xlu1 %2454  ;;  %v2431_v45 = vpop.permute.xlu0 %2430 }
 0x52f   : > { %v2479_v18 = vsel %vm2478_vm5, %v2431_v45, %v2455_v9 }
 0x530   : > { %v2492_v22 = vsel %vm2489_vm6, %v2479_v18, %v8854_v26 }
 0x531   : > { %2532 = vrot.lane.b32.xlu1 %v2492_v22, %s8100_s14  ;;  %2508 = vrot.lane.b32.xlu0 %v2492_v22, %s8101_s9 }
 0x532   : > { %v2457_v11 = vpop.permute.xlu1 %2456  ;;  %v2433_v20 = vpop.permute.xlu0 %2432 }
 0x533   : > { %v2480_v23 = vsel %vm2478_vm5, %v2433_v20, %v2457_v11 }
 0x534   : > { %v2493_v24 = vsel %vm2489_vm6, %v2480_v23, %v8864_v29 }
 0x535   : > { %2534 = vrot.lane.b32.xlu1 %v2493_v24, %s8100_s14  ;;  %2510 = vrot.lane.b32.xlu0 %v2493_v24, %s8101_s9 }
 0x58a   : > { %v2459_v28 = vpop.permute.xlu1 %2458  ;;  %v2435_v32 = vpop.permute.xlu0 %2434 }
 0x58b   : > { %v2481_v26 = vsel %vm2478_vm5, %v2435_v32, %v2459_v28 }
 0x58c   : > { %v8933_v33 = vsel %vm2489_vm6, %v2481_v26, %v8877_v38 }
 0x58d   : > { %2536 = vrot.lane.b32.xlu1 %v8933_v33, %s8100_s14  ;;  %2512 = vrot.lane.b32.xlu0 %v8933_v33, %s8101_s9 }
 0x58f   : > { %v2461_v34 = vpop.permute.xlu1 %2460  ;;  %v2437_v29 = vpop.permute.xlu0 %2436 }
 0x590   : > { %v2482_v35 = vsel %vm2478_vm5, %v2437_v29, %v2461_v34 }
 0x591   : > { %v8941_v36 = vsel %vm2489_vm6, %v2482_v35, %v2417_v46 }
 0x592   : > { %2538 = vrot.lane.b32.xlu1 %v8941_v36, %s8100_s14  ;;  %2514 = vrot.lane.b32.xlu0 %v8941_v36, %s8101_s9 }
 0x593   : > { %v2463_v38 = vpop.permute.xlu1 %2462  ;;  %v2439_v41 = vpop.permute.xlu0 %2438 }
 0x594   : > { %v2483_v42 = vsel %vm2478_vm5, %v2439_v41, %v2463_v38 }
 0x595   : > { %v8949_v43 = vsel %vm2489_vm6, %v2483_v42, %v2418_v51 }
 0x596   : > { %2540 = vrot.lane.b32.xlu1 %v8949_v43, %s8100_s14  ;;  %2516 = vrot.lane.b32.xlu0 %v8949_v43, %s8101_s9 }
 0x597   : > { %v2465_v44 = vpop.permute.xlu1 %2464  ;;  %v2441_v46 = vpop.permute.xlu0 %2440 }
 0x598   : > { %v2484_v47 = vsel %vm2478_vm5, %v2441_v46, %v2465_v44 }
 0x599   : > { %v8957_v48 = vsel %vm2489_vm6, %v2484_v47, %v2419_v59 }
 0x59a   : > { %2542 = vrot.lane.b32.xlu1 %v8957_v48, %s8100_s14  ;;  %2518 = vrot.lane.b32.xlu0 %v8957_v48, %s8101_s9 }
 0x59b   : > { %v2467_v49 = vpop.permute.xlu1 %2466  ;;  %v2443_v51 = vpop.permute.xlu0 %2442 }
 0x59c   : > { %v2485_v53 = vsel %vm2478_vm5, %v2443_v51, %v2467_v49 }
 0x59d   : > { %v8965_v52 = vsel %vm2489_vm6, %v2485_v53, %v2420_v5  ;;  %v1377_v5 = vld [vmem:[%s8520_s12] sm:$0x1]  ;;  %s8103_s12 = smov 64  }
 0x59e   : > { %2544 = vrot.lane.b32.xlu1 %v8965_v52, %s8100_s14  ;;  %2520 = vrot.lane.b32.xlu0 %v8965_v52, %s8101_s9  ;;  %vm1683_vm9 = vcmp.gt.f32.partialorder %v1377_v5, 0.5 }
 0x59f   : > { %v2469_v55 = vpop.permute.xlu1 %2468  ;;  %v2445_v57 = vpop.permute.xlu0 %2444 }
 0x5a0   : > { %v2486_v58 = vsel %vm2478_vm5, %v2445_v57, %v2469_v55 }
 0x5a1   : > { %v8973_v59 = vsel %vm2489_vm6, %v2486_v58, %v2421_v15  ;;  %v8102_v15 = vmov 0  }
 0x5a2   : > { %2546 = vrot.lane.b32.xlu1 %v8973_v59, %s8100_s14  ;;  %2522 = vrot.lane.b32.xlu0 %v8973_v59, %s8101_s9  ;;  %v3202_v6 = vsel %vm1683_vm9, 1, %v8102_v15  ;;  %v3203_v20 = vsel %vm1684_vm10, 1, %v8102_v15  ;;  %s9608_s9 = sld [smem:[#allocation50_spill]]  ;;  %s9530_s14 = smov 8  }
 0x5a3   : > { %v2533_v62 = vpop.permute.xlu1 %2532  ;;  %v2509_v1 = vpop.permute.xlu0 %2508  ;;  %v3207_v18 = vrot.slane %v3202_v6, %v8623_v61  ;;  %v3211_v32 = vrot.slane %v3203_v20, %v8623_v61 }
 0x5a4   : > { %v2557_v2 = vsel %vm2556_vm7, %v2509_v1, %v2533_v62 }
 0x5a5   : > { %v2570_v12 = vsel %vm2567_vm8, %v2557_v2, %v2492_v22  ;;  %vm8995_vm11 = vcmp.eq.s32.totalorder %v3207_v18, 1  ;;  %vm9005_vm12 = vcmp.eq.s32.totalorder %v3211_v32, 1 }
 0x5a6   : > { %v2652_v45 = vadd.f32 %v8838_v16, %v2570_v12 }
 0x5a7   : > { %v2535_v7 = vpop.permute.xlu1 %2534  ;;  %v2511_v8 = vpop.permute.xlu0 %2510 }
 0x5a8   : > { %v2558_v9 = vsel %vm2556_vm7, %v2511_v8, %v2535_v7  ;;  %v3194_v23 = vmul.f32 0.35355338, %v2652_v45 }
 0x5a9   : > { %v2571_v11 = vsel %vm2567_vm8, %v2558_v9, %v2493_v24 }
 0x5aa   : > { %v2729_v22 = vadd.f32 %v8845_v19, %v2571_v11  ;;  %v9003_v16 = vsel %vm8995_vm11, -1e+30, %v3194_v23 }
 0x5ab   : > { %v3222_v24 = vsel %vm1741_vm2, %v9003_v16, -inf }
 0x5ac   : > { %v3195_v26 = vmul.f32 0.35355338, %v2729_v22 }
 0x5ae   : > { %v9013_v29 = vsel %vm9005_vm12, -1e+30, %v3195_v26 }
 0x5af   : > { %v3225_v19 = vsel %vm1741_vm2, %v9013_v29, -inf }
 0x5c1   : > { %3223 = vmax.xlane.f32.xlu0 %v3222_v24 }
 0x5c6   : > { %3226 = vmax.xlane.f32.xlu1 %v3225_v19 }
 0x5ff   : > { %v2537_v35 = vpop.permute.xlu1 %2536  ;;  %v2513_v38 = vpop.permute.xlu0 %2512 }
 0x600   : > { %v2559_v41 = vsel %vm2556_vm7, %v2513_v38, %v2537_v35 }
 0x601   : > { %v2572_v42 = vsel %vm2567_vm8, %v2559_v41, %v8933_v33 }
 0x602   : > { %v2806_v44 = vadd.f32 %v8870_v30, %v2572_v42 }
 0x604   : > { %v2539_v46 = vpop.permute.xlu1 %2538  ;;  %v2515_v47 = vpop.permute.xlu0 %2514  ;;  %v3196_v51 = vmul.f32 0.35355338, %v2806_v44 }
 0x605   : > { %v2560_v49 = vsel %vm2556_vm7, %v2515_v47, %v2539_v46 }
 0x606   : > { %v2573_v53 = vsel %vm2567_vm8, %v2560_v49, %v8941_v36  ;;  %v9028_v55 = vsel %vm8995_vm11, -1e+30, %v3196_v51 }
 0x607   : > { %v2883_v57 = vadd.f32 %v8873_v37, %v2573_v53  ;;  %v3228_v30 = vsel %vm1741_vm2, %v9028_v55, -inf }
 0x608   : > { %v2541_v58 = vpop.permute.xlu1 %2540  ;;  %v2517_v60 = vpop.permute.xlu0 %2516  ;;  %3229 = vmax.xlane.f32.xlu0 %v3228_v30 }
 0x609   : > { %v2561_v33 = vsel %vm2556_vm7, %v2517_v60, %v2541_v58  ;;  %v3197_v62 = vmul.f32 0.35355338, %v2883_v57 }
 0x60a   : > { %v2574_v1 = vsel %vm2567_vm8, %v2561_v33, %v8949_v43 }
 0x60b   : > { %v3217_v36 = vsel %vm9005_vm12, -1e+30, %v3197_v62  ;;  %v2960_v5 = vadd.f32 %v8883_v39, %v2574_v1 }
 0x60c   : > { %v2543_v2 = vpop.permute.xlu1 %2542  ;;  %v2519_v37 = vpop.permute.xlu0 %2518  ;;  %v3231_v7 = vsel %vm1741_vm2, %v3217_v36, -inf }
 0x60d   : > { %v2562_v8 = vsel %vm2556_vm7, %v2519_v37, %v2543_v2  ;;  %3232 = vmax.xlane.f32.xlu0 %v3231_v7  ;;  %v3198_v12 = vmul.f32 0.35355338, %v2960_v5 }
 0x60e   : > { %v2575_v14 = vsel %vm2567_vm8, %v2562_v8, %v8957_v48 }
 0x60f   : > { %v3218_v43 = vsel %vm8995_vm11, -1e+30, %v3198_v12  ;;  %v3037_v6 = vadd.f32 %v8891_v50, %v2575_v14 }
 0x610   : > { %v2545_v9 = vpop.permute.xlu1 %2544  ;;  %v2521_v45 = vpop.permute.xlu0 %2520  ;;  %v3234_v39 = vsel %vm1741_vm2, %v3218_v43, -inf }
 0x611   : > { %v2563_v18 = vsel %vm2556_vm7, %v2521_v45, %v2545_v9  ;;  %3235 = vmax.xlane.f32.xlu0 %v3234_v39  ;;  %v3199_v11 = vmul.f32 0.35355338, %v3037_v6 }
 0x612   : > { %v2576_v20 = vsel %vm2567_vm8, %v2563_v18, %v8965_v52 }
 0x613   : > { %v3219_v48 = vsel %vm9005_vm12, -1e+30, %v3199_v11  ;;  %v3114_v23 = vadd.f32 %v8897_v54, %v2576_v20 }
 0x614   : > { %v2547_v22 = vpop.permute.xlu1 %2546  ;;  %v2523_v32 = vpop.permute.xlu0 %2522  ;;  %v3237_v50 = vsel %vm1741_vm2, %v3219_v48, -inf }
 0x615   : > { %v2564_v26 = vsel %vm2556_vm7, %v2523_v32, %v2547_v22  ;;  %3238 = vmax.xlane.f32.xlu1 %v3237_v50  ;;  %v3200_v24 = vmul.f32 0.35355338, %v3114_v23 }
 0x616   : > { %v2577_v19 = vsel %vm2567_vm8, %v2564_v26, %v8973_v59 }
 0x617   : > { %v3220_v52 = vsel %vm8995_vm11, -1e+30, %v3200_v24  ;;  %v3191_v35 = vadd.f32 %v8907_v3, %v2577_v19 }
 0x618   : > { %v3240_v38 = vsel %vm1741_vm2, %v3220_v52, -inf }
 0x619   : > { %3241 = vmax.xlane.f32.xlu0 %v3240_v38  ;;  %v3201_v54 = vmul.f32 0.35355338, %v3191_v35 }
 0x61b   : > { %v3221_v41 = vsel %vm9005_vm12, -1e+30, %v3201_v54 }
 0x61c   : > { %v3243_v42 = vsel %vm1741_vm2, %v3221_v41, -inf }
 0x61d   : > { %3244 = vmax.xlane.f32.xlu1 %v3243_v42 }
 0x62e   : > { %3386 = vrot.lane.b32.xlu1 %v8629_v0, %s8103_s12 }
 0x62f   : > { %3310 = vrot.lane.b32.xlu0 %v8615_v56, %s8103_s12 }
 0x632   : > { %3462 = vrot.lane.b32.xlu1 %v8665_v4, %s8103_s12 }
 0x633   : > { %3614 = vrot.lane.b32.xlu0 %v8687_v13, %s8103_s12 }
 0x636   : > { %3538 = vrot.lane.b32.xlu1 %v8678_v10, %s8103_s12 }
 0x63a   : > { %3690 = vrot.lane.b32.xlu1 %v8704_v17, %s8103_s12 }
 0x64a   : > { %v3224_v3 = vpop.xlane.xlu0 %3223 }
 0x64b   : > { %v3246_v59 = vsub.f32 %v9003_v16, %v3224_v3 }
 0x64d   : > { %v3254_v63 = vmul.f32 1.442695, %v3246_v59 }
 0x64f   : > { %7407 = vpow2.f32 %v3254_v63  ;;  %v3227_v0 = vpop.xlane.xlu1 %3226 }
 0x650   : > { %v3247_v56 = vsub.f32 %v9013_v29, %v3227_v0 }
 0x652   : > { %v3256_v28 = vmul.f32 1.442695, %v3247_v56 }
 0x654   : > { %7409 = vpow2.f32 %v3256_v28 }
 0x65c   : > { %v9082_v4 = vpop.eup %7407 }
 0x65d   : > { %v3270_v13 = vsel %vm1741_vm2, %v9082_v4, 0.0 }
 0x65e   : > { %3271 = vadd.xlane.f32.xlu0 %v3270_v13 }
 0x661   : > { %v9086_v10 = vpop.eup %7409 }
 0x662   : > { %v3273_v17 = vsel %vm1741_vm2, %v9086_v10, 0.0 }
 0x663   : > { %3274 = vadd.xlane.f32.xlu1 %v3273_v17  ;;  %v6595_v17 = vld [vmem:[#allocation13] ss:$0 sm:$0xff] }
 0x691   : > { %v3230_v16 = vpop.xlane.xlu0 %3229 }
 0x692   : > { %v3248_v34 = vsub.f32 %v9028_v55, %v3230_v16 }
 0x694   : > { %v3258_v44 = vmul.f32 1.442695, %v3248_v34 }
 0x696   : > { %v3233_v46 = vpop.xlane.xlu0 %3232  ;;  %7411 = vpow2.f32 %v3258_v44 }
 0x697   : > { %v3249_v29 = vsub.f32 %v3217_v36, %v3233_v46  ;;  %v4045_v46 = vmul.f32 %v6595_v17, %v8579_v27  ;;  %v1329_v27 = vld [vmem:[#allocation16] sm:$0xff] }
 0x699   : > { %v3260_v47 = vmul.f32 1.442695, %v3249_v29  ;;  %v6596_v29 = vld [vmem:[#allocation14] ss:$0 sm:$0xff] }
 0x69a   : > { %v3236_v49 = vpop.xlane.xlu0 %3235 }
 0x69b   : > { %7413 = vpow2.f32 %v3260_v47  ;;  %v3250_v51 = vsub.f32 %v3218_v43, %v3236_v49 }
 0x69d   : > { %v3262_v53 = vmul.f32 1.442695, %v3250_v51  ;;  %v1331_v51 = vld [vmem:[#allocation16 + $0x10] sm:$0xff] }
 0x69e   : > { %v3239_v57 = vpop.xlane.xlu1 %3238 }
 0x69f   : > { %7415 = vpow2.f32 %v3262_v53  ;;  %v3251_v58 = vsub.f32 %v3219_v48, %v3239_v57  ;;  %v4053_v53 = vadd.f32 %v6596_v29, %v4045_v46  ;;  %v1330_v57 = vld [vmem:[#allocation16 + $0x8] sm:$0xff] }
 0x6a1   : > { %v3264_v60 = vmul.f32 1.442695, %v3251_v58  ;;  %v4046_v58 = vmul.f32 %v6595_v17, %v8582_v31  ;;  %v6600_v17 = vld [vmem:[#allocation20] ss:$0 sm:$0xff] }
 0x6a2   : > { %v3242_v30 = vpop.xlane.xlu0 %3241 }
 0x6a3   : > { %7417 = vpow2.f32 %v3264_v60  ;;  %v3252_v33 = vsub.f32 %v3220_v52, %v3242_v30  ;;  %v7412_v62 = vpop.eup %7411  ;;  %v4054_v60 = vadd.f32 %v6596_v29, %v4046_v58 }
 0x6a4   : > { %v3276_v55 = vsel %vm1741_vm2, %v7412_v62, 0.0 }
 0x6a5   : > { %v3266_v1 = vmul.f32 1.442695, %v3252_v33  ;;  %3277 = vadd.xlane.f32.xlu0 %v3276_v55  ;;  %v1323_v55 = vld [vmem:[%s9608_s9 + $0x18] sm:$0xff] }
 0x6a6   : > { %v3245_v5 = vpop.xlane.xlu1 %3244  ;;  %v3311_v2 = vpop.permute.xlu0 %3310 }
 0x6a7   : > { %7419 = vpow2.f32 %v3266_v1  ;;  %v3253_v36 = vsub.f32 %v3221_v41, %v3245_v5  ;;  %6925 = vmatpush3.msra.mxu0 %v3311_v2  ;;  %v1322_v5 = vld [vmem:[%s9608_s9 + $0x10] sm:$0xff] }
 0x6a8   : > { %v7414_v37 = vpop.eup %7413  ;;  %6934 = vmatprep.subr.mxu0 %v8089_v40 }
 0x6a9   : > { %v3268_v7 = vmul.f32 1.442695, %v3253_v36  ;;  %v3279_v8 = vsel %vm1741_vm2, %v7414_v37, 0.0 }
 0x6aa   : > { %v3387_v12 = vpop.permute.xlu1 %3386  ;;  %3280 = vadd.xlane.f32.xlu1 %v3279_v8  ;;  %v3615_v23 = vpop.permute.xlu0 %3614 }
 0x6ab   : > { %7421 = vpow2.f32 %v3268_v7  ;;  %6930 = vmatpush3.msra.mxu1 %v3387_v12  ;;  %v1320_v7 = vld [vmem:[%s9608_s9] sm:$0xff] }
 0x6ac   : > { %v7416_v14 = vpop.eup %7415  ;;  %6939 = vmatprep.subr.mxu1 %v8089_v40 }
 0x6ad   : > { %v3282_v43 = vsel %vm1741_vm2, %v7416_v14, 0.0 }
 0x6ae   : > { %3283 = vadd.xlane.f32.xlu0 %v3282_v43  ;;  %v3463_v20 = vpop.permute.xlu1 %3462 }
 0x6b0   : > { %v7418_v6 = vpop.eup %7417 }
 0x6b1   : > { %v3285_v9 = vsel %vm1741_vm2, %v7418_v6, 0.0 }
 0x6b2   : > { %3286 = vadd.xlane.f32.xlu1 %v3285_v9  ;;  %v3539_v48 = vpop.permute.xlu1 %3538 }
 0x6b4   : > { %v9097_v45 = vpop.eup %7419 }
 0x6b5   : > { %v3288_v39 = vsel %vm1741_vm2, %v9097_v45, 0.0 }
 0x6b6   : > { %3289 = vadd.xlane.f32.xlu0 %v3288_v39  ;;  %v3691_v32 = vpop.permute.xlu1 %3690 }
 0x6b8   : > { %v9101_v18 = vpop.eup %7421 }
 0x6b9   : > { %v3291_v11 = vsel %vm1741_vm2, %v9101_v18, 0.0 }
 0x6ba   : > { %3292 = vadd.xlane.f32.xlu1 %v3291_v11 }
 0x6cb   : > { %3842 = vrot.lane.b32.xlu1 %v8732_v25, %s8103_s12 }
 0x6cc   : > { %3766 = vrot.lane.b32.xlu0 %v8713_v21, %s8103_s12  ;;  %s9609_s12 = sld [smem:[#allocation42_spill]] }
 0x6e7   : > { %v3272_v22 = vpop.xlane.xlu0 %3271 }
 0x6e8   : > { %7423 = vrcp.f32 %v3272_v22 }
 0x6ec   : > { %v3275_v50 = vpop.xlane.xlu1 %3274 }
 0x6ed   : > { %7425 = vrcp.f32 %v3275_v50 }
 0x6f5   : > { %v7424_v26 = vpop.eup %7423 }
 0x6f6   : > { %v3295_v24 = vmul.f32 %v7424_v26, %v9082_v4 }
 0x6f8   : > { %6927 = vmatmul.mubr.msk.f32.vlgmr.msra.gmra.mxu0 %vm1741_vm2, %v3295_v24 }
 0x6f9   : > { %6935 = vmatpush3.msra.mxu0 %v3463_v20  ;;  %6936 = vmatprep.mubr.msk.f32.mxu0 %vm8090_vm1, %v8089_v40  ;;  %v6597_v20 = vld [vmem:[#allocation17] ss:$0 sm:$0xff] }
 0x6fa   : > { %v7426_v25 = vpop.eup %7425  ;;  %6944 = vmatprep.subr.mxu0 %v8089_v40 }
 0x6fb   : > { %v3297_v21 = vmul.f32 %v7426_v25, %v9086_v10  ;;  %v1332_v10 = vld [vmem:[#allocation16 + $0x18] sm:$0xff] }
 0x6fd   : > { %6932 = vmatmul.mubr.msk.f32.vlgmr.msra.gmra.mxu1 %vm1741_vm2, %v3297_v21 }
 0x6fe   : > { %6940 = vmatpush3.msra.mxu1 %v3539_v48  ;;  %6941 = vmatprep.mubr.msk.f32.mxu1 %vm8090_vm1, %v8089_v40 }
 0x6ff   : > { %6949 = vmatprep.subr.mxu1 %v8089_v40 }
 0x72e   : > { %v3278_v19 = vpop.xlane.xlu0 %3277 }
 0x72f   : > { %7427 = vrcp.f32 %v3278_v19 }
 0x733   : > { %v3281_v52 = vpop.xlane.xlu1 %3280 }
 0x734   : > { %7429 = vrcp.f32 %v3281_v52 }
 0x737   : > { %v3284_v35 = vpop.xlane.xlu0 %3283 }
 0x738   : > { %7431 = vrcp.f32 %v3284_v35 }
 0x73b   : > { %v3287_v38 = vpop.xlane.xlu1 %3286 }
 0x73c   : > { %7433 = vrcp.f32 %v3287_v38  ;;  %v7428_v54 = vpop.eup %7427 }
 0x73d   : > { %v3299_v41 = vmul.f32 %v7428_v54, %v7412_v62 }
 0x73f   : > { %v3290_v42 = vpop.xlane.xlu0 %3289  ;;  %6937 = vmatmul.mubr.msk.f32.vlgmr.msra.gmra.mxu0 %vm1741_vm2, %v3299_v41 }
 0x740   : > { %7435 = vrcp.f32 %v3290_v42  ;;  %6945 = vmatpush3.msra.mxu0 %v3615_v23  ;;  %6946 = vmatprep.mubr.msk.f32.mxu0 %vm8090_vm1, %v8089_v40 }
 0x741   : > { %v7430_v3 = vpop.eup %7429  ;;  %6954 = vmatprep.subr.mxu0 %v8089_v40 }
 0x742   : > { %v3301_v59 = vmul.f32 %v7430_v3, %v7414_v37  ;;  %v1321_v37 = vld [vmem:[%s9608_s9 + $0x8] sm:$0xff] }
 0x743   : > { %v3293_v63 = vpop.xlane.xlu1 %3292  ;;  %v3767_v28 = vpop.permute.xlu0 %3766 }
 0x744   : > { %7437 = vrcp.f32 %v3293_v63  ;;  %6942 = vmatmul.mubr.msk.f32.vlgmr.msra.gmra.mxu1 %vm1741_vm2, %v3301_v59  ;;  %v1336_v59 = vld [vmem:[#allocation19 + $0x10] sm:$0xff]  ;;  %v1335_v63 = vld [vmem:[#allocation19 + $0x8] sm:$0xff] }
 0x745   : > { %v7432_v0 = vpop.eup %7431  ;;  %6950 = vmatpush3.msra.mxu1 %v3691_v32  ;;  %6951 = vmatprep.mubr.msk.f32.mxu1 %vm8090_vm1, %v8089_v40 }
 0x746   : > { %v3303_v56 = vmul.f32 %v7432_v0, %v7416_v14  ;;  %6959 = vmatprep.subr.mxu1 %v8089_v40  ;;  %v1337_v14 = vld [vmem:[#allocation19 + $0x18] sm:$0xff]  ;;  %v1334_v0 = vld [vmem:[#allocation19] sm:$0xff] }
 0x747   : > { %v3843_v16 = vpop.permute.xlu1 %3842 }
 0x748   : > { %6947 = vmatmul.mubr.msk.f32.vlgmr.msra.gmra.mxu0 %vm1741_vm2, %v3303_v56 }
 0x749   : > { %v7434_v4 = vpop.eup %7433  ;;  %6955 = vmatpush3.msra.mxu0 %v3767_v28  ;;  %6956 = vmatprep.mubr.msk.f32.mxu0 %vm8090_vm1, %v8089_v40  ;;  %v9178_v28 = vld [vmem:[#allocation11] ss:$0 sm:$0xff] }
 0x74a   : > { %v3305_v13 = vmul.f32 %v7434_v4, %v7418_v6  ;;  %6964 = vmatprep.subr.mxu0 %v1323_v55 }
 0x74c   : > { %6952 = vmatmul.mubr.msk.f32.vlgmr.msra.gmra.mxu1 %vm1741_vm2, %v3305_v13 }
 0x74d   : > { %v7436_v34 = vpop.eup %7435  ;;  %6960 = vmatpush3.msra.mxu1 %v3843_v16  ;;  %6961 = vmatprep.mubr.msk.f32.mxu1 %vm8090_vm1, %v8089_v40 }
 0x74e   : > { %v3307_v44 = vmul.f32 %v7436_v34, %v9097_v45  ;;  %6975 = vmatprep.subr.mxu1 %v1332_v10 }
 0x750   : > { %6957 = vmatmul.mubr.msk.f32.vlgmr.msra.gmra.mxu0 %vm1741_vm2, %v3307_v44 }
 0x751   : > { %v7438_v47 = vpop.eup %7437  ;;  %6965 = vmatpush3.msra.mxu0 %v1323_v55 }
 0x752   : > { %v3309_v49 = vmul.f32 %v7438_v47, %v9101_v18  ;;  %6966 = vmatprep.subr.mxu0 %v1322_v5 }
 0x753   : > { %6967 = vmatpush3.msra.mxu0 %v1322_v5 }
 0x754   : > { %6962 = vmatmul.mubr.msk.f32.vlgmr.msra.gmra.mxu1 %vm1741_vm2, %v3309_v49  ;;  %6968 = vmatprep.subr.mxu0 %v1321_v37 }
 0x755   : > { %6976 = vmatpush3.msra.mxu1 %v1332_v10  ;;  %6983 = vmatprep.mubr.msk.f32.mxu1 %vm1381_vm0, %v4053_v53 }
 0x756   : > { %6977 = vmatprep.subr.mxu1 %v1331_v51  ;;  %6969 = vmatpush3.msra.mxu0 %v1321_v37 }
 0x757   : > { %6978 = vmatpush3.msra.mxu1 %v1331_v51  ;;  %6970 = vmatprep.subr.mxu0 %v1320_v7 }
 0x758   : > { %6979 = vmatprep.subr.mxu1 %v1330_v57  ;;  %6971 = vmatpush3.msra.mxu0 %v1320_v7 }
 0x759   : > { %6980 = vmatpush3.msra.mxu1 %v1330_v57  ;;  %6986 = vmatprep.subr.mxu0 %v1337_v14 }
 0x75a   : > { %6981 = vmatprep.subr.mxu1 %v1329_v27 }
 0x75b   : > { %6982 = vmatpush3.msra.mxu1 %v1329_v27 }
 0x75c   : > { %6984 = vmatmul.mubr.msk.f32.vlgmr.msra.gmra.mxu1 %vm1381_vm0, %v4054_v60  ;;  %6997 = vmatprep.subr.mxu1 %v8089_v40 }
 0x75d   : > { %6999 = vmatprep.mubr.msk.f32.mxu1 %vm8090_vm1, %v8089_v40 }
 0x7b8   : > { %v3382_v30 = vpop.f32.mrf.mxu0 }
 0x7ba   : > { %v6928_v31 = vpop.f32.mrf.mxu0 }
 0x7bd   : > { %v3458_v33 = vpop.f32.mrf.mxu1 }
 0x7bf   : > { %v6933_v62 = vpop.f32.mrf.mxu1 }
 0x7ff   : > { %v3534_v1 = vpop.f32.mrf.mxu0 }
 0x800   : > { %3920 = vrot.lane.b32.xlu0 %v3534_v1, %s9530_s14 }
 0x801   : > { %v6938_v2 = vpop.f32.mrf.mxu0 }
 0x804   : > { %v3610_v36 = vpop.f32.mrf.mxu1 }
 0x805   : > { %3922 = vrot.lane.b32.xlu1 %v3610_v36, %s9530_s14 }
 0x806   : > { %v6943_v8 = vpop.f32.mrf.mxu1 }
 0x808   : > { %v3686_v12 = vpop.f32.mrf.mxu0 }
 0x809   : > { %3928 = vrot.lane.b32.xlu0 %v3686_v12, %s8105_s25 }
 0x80a   : > { %v6948_v43 = vpop.f32.mrf.mxu0 }
 0x80c   : > { %v3762_v6 = vpop.f32.mrf.mxu1 }
 0x80d   : > { %3930 = vrot.lane.b32.xlu1 %v3762_v6, %s8105_s25 }
 0x80e   : > { %v6953_v9 = vpop.f32.mrf.mxu1 }
 0x810   : > { %v3838_v45 = vpop.f32.mrf.mxu0 }
 0x811   : > { %3936 = vrot.lane.b32.xlu0 %v3838_v45, %s9528_s4 }
 0x812   : > { %v6958_v39 = vpop.f32.mrf.mxu0 }
 0x814   : > { %v3914_v18 = vpop.f32.mrf.mxu1 }
 0x815   : > { %3938 = vrot.lane.b32.xlu1 %v3914_v18, %s9528_s4  ;;  %s1299_s4 = scalar_lea.vmem %s9609_s12, %s6530_s6  ;;  %s9610_s6 = smov 104  }
 0x816   : > { %v6963_v11 = vpop.f32.mrf.mxu1  ;;  %v1373_v42 = vld [vmem:[%s1299_s4] sm:$0xff]  ;;  %v1374_v56 = vld [vmem:[%s1299_s4 + $0x8] sm:$0xff]  ;;  %s9617_s4 = smov 24   ;;  %s9620_s12 = sld [smem:[#allocation61_spill]] }
 0x81c   : > { %v6985_v48 = vpop.f32.mrf.mxu1 }
 0x81d   : > { %v9154_v23 = vadd.f32 %v6985_v48, %v6597_v20 }
 0x81e   : > { %v4133_v22 = vpop.f32.mrf.mxu1 }
 0x81f   : > { %v4134_v32 = vadd.f32 %v6597_v20, %v4133_v22  ;;  %4233 = vrot.lane.b32.xlu1 %v9154_v23, %s8092_s5 }
 0x821   : > { %4231 = vrot.lane.b32.xlu0 %v4134_v32, %s8092_s5 }
 0x823   : > { %4237 = vrot.lane.b32.xlu1 %v9154_v23, %s8093_s15 }
 0x825   : > { %4235 = vrot.lane.b32.xlu0 %v4134_v32, %s8093_s15 }
 0x872   : > { %v3921_v50 = vpop.permute.xlu0 %3920 }
 0x873   : > { %v3942_v25 = vsel %vm1741_vm2, %v3382_v30, %v3921_v50 }
 0x877   : > { %v3923_v26 = vpop.permute.xlu1 %3922 }
 0x878   : > { %v3943_v38 = vsel %vm1741_vm2, %v3458_v33, %v3923_v26 }
 0x87b   : > { %v3929_v24 = vpop.permute.xlu0 %3928 }
 0x87c   : > { %v3945_v21 = vsel %vm3944_vm13, %v3942_v25, %v3929_v24 }
 0x87f   : > { %v3931_v19 = vpop.permute.xlu1 %3930 }
 0x880   : > { %v3946_v54 = vsel %vm3944_vm13, %v3943_v38, %v3931_v19 }
 0x883   : > { %v3937_v52 = vpop.permute.xlu0 %3936 }
 0x884   : > { %v3948_v35 = vsel %vm3947_vm14, %v3945_v21, %v3937_v52 }
 0x885   : > { %6972 = vmatprep.mubr.msk.f32.mxu0 %vm1381_vm0, %v3948_v35 }
 0x887   : > { %v3939_v41 = vpop.permute.xlu1 %3938 }
 0x888   : > { %v3949_v3 = vsel %vm3947_vm14, %v3946_v54, %v3939_v41 }
 0x889   : > { %6973 = vmatmul.mubr.msk.f32.vlgmr.msra.gmra.mxu0 %vm1381_vm0, %v3949_v3 }
 0x88a   : > { %6987 = vmatpush3.msra.mxu0 %v1337_v14  ;;  %6994 = vmatprep.mubr.msk.f32.mxu0 %vm1381_vm0, %v1373_v42 }
 0x88b   : > { %6988 = vmatprep.subr.mxu0 %v1336_v59 }
 0x88c   : > { %6989 = vmatpush3.msra.mxu0 %v1336_v59 }
 0x88d   : > { %6990 = vmatprep.subr.mxu0 %v1335_v63 }
 0x88e   : > { %6991 = vmatpush3.msra.mxu0 %v1335_v63 }
 0x88f   : > { %6992 = vmatprep.subr.mxu0 %v1334_v0 }
 0x890   : > { %6993 = vmatpush3.msra.mxu0 %v1334_v0 }
 0x891   : > { %6995 = vmatmul.mubr.msk.f32.vlgmr.msra.gmra.mxu0 %vm1381_vm0, %v1374_v56  ;;  %7007 = vmatprep.subr.mxu0 %v8089_v40  ;;  %v4234_v29 = vpop.permute.xlu1 %4233 }
 0x892   : > { %7009 = vmatprep.mubr.msk.f32.mxu0 %vm8090_vm1, %v8089_v40 }
 0x893   : > { %v4232_v47 = vpop.permute.xlu0 %4231 }
 0x895   : > { %v4238_v49 = vpop.permute.xlu1 %4237 }
 0x897   : > { %v4236_v51 = vpop.permute.xlu0 %4235 }
 0x949   : > { %v6974_v4 = vpop.f32.mrf.mxu0 }
 0x94a   : > { %v9181_v13 = vadd.f32 %v6974_v4, %v9178_v28 }
 0x94b   : > { %v9183_v10 = vpop.f32.mrf.mxu0 }
 0x951   : > { %v6996_v16 = vpop.f32.mrf.mxu0 }
 0x952   : > { %v9185_v34 = vadd.f32 %v6996_v16, %v6600_v17 }
 0x953   : > { %v4220_v44 = vpop.f32.mrf.mxu0 }
 0x954   : > { %v9187_v46 = vadd.f32 %v6600_v17, %v4220_v44  ;;  %4247 = vrot.lane.b32.xlu1 %v9185_v34, %s8092_s5 }
 0x956   : > { %4245 = vrot.lane.b32.xlu0 %v9187_v46, %s8092_s5  ;;  %6998 = vmatpush3.xpose.msk.msra.mxu1 %vm1741_vm2, %v9187_v46  ;;  %s9611_s5 = sld [smem:[#allocation45_spill]] }
 0x957   : > { %7002 = vmatprep.subr.mxu1 %v8089_v40 }
 0x958   : > { %4251 = vrot.lane.b32.xlu1 %v9185_v34, %s8093_s15 }
 0x959   : > { %7000 = vmatmul.mubr.msk.f32.vlgmr.msra.gmra.mxu1 %vm1741_vm2, %v4134_v32 }
 0x95a   : > { %4249 = vrot.lane.b32.xlu0 %v9187_v46, %s8093_s15  ;;  %7003 = vmatpush3.xpose.msk.msra.mxu1 %vm1741_vm2, %v9185_v34 }
 0x95b   : > { %7004 = vmatprep.mubr.msk.f32.mxu1 %vm8090_vm1, %v8089_v40  ;;  %7012 = vmatprep.subr.mxu1 %v8089_v40 }
 0x95c   : > { %4255 = vrot.lane.b32.xlu1 %v9185_v34, %s9610_s6  ;;  %s1305_s15 = scalar_lea.vmem %s9611_s5, %s9635_s13  ;;  %s9616_s13 = smov 96  }
 0x95d   : > { %7005 = vmatmul.mubr.msk.f32.vlgmr.msra.gmra.mxu1 %vm1741_vm2, %v9154_v23  ;;  %v1379_v62 = vld [vmem:[%s1305_s15] sm:$0x1]  ;;  %v1380_v1 = vld [vmem:[%s1305_s15 + $0x1] sm:$0x1]  ;;  %s9622_s5 = sld [smem:[#allocation64_spill]] }
 0x95e   : > { %4253 = vrot.lane.b32.xlu0 %v9187_v46, %s9610_s6  ;;  %7014 = vmatprep.mubr.msk.f32.mxu1 %vm8090_vm1, %v8089_v40  ;;  %vm4257_vm15 = vcmp.gt.f32.partialorder %v1379_v62, 0.5  ;;  %vm4258_vm3 = vcmp.gt.f32.partialorder %v1380_v1, 0.5  ;;  %s9623_s15 = sld [smem:[#allocation65_spill]] }
 0x95f   : > { %v4859_v55 = vsel %vm4257_vm15, 1, %v8102_v15  ;;  %v4860_v2 = vsel %vm4258_vm3, 1, %v8102_v15 }
 0x960   : > { %4241 = vrot.lane.b32.xlu1 %v9154_v23, %s9610_s6  ;;  %v4864_v5 = vrot.slane %v4859_v55, %v8623_v61  ;;  %v4868_v7 = vrot.slane %v4860_v2, %v8623_v61 }
 0x962   : > { %4239 = vrot.lane.b32.xlu0 %v4134_v32, %s9610_s6  ;;  %vm9270_vm4 = vcmp.eq.s32.totalorder %v4864_v5, 1  ;;  %vm9277_vm5 = vcmp.eq.s32.totalorder %v4868_v7, 1  ;;  %s9621_s6 = sld [smem:[#allocation62_spill]] }
 0x9c6   : > { %v9217_v53 = vpop.permute.xlu1 %4247 }
 0x9c7   : > { %7013 = vmatpush3.xpose.msk.msra.mxu1 %vm1741_vm2, %v9217_v53 }
 0x9c8   : > { %v9221_v57 = vpop.permute.xlu0 %4245  ;;  %7022 = vmatprep.subr.mxu1 %v8089_v40 }
 0x9c9   : > { %7008 = vmatpush3.xpose.msk.msra.mxu0 %vm1741_vm2, %v9221_v57 }
 0x9ca   : > { %v9226_v58 = vpop.permute.xlu1 %4251  ;;  %7015 = vmatmul.mubr.msk.f32.vlgmr.msra.gmra.mxu1 %vm1741_vm2, %v4234_v29  ;;  %7017 = vmatprep.subr.mxu0 %v8089_v40 }
 0x9cb   : > { %7023 = vmatpush3.xpose.msk.msra.mxu1 %vm1741_vm2, %v9226_v58  ;;  %7024 = vmatprep.mubr.msk.f32.mxu1 %vm8090_vm1, %v8089_v40 }
 0x9cc   : > { %7010 = vmatmul.mubr.msk.f32.vlgmr.msra.gmra.mxu0 %vm1741_vm2, %v4232_v47  ;;  %v9235_v27 = vpop.permute.xlu0 %4249  ;;  %7032 = vmatprep.subr.mxu1 %v8089_v40 }
 0x9cd   : > { %7018 = vmatpush3.xpose.msk.msra.mxu0 %vm1741_vm2, %v9235_v27  ;;  %7019 = vmatprep.mubr.msk.f32.mxu0 %vm8090_vm1, %v8089_v40 }
 0x9ce   : > { %v9242_v60 = vpop.permute.xlu1 %4255  ;;  %7025 = vmatmul.mubr.msk.f32.vlgmr.msra.gmra.mxu1 %vm1741_vm2, %v4238_v49  ;;  %7027 = vmatprep.subr.mxu0 %v8089_v40 }
 0x9cf   : > { %7033 = vmatpush3.xpose.msk.msra.mxu1 %vm1741_vm2, %v9242_v60  ;;  %7034 = vmatprep.mubr.msk.f32.mxu1 %vm8090_vm1, %v8089_v40 }
 0x9d0   : > { %7020 = vmatmul.mubr.msk.f32.vlgmr.msra.gmra.mxu0 %vm1741_vm2, %v4236_v51  ;;  %v9251_v30 = vpop.permute.xlu0 %4253  ;;  %7042 = vmatprep.subr.mxu1 %v8089_v40 }
 0x9d1   : > { %7028 = vmatpush3.xpose.msk.msra.mxu0 %vm1741_vm2, %v9251_v30  ;;  %7029 = vmatprep.mubr.msk.f32.mxu0 %vm8090_vm1, %v8089_v40 }
 0x9d2   : > { %v4242_v31 = vpop.permute.xlu1 %4241  ;;  %7037 = vmatprep.subr.mxu0 %v8089_v40 }
 0x9d3   : > { %7035 = vmatmul.mubr.msk.f32.vlgmr.msra.gmra.mxu1 %vm1741_vm2, %v4242_v31 }
 0x9d4   : > { %v4240_v33 = vpop.permute.xlu0 %4239  ;;  %7044 = vmatprep.mubr.msk.f32.mxu1 %vm8090_vm1, %v8089_v40 }
 0x9d5   : > { %7030 = vmatmul.mubr.msk.f32.vlgmr.msra.gmra.mxu0 %vm1741_vm2, %v4240_v33 }
 0x9d6   : > { %7039 = vmatprep.mubr.msk.f32.mxu0 %vm8090_vm1, %v8089_v40 }
 0xa19   : > { %v4329_v36 = vpop.f32.mrf.mxu1 }
 0xa1a   : > { %v4851_v8 = vmul.f32 0.35355338, %v4329_v36 }
 0xa1b   : > { %v7001_v12 = vpop.f32.mrf.mxu1 }
 0xa1c   : > { %v4871_v14 = vsel %vm9270_vm4, -1e+30, %v4851_v8 }
 0xa1d   : > { %v4403_v43 = vpop.f32.mrf.mxu1  ;;  %v4879_v9 = vsel %vm1741_vm2, %v4871_v14, -inf }
 0xa1e   : > { %v4852_v15 = vmul.f32 0.35355338, %v4403_v43  ;;  %4880 = vmax.xlane.f32.xlu0 %v4879_v9 }
 0xa1f   : > { %v7006_v45 = vpop.f32.mrf.mxu1 }
 0xa20   : > { %v4872_v39 = vsel %vm9277_vm5, -1e+30, %v4852_v15 }
 0xa21   : > { %v4882_v61 = vsel %vm1741_vm2, %v4872_v39, -inf }
 0xa22   : > { %4883 = vmax.xlane.f32.xlu1 %v4882_v61 }
 0xa8a   : > { %v4551_v18 = vpop.f32.mrf.mxu1 }
 0xa8b   : > { %v4854_v11 = vmul.f32 0.35355338, %v4551_v18 }
 0xa8c   : > { %v4477_v20 = vpop.f32.mrf.mxu0  ;;  %v7016_v48 = vpop.f32.mrf.mxu1 }
 0xa8d   : > { %v4874_v23 = vsel %vm9277_vm5, -1e+30, %v4854_v11  ;;  %v4853_v22 = vmul.f32 0.35355338, %v4477_v20 }
 0xa8e   : > { %v7011_v32 = vpop.f32.mrf.mxu0  ;;  %v4699_v50 = vpop.f32.mrf.mxu1  ;;  %v4888_v26 = vsel %vm1741_vm2, %v4874_v23, -inf }
 0xa8f   : > { %v4873_v24 = vsel %vm9270_vm4, -1e+30, %v4853_v22  ;;  %v4856_v25 = vmul.f32 0.35355338, %v4699_v50  ;;  %4889 = vmax.xlane.f32.xlu0 %v4888_v26 }
 0xa90   : > { %v4625_v21 = vpop.f32.mrf.mxu0  ;;  %v7026_v19 = vpop.f32.mrf.mxu1  ;;  %v4885_v54 = vsel %vm1741_vm2, %v4873_v24, -inf }
 0xa91   : > { %v4876_v52 = vsel %vm9277_vm5, -1e+30, %v4856_v25  ;;  %v4855_v35 = vmul.f32 0.35355338, %v4625_v21 }
 0xa92   : > { %v7021_v38 = vpop.f32.mrf.mxu0  ;;  %v4894_v41 = vsel %vm1741_vm2, %v4876_v52, -inf }
 0xa93   : > { %v4875_v42 = vsel %vm9270_vm4, -1e+30, %v4855_v35  ;;  %4886 = vmax.xlane.f32.xlu0 %v4885_v54  ;;  %4895 = vmax.xlane.f32.xlu1 %v4894_v41  ;;  %v4847_v3 = vpop.f32.mrf.mxu1 }
 0xa94   : > { %v4858_v59 = vmul.f32 0.35355338, %v4847_v3  ;;  %v4891_v17 = vsel %vm1741_vm2, %v4875_v42, -inf }
 0xa95   : > { %v4773_v63 = vpop.f32.mrf.mxu0  ;;  %v7036_v0 = vpop.f32.mrf.mxu1 }
 0xa96   : > { %v4878_v56 = vsel %vm9277_vm5, -1e+30, %v4858_v59  ;;  %v4857_v4 = vmul.f32 0.35355338, %v4773_v63 }
 0xa97   : > { %v7031_v16 = vpop.f32.mrf.mxu0  ;;  %4892 = vmax.xlane.f32.xlu0 %v4891_v17  ;;  %v4900_v44 = vsel %vm1741_vm2, %v4878_v56, -inf }
 0xa98   : > { %v4877_v29 = vsel %vm9270_vm4, -1e+30, %v4857_v4  ;;  %4901 = vmax.xlane.f32.xlu1 %v4900_v44 }
 0xa99   : > { %v4897_v47 = vsel %vm1741_vm2, %v4877_v29, -inf }
 0xa9b   : > { %4898 = vmax.xlane.f32.xlu0 %v4897_v47 }
 0xaa7   : > { %v4881_v49 = vpop.xlane.xlu0 %4880 }
 0xaa8   : > { %v4903_v51 = vsub.f32 %v4871_v14, %v4881_v49 }
 0xaa9   : > { %5043 = vrot.lane.b32.xlu1 %v9185_v34, %s9616_s13 }
 0xaaa   : > { %v4911_v33 = vmul.f32 1.442695, %v4903_v51 }
 0xaab   : > { %v4884_v31 = vpop.xlane.xlu1 %4883 }
 0xaac   : > { %v4904_v34 = vsub.f32 %v4872_v39, %v4884_v31  ;;  %7439 = vpow2.f32 %v4911_v33 }
 0xaad   : > { %5119 = vrot.lane.b32.xlu1 %v9221_v57, %s9616_s13 }
 0xaae   : > { %v4913_v62 = vmul.f32 1.442695, %v4904_v34 }
 0xab0   : > { %7441 = vpow2.f32 %v4913_v62 }
 0xab1   : > { %4967 = vrot.lane.b32.xlu0 %v9187_v46, %s9616_s13  ;;  %5195 = vrot.lane.b32.xlu1 %v9217_v53, %s9616_s13 }
 0xab5   : > { %5271 = vrot.lane.b32.xlu0 %v9235_v27, %s9616_s13  ;;  %5347 = vrot.lane.b32.xlu1 %v9226_v58, %s9616_s13 }
 0xab9   : > { %v9315_v57 = vpop.eup %7439 }
 0xaba   : > { %v4927_v46 = vsel %vm1741_vm2, %v9315_v57, 0.0 }
 0xabd   : > { %v9319_v53 = vpop.eup %7441 }
 0xabe   : > { %v4930_v27 = vsel %vm1741_vm2, %v9319_v53, 0.0 }
 0xad4   : > { %4928 = vadd.xlane.f32.xlu0 %v4927_v46 }
 0xad9   : > { %4931 = vadd.xlane.f32.xlu1 %v4930_v27 }
 0xb18   : > { %v4890_v58 = vpop.xlane.xlu0 %4889 }
 0xb19   : > { %v4906_v1 = vsub.f32 %v4874_v23, %v4890_v58 }
 0xb1b   : > { %v4917_v55 = vmul.f32 1.442695, %v4906_v1 }
 0xb1c   : > { %v4887_v5 = vpop.xlane.xlu0 %4886  ;;  %v4896_v2 = vpop.xlane.xlu1 %4895 }
 0xb1d   : > { %7443 = vpow2.f32 %v4917_v55  ;;  %v4905_v36 = vsub.f32 %v4873_v24, %v4887_v5  ;;  %v4908_v37 = vsub.f32 %v4876_v52, %v4896_v2 }
 0xb1f   : > { %v4915_v7 = vmul.f32 1.442695, %v4905_v36  ;;  %v4921_v8 = vmul.f32 1.442695, %v4908_v37  ;;  %v1342_v37 = vld [vmem:[#allocation22 + $0x18] sm:$0xff] }
 0xb20   : > { %v4893_v12 = vpop.xlane.xlu0 %4892 }
 0xb21   : > { %7445 = vpow2.f32 %v4915_v7  ;;  %v4907_v14 = vsub.f32 %v4875_v42, %v4893_v12  ;;  %v4902_v43 = vpop.xlane.xlu1 %4901  ;;  %v1341_v7 = vld [vmem:[#allocation22 + $0x10] sm:$0xff] }
 0xb22   : > { %7447 = vpow2.f32 %v4921_v8  ;;  %v4910_v6 = vsub.f32 %v4878_v56, %v4902_v43  ;;  %v1340_v8 = vld [vmem:[#allocation22 + $0x8] sm:$0xff] }
 0xb23   : > { %v4919_v9 = vmul.f32 1.442695, %v4907_v14  ;;  %v1339_v14 = vld [vmem:[#allocation22] sm:$0xff] }
 0xb24   : > { %v4925_v15 = vmul.f32 1.442695, %v4910_v6  ;;  %v4899_v45 = vpop.xlane.xlu0 %4898 }
 0xb25   : > { %7449 = vpow2.f32 %v4919_v9  ;;  %v4909_v39 = vsub.f32 %v4877_v29, %v4899_v45  ;;  %v5044_v61 = vpop.permute.xlu1 %5043 }
 0xb26   : > { %7451 = vpow2.f32 %v4925_v15  ;;  %7043 = vmatpush3.msra.mxu1 %v5044_v61 }
 0xb27   : > { %v4923_v18 = vmul.f32 1.442695, %v4909_v39  ;;  %7052 = vmatprep.subr.mxu1 %v8089_v40 }
 0xb28   : > { %v4968_v11 = vpop.permute.xlu0 %4967 }
 0xb29   : > { %7453 = vpow2.f32 %v4923_v18  ;;  %7038 = vmatpush3.msra.mxu0 %v4968_v11  ;;  %v5120_v35 = vpop.permute.xlu1 %5119 }
 0xb2a   : > { %v7444_v20 = vpop.eup %7443  ;;  %7047 = vmatprep.subr.mxu0 %v8089_v40 }
 0xb2b   : > { %v4936_v48 = vsel %vm1741_vm2, %v7444_v20, 0.0 }
 0xb2c   : > { %4937 = vadd.xlane.f32.xlu1 %v4936_v48  ;;  %v5272_v54 = vpop.permute.xlu0 %5271  ;;  %v4029_v48 = vadd.f32 %v9178_v28, %v9183_v10 }
 0xb2d   : > { %v5196_v38 = vpop.permute.xlu1 %5195 }
 0xb2e   : > { %v7446_v23 = vpop.eup %7445 }
 0xb2f   : > { %v7448_v22 = vpop.eup %7447  ;;  %v4933_v32 = vsel %vm1741_vm2, %v7446_v23, 0.0 }
 0xb30   : > { %4934 = vadd.xlane.f32.xlu0 %v4933_v32  ;;  %v4942_v50 = vsel %vm1741_vm2, %v7448_v22, 0.0 }
 0xb31   : > { %4943 = vadd.xlane.f32.xlu1 %v4942_v50  ;;  %v5348_v42 = vpop.permute.xlu1 %5347 }
 0xb32   : > { %v7450_v26 = vpop.eup %7449 }
 0xb33   : > { %v9328_v24 = vpop.eup %7451  ;;  %v4939_v25 = vsel %vm1741_vm2, %v7450_v26, 0.0 }
 0xb34   : > { %4940 = vadd.xlane.f32.xlu0 %v4939_v25  ;;  %v4948_v21 = vsel %vm1741_vm2, %v9328_v24, 0.0 }
 0xb35   : > { %4949 = vadd.xlane.f32.xlu1 %v4948_v21 }
 0xb36   : > { %v9333_v19 = vpop.eup %7453 }
 0xb37   : > { %v4945_v52 = vsel %vm1741_vm2, %v9333_v19, 0.0 }
 0xb38   : > { %4946 = vadd.xlane.f32.xlu0 %v4945_v52 }
 0xb46   : > { %5499 = vrot.lane.b32.xlu1 %v9242_v60, %s9616_s13 }
 0xb4e   : > { %5423 = vrot.lane.b32.xlu0 %v9251_v30, %s9616_s13 }
 0xb5d   : > { %v4929_v41 = vpop.xlane.xlu0 %4928 }
 0xb5e   : > { %7455 = vrcp.f32 %v4929_v41  ;;  %v6627_v41 = vld [vmem:[#allocation23] ss:$0 sm:$0xff] }
 0xb62   : > { %v4932_v3 = vpop.xlane.xlu1 %4931 }
 0xb63   : > { %7457 = vrcp.f32 %v4932_v3 }
 0xb6b   : > { %v7456_v59 = vpop.eup %7455 }
 0xb6c   : > { %v4952_v63 = vmul.f32 %v7456_v59, %v9315_v57 }
 0xb6e   : > { %7040 = vmatmul.mubr.msk.f32.vlgmr.msra.gmra.mxu0 %vm1741_vm2, %v4952_v63  ;;  %v7488_v63 = vld [vmem:[%s8565_s22 + $0x8] sm:$0xff] }
 0xb6f   : > { %7048 = vmatpush3.msra.mxu0 %v5120_v35  ;;  %7049 = vmatprep.mubr.msk.f32.mxu0 %vm8090_vm1, %v8089_v40 }
 0xb70   : > { %v7458_v60 = vpop.eup %7457  ;;  %7057 = vmatprep.subr.mxu0 %v8089_v40 }
 0xb71   : > { %v4954_v30 = vmul.f32 %v7458_v60, %v9319_v53 }
 0xb73   : > { %7045 = vmatmul.mubr.msk.f32.vlgmr.msra.gmra.mxu1 %vm1741_vm2, %v4954_v30 }
 0xb74   : > { %7053 = vmatpush3.msra.mxu1 %v5196_v38  ;;  %7054 = vmatprep.mubr.msk.f32.mxu1 %vm8090_vm1, %v8089_v40 }
 0xb75   : > { %7062 = vmatprep.subr.mxu1 %v8089_v40 }
 0xbb5   : > { %v4938_v0 = vpop.xlane.xlu1 %4937 }
 0xbb6   : > { %7459 = vrcp.f32 %v4938_v0 }
 0xbb9   : > { %v4935_v56 = vpop.xlane.xlu0 %4934 }
 0xbba   : > { %7461 = vrcp.f32 %v4935_v56  ;;  %v4944_v4 = vpop.xlane.xlu1 %4943 }
 0xbbb   : > { %7463 = vrcp.f32 %v4944_v4  ;;  %v9398_v4 = vadd.f32 %v7488_v63, %v9181_v13 }
 0xbbd   : > { %v4941_v17 = vpop.xlane.xlu0 %4940 }
 0xbbe   : > { %7465 = vrcp.f32 %v4941_v17  ;;  %v4950_v16 = vpop.xlane.xlu1 %4949 }
 0xbbf   : > { %7467 = vrcp.f32 %v4950_v16  ;;  %v5703_v16 = vsel %vm1381_vm0, %v9398_v4, 0.0 }
 0xbc1   : > { %v4947_v44 = vpop.xlane.xlu0 %4946 }
 0xbc2   : > { %7469 = vrcp.f32 %v4947_v44  ;;  %v5500_v62 = vpop.permute.xlu1 %5499 }
 0xbc3   : > { %v7460_v29 = vpop.eup %7459 }
 0xbc4   : > { %v4958_v47 = vmul.f32 %v7460_v29, %v7444_v20 }
 0xbc5   : > { %v5424_v27 = vpop.permute.xlu0 %5423 }
 0xbc6   : > { %7055 = vmatmul.mubr.msk.f32.vlgmr.msra.gmra.mxu1 %vm1741_vm2, %v4958_v47 }
 0xbc7   : > { %v7462_v49 = vpop.eup %7461  ;;  %7063 = vmatpush3.msra.mxu1 %v5348_v42  ;;  %7064 = vmatprep.mubr.msk.f32.mxu1 %vm8090_vm1, %v8089_v40 }
 0xbc8   : > { %v7464_v51 = vpop.eup %7463  ;;  %7072 = vmatprep.subr.mxu1 %v8089_v40  ;;  %v4956_v31 = vmul.f32 %v7462_v49, %v7446_v23  ;;  %v7487_v23 = vld [vmem:[%s8565_s22] sm:$0xff]  ;;  %s9618_s22 = sld [smem:[#allocation59_spill]] }
 0xbc9   : > { %v4962_v33 = vmul.f32 %v7464_v51, %v7448_v22  ;;  %v9378_v22 = vadd.f32 %v7487_v23, %v4029_v48 }
 0xbca   : > { %7050 = vmatmul.mubr.msk.f32.vlgmr.msra.gmra.mxu0 %vm1741_vm2, %v4956_v31 }
 0xbcb   : > { %v7466_v34 = vpop.eup %7465  ;;  %7058 = vmatpush3.msra.mxu0 %v5272_v54  ;;  %7065 = vmatmul.mubr.msk.f32.vlgmr.msra.gmra.mxu1 %vm1741_vm2, %v4962_v33  ;;  %v5700_v32 = vsel %vm1381_vm0, %v9378_v22, 0.0 }
 0xbcc   : > { %v7468_v57 = vpop.eup %7467  ;;  %7073 = vmatpush3.msra.mxu1 %v5500_v62  ;;  %7059 = vmatprep.mubr.msk.f32.mxu0 %vm8090_vm1, %v8089_v40  ;;  %v4960_v46 = vmul.f32 %v7466_v34, %v7450_v26 }
 0xbcd   : > { %7067 = vmatprep.subr.mxu0 %v8089_v40  ;;  %7074 = vmatprep.mubr.msk.f32.mxu1 %vm8090_vm1, %v8089_v40  ;;  %v4966_v53 = vmul.f32 %v7468_v57, %v9328_v24 }
 0xbce   : > { %7060 = vmatmul.mubr.msk.f32.vlgmr.msra.gmra.mxu0 %vm1741_vm2, %v4960_v46 }
 0xbcf   : > { %v7470_v58 = vpop.eup %7469  ;;  %7068 = vmatpush3.msra.mxu0 %v5424_v27  ;;  %7075 = vmatmul.mubr.msk.f32.vlgmr.msra.gmra.mxu1 %vm1741_vm2, %v4966_v53 }
 0xbd0   : > { %7069 = vmatprep.mubr.msk.f32.mxu0 %vm8090_vm1, %v8089_v40  ;;  %v4964_v1 = vmul.f32 %v7470_v58, %v9333_v19  ;;  %7077 = vmatprep.subr.mxu0 %v1342_v37  ;;  %vm6095_vm1 = vcmask 523264  }
 0xbd2   : > { %7070 = vmatmul.mubr.msk.f32.vlgmr.msra.gmra.mxu0 %vm1741_vm2, %v4964_v1 }
 0xbd3   : > { %7078 = vmatpush3.msra.mxu0 %v1342_v37  ;;  %v6631_v37 = vld [vmem:[#allocation26] ss:$0 sm:$0xff] }
 0xbd4   : > { %7079 = vmatprep.subr.mxu0 %v1341_v7 }
 0xbd5   : > { %7080 = vmatpush3.msra.mxu0 %v1341_v7  ;;  %v6630_v7 = vld [vmem:[#allocation25] ss:$0 sm:$0xff] }
 0xbd6   : > { %7081 = vmatprep.subr.mxu0 %v1340_v8 }
 0xbd7   : > { %7082 = vmatpush3.msra.mxu0 %v1340_v8  ;;  %v1353_v8 = vld [vmem:[%s9618_s22 + $0x38] sm:$0xff] }
 0xbd8   : > { %7083 = vmatprep.subr.mxu0 %v1339_v14  ;;  %7088 = vmatprep.subr.mxu1 %v1353_v8 }
 0xbd9   : > { %7084 = vmatpush3.msra.mxu0 %v1339_v14  ;;  %7089 = vmatpush3.msra.mxu1 %v1353_v8  ;;  %v1352_v14 = vld [vmem:[%s9618_s22 + $0x30] sm:$0xff] }
 0xbda   : > { %7090 = vmatprep.subr.mxu1 %v1352_v14 }
 0xbdb   : > { %7091 = vmatpush3.msra.mxu1 %v1352_v14 }
 0xc2e   : > { %v5039_v55 = vpop.f32.mrf.mxu0 }
 0xc30   : > { %v7041_v5 = vpop.f32.mrf.mxu0 }
 0xc33   : > { %v5115_v2 = vpop.f32.mrf.mxu1 }
 0xc35   : > { %v7046_v36 = vpop.f32.mrf.mxu1 }
 0xc86   : > { %v5267_v12 = vpop.f32.mrf.mxu1 }
 0xc87   : > { %5579 = vrot.lane.b32.xlu1 %v5267_v12, %s9530_s14  ;;  %v1349_v12 = vld [vmem:[%s9618_s22 + $0x18] sm:$0xff] }
 0xc88   : > { %v7056_v40 = vpop.f32.mrf.mxu1  ;;  %7099 = vmatprep.subr.mxu0 %v1349_v12 }
 0xc89   : > { %v1348_v40 = vld [vmem:[%s9618_s22 + $0x10] sm:$0xff] }
 0xc8a   : > { %v5191_v43 = vpop.f32.mrf.mxu0 }
 0xc8b   : > { %v5419_v6 = vpop.f32.mrf.mxu1  ;;  %5577 = vrot.lane.b32.xlu0 %v5191_v43, %s9530_s14  ;;  %v1351_v43 = vld [vmem:[%s9618_s22 + $0x28] sm:$0xff] }
 0xc8c   : > { %5587 = vrot.lane.b32.xlu1 %v5419_v6, %s8105_s25  ;;  %v7051_v9 = vpop.f32.mrf.mxu0  ;;  %v1347_v6 = vld [vmem:[%s9618_s22 + $0x8] sm:$0xff]  ;;  %7092 = vmatprep.subr.mxu1 %v1351_v43 }
 0xc8d   : > { %v7066_v15 = vpop.f32.mrf.mxu1  ;;  %v1350_v9 = vld [vmem:[%s9618_s22 + $0x20] sm:$0xff]  ;;  %7093 = vmatpush3.msra.mxu1 %v1351_v43 }
 0xc8e   : > { %v5343_v45 = vpop.f32.mrf.mxu0  ;;  %v1346_v15 = vld [vmem:[%s9618_s22] sm:$0xff]  ;;  %7094 = vmatprep.subr.mxu1 %v1350_v9 }
 0xc8f   : > { %5585 = vrot.lane.b32.xlu0 %v5343_v45, %s8105_s25  ;;  %v5571_v39 = vpop.f32.mrf.mxu1  ;;  %7095 = vmatpush3.msra.mxu1 %v1350_v9  ;;  %s9619_s25 = sld [smem:[#allocation60_spill]] }
 0xc90   : > { %v7061_v61 = vpop.f32.mrf.mxu0  ;;  %5595 = vrot.lane.b32.xlu1 %v5571_v39, %s9617_s4 }
 0xc91   : > { %v7076_v18 = vpop.f32.mrf.mxu1 }
 0xc92   : > { %v5495_v11 = vpop.f32.mrf.mxu0 }
 0xc93   : > { %5593 = vrot.lane.b32.xlu0 %v5495_v11, %s9617_s4  ;;  %s6528_s4 = sshll.u32 %s8517_s8, 4 }
 0xc94   : > { %v7071_v20 = vpop.f32.mrf.mxu0 }
 0xcb4   : > { %5701 = vadd.xlane.f32.xlu1 %v5700_v32 }
 0xcf9   : > { %v5580_v50 = vpop.permute.xlu1 %5579 }
 0xcfa   : > { %v5600_v52 = vsel %vm1741_vm2, %v5115_v2, %v5580_v50 }
 0xcfd   : > { %v5578_v26 = vpop.permute.xlu0 %5577 }
 0xcfe   : > { %v5588_v24 = vpop.permute.xlu1 %5587  ;;  %v5599_v21 = vsel %vm1741_vm2, %v5039_v55, %v5578_v26 }
 0xcff   : > { %v5602_v10 = vsel %vm3944_vm13, %v5600_v52, %v5588_v24 }
 0xd01   : > { %v5586_v25 = vpop.permute.xlu0 %5585 }
 0xd02   : > { %v5596_v19 = vpop.permute.xlu1 %5595  ;;  %v5601_v35 = vsel %vm3944_vm13, %v5599_v21, %v5586_v25 }
 0xd03   : > { %v5604_v54 = vsel %vm3947_vm14, %v5602_v10, %v5596_v19 }
 0xd05   : > { %v5594_v28 = vpop.permute.xlu0 %5593 }
 0xd06   : > { %v5603_v38 = vsel %vm3947_vm14, %v5601_v35, %v5594_v28 }
 0xd07   : > { %7085 = vmatprep.mubr.msk.f32.mxu0 %vm1381_vm0, %v5603_v38 }
 0xd08   : > { %7086 = vmatmul.mubr.msk.f32.vlgmr.msra.gmra.mxu0 %vm1381_vm0, %v5604_v54 }
 0xd09   : > { %7100 = vmatpush3.msra.mxu0 %v1349_v12 }
 0xd0a   : > { %7101 = vmatprep.subr.mxu0 %v1348_v40 }
 0xd0b   : > { %7102 = vmatpush3.msra.mxu0 %v1348_v40 }
 0xd0c   : > { %7103 = vmatprep.subr.mxu0 %v1347_v6 }
 0xd0d   : > { %7104 = vmatpush3.msra.mxu0 %v1347_v6 }
 0xd0e   : > { %7105 = vmatprep.subr.mxu0 %v1346_v15 }
 0xd0f   : > { %7106 = vmatpush3.msra.mxu0 %v1346_v15  ;;  %v1360_v15 = vld [vmem:[#allocation28 + $0x18] sm:$0xff] }
 0xd10   : > { %7110 = vmatprep.subr.mxu1 %v1360_v15 }
 0xd3d   : > { %v5702_v29 = vpop.xlane.xlu1 %5701 }
 0xdc8   : > { %v7087_v42 = vpop.f32.mrf.mxu0 }
 0xdc9   : > { %v5689_v3 = vadd.f32 %v7087_v42, %v6627_v41 }
 0xdca   : > { %v5683_v59 = vpop.f32.mrf.mxu0 }
 0xdcb   : > { %v9391_v60 = vadd.f32 %v7488_v63, %v5689_v3  ;;  %v5684_v30 = vadd.f32 %v6627_v41, %v5683_v59 }
 0xdcd   : > { %v9393_v0 = vadd.f32 %v7487_v23, %v5684_v30  ;;  %v5697_v56 = vsel %vm1381_vm0, %v9391_v60, 0.0 }
 0xdce   : > { %5698 = vadd.xlane.f32.xlu0 %v5697_v56  ;;  %v6636_v56 = vld [vmem:[%s9619_s25] ss:$0 sm:$0xff]  ;;  %s6653_s25 = sshll.u32 %s8305_s18, 8 }
 0xdcf   : > { %v5694_v17 = vsel %vm1381_vm0, %v9393_v0, 0.0 }
 0xdd2   : > { %5695 = vadd.xlane.f32.xlu0 %v5694_v17 }
 0xdd6   : > { %5704 = vadd.xlane.f32.xlu0 %v5703_v16 }
 0xe57   : > { %v5699_v44 = vpop.xlane.xlu0 %5698 }
 0xe5b   : > { %v5696_v47 = vpop.xlane.xlu0 %5695 }
 0xe5c   : > { %v5706_v49 = vadd.f32 %v5702_v29, %v5696_v47 }
 0xe5e   : > { %v5708_v51 = vmul.f32 0.015625, %v5706_v49 }
 0xe5f   : > { %v5705_v31 = vpop.xlane.xlu0 %5704 }
 0xe60   : > { %v9405_v33 = vsub.f32 %v9393_v0, %v5708_v51  ;;  %v5707_v34 = vadd.f32 %v5705_v31, %v5699_v44  ;;  %v5712_v57 = vsub.f32 %v9378_v22, %v5708_v51 }
 0xe62   : > { %v5709_v13 = vmul.f32 0.015625, %v5707_v34  ;;  %v5714_v62 = vmul.f32 %v9405_v33, %v9405_v33  ;;  %v5722_v2 = vmul.f32 %v5712_v57, %v5712_v57 }
 0xe64   : > { %v5711_v46 = vsub.f32 %v9391_v60, %v5709_v13  ;;  %v5713_v53 = vsub.f32 %v9398_v4, %v5709_v13  ;;  %v5716_v27 = vsel %vm1381_vm0, %v5714_v62, 0.0  ;;  %v5724_v36 = vsel %vm1381_vm0, %v5722_v2, 0.0 }
 0xe65   : > { %5717 = vadd.xlane.f32.xlu0 %v5716_v27 }
 0xe66   : > { %v5723_v58 = vmul.f32 %v5713_v53, %v5713_v53  ;;  %v5715_v1 = vmul.f32 %v5711_v46, %v5711_v46 }
 0xe68   : > { %v5727_v55 = vsel %vm1381_vm0, %v5723_v58, 0.0  ;;  %v5719_v5 = vsel %vm1381_vm0, %v5715_v1, 0.0 }
 0xe69   : > { %5728 = vadd.xlane.f32.xlu1 %v5727_v55  ;;  %5720 = vadd.xlane.f32.xlu0 %v5719_v5 }
 0xe6d   : > { %5725 = vadd.xlane.f32.xlu1 %v5724_v36 }
 0xe7e   : > { %5763 = vrot.lane.b32.xlu1 %v6631_v37, %s9616_s13 }
 0xe7f   : > { %5758 = vrot.lane.b32.xlu0 %v6630_v7, %s9616_s13  ;;  %s9624_s13 = sld [smem:[#allocation66_spill]] }
 0xeee   : > { %v5718_v45 = vpop.xlane.xlu0 %5717 }
 0xef2   : > { %v5721_v39 = vpop.xlane.xlu0 %5720  ;;  %v5729_v61 = vpop.xlane.xlu1 %5728 }
 0xef3   : > { %v5731_v18 = vadd.f32 %v5729_v61, %v5721_v39  ;;  %v1358_v39 = vld [vmem:[#allocation28 + $0x8] sm:$0xff]  ;;  %v1357_v61 = vld [vmem:[#allocation28] sm:$0xff] }
 0xef5   : > { %v5733_v11 = vmul.f32 0.015625, %v5731_v18  ;;  %v1369_v18 = vld [vmem:[%s8272_s17 + $0x38] sm:$0xff] }
 0xef6   : > { %v5726_v20 = vpop.xlane.xlu1 %5725  ;;  %v5759_v21 = vpop.permute.xlu0 %5758  ;;  %7121 = vmatprep.subr.mxu0 %v1369_v18 }
 0xef7   : > { %v5735_v48 = vadd.f32 1e-05, %v5733_v11  ;;  %v5730_v23 = vadd.f32 %v5726_v20, %v5718_v45  ;;  %v1359_v45 = vld [vmem:[#allocation28 + $0x10] sm:$0xff]  ;;  %v1368_v11 = vld [vmem:[%s8272_s17 + $0x30] sm:$0xff]  ;;  %v1367_v20 = vld [vmem:[%s8272_s17 + $0x28] sm:$0xff] }
 0xef9   : > { %7471 = vrsqrt.f32 %v5735_v48  ;;  %v5732_v32 = vmul.f32 0.015625, %v5730_v23  ;;  %v1366_v48 = vld [vmem:[%s8272_s17 + $0x20] sm:$0xff] }
 0xefa   : > { %v5764_v54 = vpop.permute.xlu1 %5763 }
 0xefb   : > { %v5734_v50 = vadd.f32 1e-05, %v5732_v32 }
 0xefd   : > { %7473 = vrsqrt.f32 %v5734_v50 }
 0xf06   : > { %v7472_v26 = vpop.eup %7471 }
 0xf07   : > { %v5757_v24 = vmul.f32 %v7472_v26, %v5713_v53  ;;  %v5739_v25 = vmul.f32 %v7472_v26, %v5711_v46 }
 0xf09   : > { %v5762_v28 = vmul.f32 %v5759_v21, %v5757_v24  ;;  %v5747_v10 = vmul.f32 %v6630_v7, %v5739_v25 }
 0xf0a   : > { %v7474_v19 = vpop.eup %7473 }
 0xf0b   : > { %v5756_v52 = vmul.f32 %v7474_v19, %v5712_v57  ;;  %v5738_v35 = vmul.f32 %v7474_v19, %v9405_v33  ;;  %v5767_v59 = vadd.f32 %v5764_v54, %v5762_v28  ;;  %v5755_v63 = vadd.f32 %v6631_v37, %v5747_v10  ;;  %v6639_v19 = vld [vmem:[%s9620_s12] ss:$0 sm:$0xff]  ;;  %s1288_s12 = scalar_lea.vmem [#allocation29], %s6528_s4  ;;  %s8107_s4 = smov [#allocation29]  }
 0xf0d   : > { %v5761_v38 = vmul.f32 %v5759_v21, %v5756_v52  ;;  %v5746_v41 = vmul.f32 %v6630_v7, %v5738_v35 }
 0xf0f   : > { %v5766_v42 = vadd.f32 %v5764_v54, %v5761_v38  ;;  %v5754_v3 = vadd.f32 %v6631_v37, %v5746_v41  ;;  %v6640_v38 = vld [vmem:[%s9621_s6] ss:$0 sm:$0xff]  ;;  %s6195_s6 = sshll.u32 %s1288_s12, 4  ;;  %s9470_s6 = int_to_ptr.vmem [resolvable:$true] %s6195_s6 }
 0xf11   : > { %7096 = vmatprep.mubr.msk.f32.mxu1 %vm1381_vm0, %v5766_v42  ;;  %7107 = vmatprep.mubr.msk.f32.mxu0 %vm1381_vm0, %v5754_v3  ;;  %v1365_v3 = vld [vmem:[%s8272_s17 + $0x18] sm:$0xff] }
 0xf12   : > { %7097 = vmatmul.mubr.msk.f32.vlgmr.msra.gmra.mxu1 %vm1381_vm0, %v5767_v59  ;;  %7108 = vmatmul.mubr.msk.f32.vlgmr.msra.gmra.mxu0 %vm1381_vm0, %v5755_v63  ;;  %v1364_v59 = vld [vmem:[%s8272_s17 + $0x10] sm:$0xff]  ;;  %v1363_v63 = vld [vmem:[%s8272_s17 + $0x8] sm:$0xff] }
 0xf13   : > { %7111 = vmatpush3.msra.mxu1 %v1360_v15  ;;  %7122 = vmatpush3.msra.mxu0 %v1369_v18 }
 0xf14   : > { %7112 = vmatprep.subr.mxu1 %v1359_v45  ;;  %7123 = vmatprep.subr.mxu0 %v1368_v11 }
 0xf15   : > { %7113 = vmatpush3.msra.mxu1 %v1359_v45  ;;  %7124 = vmatpush3.msra.mxu0 %v1368_v11 }
 0xf16   : > { %7114 = vmatprep.subr.mxu1 %v1358_v39  ;;  %7125 = vmatprep.subr.mxu0 %v1367_v20 }
 0xf17   : > { %7115 = vmatpush3.msra.mxu1 %v1358_v39  ;;  %7126 = vmatpush3.msra.mxu0 %v1367_v20 }
 0xf18   : > { %7116 = vmatprep.subr.mxu1 %v1357_v61  ;;  %7127 = vmatprep.subr.mxu0 %v1366_v48 }
 0xf19   : > { %7117 = vmatpush3.msra.mxu1 %v1357_v61  ;;  %7128 = vmatpush3.msra.mxu0 %v1366_v48 }
 0xf1a   : > { %7129 = vmatprep.subr.mxu0 %v1365_v3 }
 0xf1b   : > { %7130 = vmatpush3.msra.mxu0 %v1365_v3 }
 0xf1c   : > { %7131 = vmatprep.subr.mxu0 %v1364_v59 }
 0xf1d   : > { %7132 = vmatpush3.msra.mxu0 %v1364_v59 }
 0xf1e   : > { %7133 = vmatprep.subr.mxu0 %v1363_v63 }
 0xf1f   : > { %7134 = vmatpush3.msra.mxu0 %v1363_v63 }
 0xfd2   : > { %v7098_v30 = vpop.f32.mrf.mxu1  ;;  %v7109_v17 = vpop.f32.mrf.mxu0 }
 0xfd3   : > { %v5927_v16 = vadd.f32 %v7109_v17, %v7098_v30  ;;  %v1362_v30 = vld [vmem:[%s8272_s17] sm:$0xff] }
 0xfd4   : > { %v5840_v44 = vpop.f32.mrf.mxu1  ;;  %v5921_v29 = vpop.f32.mrf.mxu0  ;;  %7135 = vmatprep.subr.mxu0 %v1362_v30 }
 0xfd5   : > { %v5937_v47 = vadd.f32 %v6636_v56, %v5927_v16  ;;  %v5922_v49 = vadd.f32 %v5921_v29, %v5840_v44  ;;  %7136 = vmatpush3.msra.mxu0 %v1362_v30 }
 0xfd7   : > { %v6638_v51 = vmul.f32 -1.442695, %v5937_v47  ;;  %v5936_v31 = vadd.f32 %v6636_v56, %v5922_v49  ;;  %v6641_v56 = vld [vmem:[%s9622_s5] ss:$0 sm:$0xff]  ;;  %s9466_s5 = scalar_lea.hbm %s9624_s13, %s6653_s25  ;;  %s7937_s25 = sshll.u32 %s8107_s4, 4  ;;  %s7938_s25 = int_to_ptr.vmem [resolvable:$false] %s7937_s25 }
 0xfd8   : > { %s7939_s14 = scalar_lea.vmem %s7938_s25, 512  ;;  %p7940_p13 = scmp.lt.s32.totalorder %s9470_s6, %s7938_s25 }
 0xfd9   : > { %7475 = vpow2.f32 %v6638_v51  ;;  %v6637_v33 = vmul.f32 -1.442695, %v5936_v31  ;;  %v6644_v51 = vld [vmem:[%s9623_s15] ss:$0 sm:$0xff]  ;;  %s7933_s15 = scalar_lea.vmem %s9470_s6, 256 }
 0xfda   : > { %p7934_p6 = scmp.ne.s32.totalorder %s9470_s6, %s7933_s15  ;;  %p7941_p8 = scmp.lt.s32.totalorder %s7939_s14, %s7933_s15 }
 0xfdb   : > { %7477 = vpow2.f32 %v6637_v33 }
 0xfdc   : > { %p7935_p12 = pnand %p7934_p6, %p9625_p10  ;;  %p7942_p1 = por %p7941_p8, %p7940_p13 }
 0xfde   : > { %p7936_p9 = pneg %p7935_p12 }
 0xfe0   : > { %p7943_p7 = pnand %p7942_p1, %p7936_p9 }
 0xfe6   : > { %v7476_v34 = vpop.eup %7475 }
 0xfe7   : > { %v5945_v13 = vadd.f32 1.0, %v7476_v34 }
 0xfe8   : > { %v7478_v62 = vpop.eup %7477 }
 0xfe9   : > { %7479 = vrcp.f32 %v5945_v13  ;;  %v5944_v57 = vadd.f32 1.0, %v7478_v62 }
 0xfeb   : > { %7481 = vrcp.f32 %v5944_v57 }
 0xff6   : > { %v7480_v46 = vpop.eup %7479 }
 0xff7   : > { %v5953_v53 = vsub.f32 1.0, %v7480_v46  ;;  %v5951_v58 = vmul.f32 %v7480_v46, %v9398_v4 }
 0xff8   : > { %v7482_v27 = vpop.eup %7481 }
 0xff9   : > { %v5955_v1 = vmul.f32 %v5953_v53, %v9391_v60  ;;  %v5952_v55 = vsub.f32 1.0, %v7482_v27  ;;  %v5950_v2 = vmul.f32 %v7482_v27, %v9378_v22 }
 0xffb   : > { %v9434_v5 = vadd.f32 %v5955_v1, %v5951_v58  ;;  %v5954_v36 = vmul.f32 %v5952_v55, %v9393_v0 }
 0xffd   : > { %v5961_v37 = vsel %vm1381_vm0, %v9434_v5, 0.0  ;;  %v9440_v7 = vadd.f32 %v5954_v36, %v5950_v2 }
 0xffe   : > { %5962 = vadd.xlane.f32.xlu0 %v5961_v37 }
 0xfff   : > { %v5958_v8 = vsel %vm1381_vm0, %v9440_v7, 0.0 }
0x1000   : > { %5959 = vadd.xlane.f32.xlu1 %v5958_v8 }
0x1087   : > { %v5963_v4 = vpop.xlane.xlu0 %5962 }
0x1088   : > { %v5965_v12 = vmul.f32 0.03125, %v5963_v4 }
0x1089   : > { %v5960_v60 = vpop.xlane.xlu1 %5959 }
0x108a   : > { %v5967_v14 = vsub.f32 %v9434_v5, %v5965_v12  ;;  %v5964_v40 = vmul.f32 0.03125, %v5960_v60 }
0x108c   : > { %v5966_v22 = vsub.f32 %v9440_v7, %v5964_v40  ;;  %v5969_v43 = vmul.f32 %v5967_v14, %v5967_v14 }
0x108e   : > { %v5973_v0 = vsel %vm1381_vm0, %v5969_v43, 0.0  ;;  %v5968_v6 = vmul.f32 %v5966_v22, %v5966_v22 }
0x108f   : > { %5974 = vadd.xlane.f32.xlu1 %v5973_v0 }
0x1090   : > { %v5970_v9 = vsel %vm1381_vm0, %v5968_v6, 0.0 }
0x1091   : > { %5971 = vadd.xlane.f32.xlu0 %v5970_v9 }
0x1118   : > { %v5975_v23 = vpop.xlane.xlu1 %5974 }
0x1119   : > { %v5977_v32 = vmul.f32 0.03125, %v5975_v23 }
0x111a   : > { %v5972_v50 = vpop.xlane.xlu0 %5971 }
0x111b   : > { %v5979_v26 = vadd.f32 1e-05, %v5977_v32  ;;  %v5976_v24 = vmul.f32 0.03125, %v5972_v50 }
0x111d   : > { %7483 = vrsqrt.f32 %v5979_v26  ;;  %v5978_v25 = vadd.f32 1e-05, %v5976_v24 }
0x111f   : > { %7485 = vrsqrt.f32 %v5978_v25 }
0x112a   : > { %v7484_v21 = vpop.eup %7483 }
0x112b   : > { %v5983_v52 = vmul.f32 %v7484_v21, %v5967_v14 }
0x112c   : > { %v7486_v35 = vpop.eup %7485 }
0x112d   : > { %v5982_v28 = vmul.f32 %v7486_v35, %v5966_v22  ;;  %v5991_v10 = vmul.f32 %v6639_v19, %v5983_v52 }
0x112f   : > { %v5990_v54 = vmul.f32 %v6639_v19, %v5982_v28  ;;  %v5999_v42 = vadd.f32 %v6640_v38, %v5991_v10 }
0x1131   : > { %v5998_v41 = vadd.f32 %v6640_v38, %v5990_v54 }
0x1133   : > { %7118 = vmatprep.mubr.msk.f32.mxu1 %vm1381_vm0, %v5998_v41 }
0x1134   : > { %7119 = vmatmul.mubr.msk.f32.vlgmr.msra.gmra.mxu1 %vm1381_vm0, %v5999_v42 }
0x11f4   : > { %v7120_v17 = vpop.f32.mrf.mxu1 }
0x11f5   : > { %v6084_v16 = vadd.f32 %v7120_v17, %v6641_v56 }
0x11f6   : > { %v6078_v44 = vpop.f32.mrf.mxu1 }
0x11f7   : > { %v6079_v29 = vadd.f32 %v6641_v56, %v6078_v44  ;;  %v6088_v49 = vmax.f32 %v6084_v16, 0.0 }
0x11f9   : > { %v6087_v47 = vmax.f32 %v6079_v29, 0.0 }
0x11fb   : > { %7137 = vmatprep.mubr.msk.f32.mxu0 %vm6095_vm1, %v6087_v47 }
0x11fc   : > { %7138 = vmatmul.mubr.msk.f32.vlgmr.msra.gmra.mxu0 %vm6095_vm1, %v6088_v49 }
0x12bc   : > { %v7139_v31 = vpop.f32.mrf.mxu0 }
0x12bd   : > { %v6174_v33 = vadd.f32 %v7139_v31, %v6644_v51 }
0x12be   : > { %v6168_v34 = vpop.f32.mrf.mxu0 }
0x12bf   : > { %v6178_v13 = vadd.f32 %v6174_v33, %v9434_v5  ;;  %v6169_v62 = vadd.f32 %v6644_v51, %v6168_v34 }
0x12c1   : > { %6180 = vst.msk [vmem:[%s1288_s12 + $0x8] sm:$0xff] %vm1381_vm0, %v6178_v13  ;;  %v6177_v57 = vadd.f32 %v6169_v62, %v9440_v7 }
0x12c3   : > { %6179 = vst.msk [vmem:[%s1288_s12] sm:$0xff] %vm1381_vm0, %v6177_v57 }
0x12c4   : > { %7946 = shalt.err (!%p7943_p7)
}
0x12c5   : > { %s7947_s12 = scalar_lea.hbm %s9466_s5, 256  ;;  %s7951_s18 = scalar_lea.hbm %s9624_s13, 512 }
0x12c6   : > { %p7948_p3 = scmp.ne.s32.totalorder %s9466_s5, %s7947_s12  ;;  %p7952_p0 = scmp.lt.s32.totalorder %s9466_s5, %s9624_s13 }
0x12c7   : > { %p7953_p5 = scmp.lt.s32.totalorder %s7951_s18, %s7947_s12 }
0x12c8   : > { %p7949_p4 = pnand %p7948_p3, %p9625_p10 }
0x12c9   : > { %p7954_p2 = por %p7953_p5, %p7952_p0 }
0x12ca   : > { %p7950_p11 = pneg %p7949_p4 }
0x12cc   : > { %p7955_p6 = pnand %p7954_p2, %p7950_p11 }
0x12ce   : > { %7958 = shalt.err (!%p7955_p6)
}
0x12cf   : > { %s8108_s14 = smov 128   ;;  %s9626_s15 = smov 8  }
0x12d0   : > { %s9627_s4 = scalar_lea.sflag [#allocation4], %s8517_s8 }
0x12d1   : > { %7206 = dma.vmem_to_hbm [thread:$0]  (%p9625_p10), %s9470_s6, 256, %s9466_s5, %s9627_s4, %s8108_s14, %s8108_s14, %s9626_s15  }
0x12d2 PF: > { %s6210_s25 = sand.u32 1, %s8021_s7   ;;  %p9628_p12 = scmp.ne.s32.totalorder %s9575_s28, 0 }
0x12d3   : > { %p9629_p9 = scmp.ge.s32.totalorder %s8033_s0, 2  ;;  %s6211_s18 = scalar_lea.sflag [#allocation4], %s6210_s25 }
0x12d5   : > { %p7262_p13 = pnand %p9629_p9, %p9628_p12 }
0x12d7   : > { %p7263_p8 = pneg %p7262_p13 }
0x12d9   : > { %8016 = dma.done.wait (%p7263_p8), %s6211_s18, 256  }
0x12da   : > { %8018 = vsyncadd (%p7263_p8), %s6211_s18, 4294967040  ;;  %p88_p1 = scmp.ge.s32.totalorder %s8445_s2, 4   ;;  %s9630_s7 = smov %s8025_s10 }
0x12db   : > { %s9631_s10 = smov %s8029_s11  ;;  %s9632_s11 = smov %s8456_s23 }
0x12dc   : > { %s9633_s0 = smov %s8445_s2  ;;  %90 = sbr.rel (!%p88_p1) target bundleno = 79 (0x4f), region = 304 }
0x12e1   :  { %6216 = vsyncpa [#allocation3], 1 }
0x12e2   :  { %6218 = vsyncpa [#allocation3 + $0x1], 1 }
0x12e3   :  { %6219 = vsyncpa [#allocation6], 1 }
0x12e4   :  { %6221 = vsyncpa [#allocation6 + $0x1], 1 }
0x12e5   :  { %6222 = vsyncpa [#allocation9], 1 }
0x12e6   :  { %6223 = vsyncpa [#allocation12], 1 }
0x12e7   :  { %6224 = vsyncpa [#allocation15], 1 }
0x12e8   :  { %6225 = vsyncpa [#allocation18], 1 }
0x12e9   :  { %6226 = vsyncpa [#allocation21], 1 }
0x12ea   :  { %6227 = vsyncpa [#allocation24], 1 }
0x12eb   :  { %6228 = vsyncpa [#allocation27], 1 }
0x12ec   :  { %6229 = vsyncpa [#allocation4], 1 }
0x12ed   :  { %6231 = vsyncpa [#allocation4 + $0x1], 1 }

</bundles_post_ra>
